<compile_context>
chip_gen: v7x
topology: tpu7x:2x2x1
jax: 0.10.0
libtpu: 0.0.40
codegen_flags: <defaults>
</compile_context>

<pallas_src>
import jax
import jax.numpy as jnp
import numpy as np
from jax.experimental import pallas as pl
from jax.experimental.pallas import tpu as pltpu

GROUPS = 32       # nn.GroupNorm(32, channels)
EPS = 1e-5        # PyTorch GroupNorm default eps


# --------------------------------------------------------------------------
# Kernel
# --------------------------------------------------------------------------
def _make_kernel(Nb, H, WCi, WCo, has_shortcut):
    """Fused ResidualBlock kernel for one (Nb, H, W*C) super-block."""

    def group_norm_silu(h3, M_ref, MT_ref, gamma_ref, beta_ref):
        # h3: (Nb, H, W*C) f32, channel c of column w at lane w*C + c.
        # Per-image group stats via one fused indicator matmul (kept in f32);
        # the affine is folded into a single per-lane scale/shift.
        WC = h3.shape[2]
        inv_n = GROUPS / float(H * WC)              # 1 / elements-per-group
        s = jnp.sum(h3, axis=1)                     # (Nb, W*C)
        ss = jnp.sum(h3 * h3, axis=1)               # (Nb, W*C)
        stats = jnp.concatenate([s, ss], axis=0)    # (2*Nb, W*C)
        sg = jnp.dot(stats, M_ref[...], preferred_element_type=jnp.float32)
        mean_g = sg[:Nb] * inv_n                    # (Nb, G)
        var_g = sg[Nb:] * inv_n - mean_g * mean_g
        inv_g = jax.lax.rsqrt(var_g + EPS)
        mi = jnp.concatenate([mean_g, inv_g], axis=0)              # (2*Nb, G)
        mi_lane = jnp.dot(mi, MT_ref[...], preferred_element_type=jnp.float32)
        a = mi_lane[Nb:] * gamma_ref[...]           # (Nb, W*C): inv * gamma
        b = beta_ref[...] - mi_lane[:Nb] * a        # beta - mean * a
        hn = h3 * a[:, None, :] + b[:, None, :]
        return hn * jax.nn.sigmoid(hn)              # SiLU

    def conv3x3(h3, B_ref):
        # h3: (Nb, H, W*Ci) f32.  One banded bf16 matmul with M = Nb*H rows
        # computes all 9 taps (kw taps + channel sum folded into K); the kh
        # taps are resolved with two row-shifted slices of the result, masked
        # at per-image boundaries -- no padded VMEM scratch round-trip.
        M = Nb * H
        h2 = h3.reshape(M, h3.shape[2]).astype(B_ref.dtype)
        R = jnp.dot(h2, B_ref[...], preferred_element_type=jnp.float32)  # (M, 3*WCo)
        zrow = jnp.zeros((1, WCo), jnp.float32)
        top = jnp.concatenate([zrow, R[:M - 1, 0:WCo]], axis=0)          # R[r-1]
        mid = R[:, WCo:2 * WCo]
        bot = jnp.concatenate([R[1:, 2 * WCo:3 * WCo], zrow], axis=0)    # R[r+1]
        if Nb > 1:   # zero the kh taps that would read across image boundaries
            row = jax.lax.broadcasted_iota(jnp.int32, (M, WCo), 0) % H
            top = jnp.where(row == 0, 0.0, top)
            bot = jnp.where(row == H - 1, 0.0, bot)
        return (top + mid + bot).reshape(Nb, H, WCo)

    def kernel(x_ref, add_ref,
               g1_ref, be1_ref, M1_ref, M1T_ref, B1_ref,
               g2_ref, be2_ref, M2_ref, M2T_ref, B2_ref, b2_ref,
               *rest):
        if has_shortcut:
            Bs_ref, bs_ref, out_ref = rest
        else:
            (out_ref,) = rest

        x3 = x_ref[...]                                   # (Nb, H, W*Cin) f32

        # conv1 = GroupNorm(32, Cin) -> SiLU -> Conv2d(Cin, Cout, 3, pad=1)
        h = group_norm_silu(x3, M1_ref, M1T_ref, g1_ref, be1_ref)
        h = conv3x3(h, B1_ref)
        # + (time_emb + conv1 bias), precomputed per image in the wrapper.
        h = h + add_ref[...]                              # (Nb,1,W*Cout) bcast

        # conv2 = GroupNorm(32, Cout) -> SiLU -> Dropout -> Conv2d(Cout,Cout,3)
        h = group_norm_silu(h, M2_ref, M2T_ref, g2_ref, be2_ref)
        # Dropout(p=0.0) / eval mode -> identity.
        # TODO(synk): training-mode dropout (p>0) needs pltpu.prng_* masking.
        h = conv3x3(h, B2_ref) + b2_ref[...]

        # shortcut: 1x1 conv as a block-diagonal bf16 matmul, or identity.
        if has_shortcut:
            x2 = x3.reshape(Nb * H, WCi).astype(Bs_ref.dtype)
            sc = jnp.dot(x2, Bs_ref[...], preferred_element_type=jnp.float32)
            out_ref[...] = h + sc.reshape(Nb, H, WCo) + bs_ref[...]
        else:
            out_ref[...] = h + x3                         # identity shortcut

    return kernel


# --------------------------------------------------------------------------
# One-time weight preprocessing (hoisted out of the per-call path)
# --------------------------------------------------------------------------
def _banded_conv3x3_weights(w_oihw, W):
    """(Cout, Cin, 3, 3) -> (W*Cin, 3*W*Cout) banded matrix.

    B[win*Cin + ci, kh*W*Cout + wout*Cout + co] = w[co, ci, kh, win - wout + 1]
    when 0 <= win - wout + 1 <= 2, else 0 (zero-padding contributions vanish).
    """
    Cout, Cin, KH, KW = w_oihw.shape
    kw = np.arange(KW)[:, None, None]
    win = np.arange(W)[None, :, None]
    wout = np.arange(W)[None, None, :]
    sel = (win == wout + kw - 1).astype(np.float32)        # (3, W, W)
    B = jnp.einsum('oikl,lvw->vikwo',
                   jnp.asarray(w_oihw, jnp.float32), jnp.asarray(sel))
    return B.reshape(W * Cin, KH * W * Cout)


def _group_indicator(C, W):
    """(W*C, GROUPS) indicator: lane w*C + c -> group c // (C // GROUPS)."""
    lane_group = np.tile(np.arange(C) // (C // GROUPS), W)
    m = (lane_group[:, None] == np.arange(GROUPS)[None, :]).astype(np.float32)
    return jnp.asarray(m)


def _tile_lane(v, W):
    """Per-channel vector (C,) -> lane-dense row (1, W*C)."""
    return jnp.tile(jnp.asarray(v, jnp.float32).reshape(1, -1), (1, W))


def prepare_params(params, W):
    """Build the lane-dense / banded weights once per module."""
    Cout, Cin = params['conv1_w'].shape[:2]
    if Cin % GROUPS or Cout % GROUPS:
        raise ValueError("GroupNorm(32, C) requires C % 32 == 0")
    if (W * Cin) % 128 or (W * Cout) % 128:
        raise ValueError("lane-dense layout requires W*C to be a multiple of 128")
    has_sc = 'sc_w' in params
    if not has_sc and Cin != Cout:
        raise ValueError("identity shortcut requires in_channels == out_channels")

    prep = {
        'W': W, 'Cin': Cin, 'Cout': Cout, 'has_sc': has_sc,
        'g1': _tile_lane(params['gn1_w'], W), 'be1': _tile_lane(params['gn1_b'], W),
        'M1': _group_indicator(Cin, W),
        'B1': _banded_conv3x3_weights(params['conv1_w'], W).astype(jnp.bfloat16),
        'g2': _tile_lane(params['gn2_w'], W), 'be2': _tile_lane(params['gn2_b'], W),
        'M2': _group_indicator(Cout, W),
        'B2': _banded_conv3x3_weights(params['conv2_w'], W).astype(jnp.bfloat16),
        'b2': _tile_lane(params['conv2_b'], W),
        # time-emb linear is evaluated in the wrapper; conv1's bias is folded in.
        'time_wT': jnp.asarray(params['time_w'], jnp.float32).T,       # (Tc, Cout)
        'time_bias': (jnp.asarray(params['time_b'], jnp.float32)
                      + jnp.asarray(params['conv1_b'], jnp.float32)),  # (Cout,)
    }
    prep['M1T'] = prep['M1'].T
    prep['M2T'] = prep['M2'].T
    if has_sc:
        ws2d = jnp.asarray(params['sc_w'], jnp.float32)[:, :, 0, 0].T  # (Cin, Cout)
        prep['Bs'] = jnp.kron(jnp.eye(W, dtype=jnp.float32), ws2d).astype(jnp.bfloat16)
        prep['bs'] = _tile_lane(params['sc_b'], W)
    return prep


def _pick_block_batch(N, H, target_m=256):
    """Images per grid step: aim for ~target_m matmul rows (MXU height) while
    keeping >= 2 grid steps so both v7x TensorCores get work."""
    cap = max(1, target_m // max(H, 1))
    if N >= 2:
        cap = min(cap, N // 2)
    nb = 1
    for d in range(1, max(cap, 1) + 1):
        if N % d == 0:
            nb = d
    return nb


# --------------------------------------------------------------------------
# Forward (lane-dense API; NCHW helpers only at the network boundary)
# --------------------------------------------------------------------------
def residual_block_apply(x_lane, t, prep):
    """x_lane: (N, H, W*Cin) lane-dense (channel c of column w at lane w*Cin+c),
    t: (N, time_channels).  Returns lane-dense (N, H, W*Cout)."""
    W, Cin, Cout = prep['W'], prep['Cin'], prep['Cout']
    N, H, WCin = x_lane.shape
    assert WCin == W * Cin, "x_lane width must be W*Cin"
    WCo = W * Cout
    x_lane = x_lane.astype(jnp.float32)

    # time embedding: SiLU -> Linear as one tiny XLA GEMM, fused with conv1's
    # bias into a single lane-tiled per-image row.
    t = t.astype(jnp.float32)
    ts = t * jax.nn.sigmoid(t)
    temb = ts @ prep['time_wT'] + prep['time_bias']           # (N, Cout)
    add_rows = jnp.tile(temb, (1, W)).reshape(N, 1, WCo)      # lane-dense rows

    Nb = _pick_block_batch(N, H)
    grid = (N // Nb,)

    ops = [x_lane, add_rows,
           prep['g1'], prep['be1'], prep['M1'], prep['M1T'], prep['B1'],
           prep['g2'], prep['be2'], prep['M2'], prep['M2T'], prep['B2'],
           prep['b2']]
    if prep['has_sc']:
        ops += [prep['Bs'], prep['bs']]

    in_specs = [
        pl.BlockSpec((Nb, H, WCin), lambda n: (n, 0, 0)),
        pl.BlockSpec((Nb, 1, WCo), lambda n: (n, 0, 0)),
    ] + [pl.BlockSpec(a.shape, lambda n, _nd=a.ndim: (0,) * _nd)
         for a in ops[2:]]

    # Explicit VMEM budget: double-buffered operands + activation blocks,
    # with generous headroom for compiler temporaries.
    weight_bytes = sum(int(np.prod(a.shape)) * a.dtype.itemsize for a in ops[2:])
    block_bytes = 4 * (Nb * H * WCin + Nb * WCo + Nb * H * WCo)
    vmem_limit = int(min(64 << 20,
                         max(32 << 20, 2 * (weight_bytes + block_bytes) + (16 << 20))))

    grid_spec = pltpu.PrefetchScalarGridSpec(
        num_scalar_prefetch=0,
        grid=grid,
        in_specs=in_specs,
        out_specs=pl.BlockSpec((Nb, H, WCo), lambda n: (n, 0, 0)),
    )

    kernel = _make_kernel(Nb, H, WCin, WCo, prep['has_sc'])
    return pl.pallas_call(
        kernel,
        out_shape=jax.ShapeDtypeStruct((N, H, WCo), jnp.float32),
        grid_spec=grid_spec,
        compiler_params=pltpu.CompilerParams(
            dimension_semantics=("parallel",),     # independent super-blocks
            vmem_limit_bytes=vmem_limit),
    )(*ops)


def nchw_to_lane(x_nchw):
    N, C, H, W = x_nchw.shape
    return jnp.transpose(x_nchw, (0, 2, 3, 1)).reshape(N, H, W * C)


def lane_to_nchw(x_lane, C):
    N, H, WC = x_lane.shape
    return jnp.transpose(x_lane.reshape(N, H, WC // C, C), (0, 3, 1, 2))


# --------------------------------------------------------------------------
# Pure-JAX reference mirroring the PyTorch module (NCHW)
# --------------------------------------------------------------------------
def reference_forward(x, t, params):
    def gn(h, w, b):
        N, C, H, W = h.shape
        hg = h.reshape(N, GROUPS, C // GROUPS, H, W)
        mean = hg.mean(axis=(2, 3, 4), keepdims=True)
        var = hg.var(axis=(2, 3, 4), keepdims=True)
        hn = ((hg - mean) / jnp.sqrt(var + EPS)).reshape(N, C, H, W)
        return hn * w[None, :, None, None] + b[None, :, None, None]

    def silu(v):
        return v * jax.nn.sigmoid(v)

    def conv(h, w, b, pad):
        y = jax.lax.conv_general_dilated(
            h, w, (1, 1), [(pad, pad), (pad, pad)],
            dimension_numbers=('NCHW', 'OIHW', 'NCHW'))
        return y + b[None, :, None, None]

    h = conv(silu(gn(x, params['gn1_w'], params['gn1_b'])),
             params['conv1_w'], params['conv1_b'], 1)
    temb = silu(t) @ params['time_w'].T + params['time_b']
    h = h + temb[:, :, None, None]
    h = conv(silu(gn(h, params['gn2_w'], params['gn2_b'])),
             params['conv2_w'], params['conv2_b'], 1)
    sc = conv(x, params['sc_w'], params['sc_b'], 0) if 'sc_w' in params else x
    return h + sc


if __name__ == "__main__":
    # ResidualBlock(in_channels=32, out_channels=64, time_channels=32, dropout=0.0)
    N, Cin, Cout, Tc, H, W = 8, 32, 64, 32, 8, 8
    key = jax.random.PRNGKey(0)
    ks = jax.random.split(key, 16)
    params = {
        'gn1_w': 1.0 + 0.1 * jax.random.normal(ks[0], (Cin,), jnp.float32),
        'gn1_b': 0.1 * jax.random.normal(ks[1], (Cin,), jnp.float32),
        'conv1_w': 0.05 * jax.random.normal(ks[2], (Cout, Cin, 3, 3), jnp.float32),
        'conv1_b': 0.05 * jax.random.normal(ks[3], (Cout,), jnp.float32),
        'time_w': 0.05 * jax.random.normal(ks[4], (Cout, Tc), jnp.float32),
        'time_b': 0.05 * jax.random.normal(ks[5], (Cout,), jnp.float32),
        'gn2_w': 1.0 + 0.1 * jax.random.normal(ks[6], (Cout,), jnp.float32),
        'gn2_b': 0.1 * jax.random.normal(ks[7], (Cout,), jnp.float32),
        'conv2_w': 0.05 * jax.random.normal(ks[8], (Cout, Cout, 3, 3), jnp.float32),
        'conv2_b': 0.05 * jax.random.normal(ks[9], (Cout,), jnp.float32),
        'sc_w': 0.05 * jax.random.normal(ks[10], (Cout, Cin, 1, 1), jnp.float32),
        'sc_b': 0.05 * jax.random.normal(ks[11], (Cout,), jnp.float32),
    }
    x = jax.random.normal(ks[12], (N, Cin, H, W), jnp.float32)
    t = jax.random.normal(ks[13], (N, Tc), jnp.float32)

    prep = prepare_params(params, W)                 # one-time preprocessing
    fwd = jax.jit(lambda xl, tt: residual_block_apply(xl, tt, prep))

    x_lane = nchw_to_lane(x)                         # relayout once, at the edge
    out = lane_to_nchw(fwd(x_lane, t), Cout)
    out = jax.block_until_ready(out)

    ref = jax.block_until_ready(reference_forward(x, t, params))

    # bf16 MXU operands (f32 accumulation) -> compare at ~1e-2-level tolerance.
    if not np.allclose(np.asarray(out), np.asarray(ref), atol=5e-2, rtol=5e-2):
        max_err = float(np.max(np.abs(np.asarray(out) - np.asarray(ref))))
        raise AssertionError(f"Pallas kernel mismatch, max abs err = {max_err}")

    print("KERNEL_OK")
</pallas_src>

<mosaic_0001>
module attributes {stable_mosaic.version = 11 : i64} {
  func.func @kernel(%arg0: i32, %arg1: memref<4x8x256xf32, #tpu.memory_space<vmem>>, %arg2: memref<4x1x512xf32, #tpu.memory_space<vmem>>, %arg3: memref<1x256xf32, #tpu.memory_space<vmem>>, %arg4: memref<1x256xf32, #tpu.memory_space<vmem>>, %arg5: memref<256x32xf32, #tpu.memory_space<vmem>>, %arg6: memref<32x256xf32, #tpu.memory_space<vmem>>, %arg7: memref<256x1536xbf16, #tpu.memory_space<vmem>>, %arg8: memref<1x512xf32, #tpu.memory_space<vmem>>, %arg9: memref<1x512xf32, #tpu.memory_space<vmem>>, %arg10: memref<512x32xf32, #tpu.memory_space<vmem>>, %arg11: memref<32x512xf32, #tpu.memory_space<vmem>>, %arg12: memref<512x1536xbf16, #tpu.memory_space<vmem>>, %arg13: memref<1x512xf32, #tpu.memory_space<vmem>>, %arg14: memref<256x512xbf16, #tpu.memory_space<vmem>>, %arg15: memref<1x512xf32, #tpu.memory_space<vmem>>, %arg16: memref<4x8x512xf32, #tpu.memory_space<vmem>>) attributes {dimension_semantics = [#tpu.dimension_semantics<parallel>], iteration_bounds = array<i64: 2>, scalar_prefetch = 0 : i64, scratch_operands = 0 : i64, tpu.core_type = #tpu.core_type<tc>, window_params = [{transform_indices = @transform_0, window_bounds = array<i64: 4, 8, 256>}, {transform_indices = @transform_1, window_bounds = array<i64: 4, 1, 512>}, {pipeline_mode = #tpu.pipeline_mode<synchronous>, transform_indices = @transform_2, window_bounds = array<i64: 1, 256>}, {pipeline_mode = #tpu.pipeline_mode<synchronous>, transform_indices = @transform_3, window_bounds = array<i64: 1, 256>}, {pipeline_mode = #tpu.pipeline_mode<synchronous>, transform_indices = @transform_4, window_bounds = array<i64: 256, 32>}, {pipeline_mode = #tpu.pipeline_mode<synchronous>, transform_indices = @transform_5, window_bounds = array<i64: 32, 256>}, {pipeline_mode = #tpu.pipeline_mode<synchronous>, transform_indices = @transform_6, window_bounds = array<i64: 256, 1536>}, {pipeline_mode = #tpu.pipeline_mode<synchronous>, transform_indices = @transform_7, window_bounds = array<i64: 1, 512>}, {pipeline_mode = #tpu.pipeline_mode<synchronous>, transform_indices = @transform_8, window_bounds = array<i64: 1, 512>}, {pipeline_mode = #tpu.pipeline_mode<synchronous>, transform_indices = @transform_9, window_bounds = array<i64: 512, 32>}, {pipeline_mode = #tpu.pipeline_mode<synchronous>, transform_indices = @transform_10, window_bounds = array<i64: 32, 512>}, {pipeline_mode = #tpu.pipeline_mode<synchronous>, transform_indices = @transform_11, window_bounds = array<i64: 512, 1536>}, {pipeline_mode = #tpu.pipeline_mode<synchronous>, transform_indices = @transform_12, window_bounds = array<i64: 1, 512>}, {pipeline_mode = #tpu.pipeline_mode<synchronous>, transform_indices = @transform_13, window_bounds = array<i64: 256, 512>}, {pipeline_mode = #tpu.pipeline_mode<synchronous>, transform_indices = @transform_14, window_bounds = array<i64: 1, 512>}, {transform_indices = @transform_15, window_bounds = array<i64: 4, 8, 512>}]} {
    %c0 = arith.constant 0 : index
    %c0_0 = arith.constant 0 : index
    %c0_1 = arith.constant 0 : index
    %0 = vector.load %arg1[%c0, %c0_0, %c0_1] : memref<4x8x256xf32, #tpu.memory_space<vmem>>, vector<4x8x256xf32>
    %cst = arith.constant dense<0.000000e+00> : vector<4x256xf32>
    %1 = vector.multi_reduction <add>, %0, %cst [1] : vector<4x8x256xf32> to vector<4x256xf32>
    %2 = arith.mulf %0, %0 : vector<4x8x256xf32>
    %cst_2 = arith.constant dense<0.000000e+00> : vector<4x256xf32>
    %3 = vector.multi_reduction <add>, %2, %cst_2 [1] : vector<4x8x256xf32> to vector<4x256xf32>
    %4 = tpu.concatenate %1, %3 in 0 : vector<4x256xf32>, vector<4x256xf32> -> vector<8x256xf32>
    %c0_3 = arith.constant 0 : index
    %c0_4 = arith.constant 0 : index
    %5 = vector.load %arg5[%c0_3, %c0_4] : memref<256x32xf32, #tpu.memory_space<vmem>>, vector<256x32xf32>
    %cst_5 = arith.constant dense<0.000000e+00> : vector<8x32xf32>
    %6 = tpu.matmul %4, %5, %cst_5 {dimension_numbers = #tpu.dot_dimension_numbers<[1], [0], [0], [1], [0, 0, 1, 1], [], []>} : vector<8x256xf32>, vector<256x32xf32>, vector<8x32xf32> -> vector<8x32xf32>
    %7 = vector.extract_strided_slice %6 {offsets = [0, 0], sizes = [4, 32], strides = [1, 1]} : vector<8x32xf32> to vector<4x32xf32>
    %cst_6 = arith.constant 1.562500e-02 : f32
    %8 = vector.broadcast %cst_6 : f32 to vector<4x32xf32>
    %9 = arith.mulf %7, %8 : vector<4x32xf32>
    %10 = vector.extract_strided_slice %6 {offsets = [4, 0], sizes = [4, 32], strides = [1, 1]} : vector<8x32xf32> to vector<4x32xf32>
    %cst_7 = arith.constant 1.562500e-02 : f32
    %11 = vector.broadcast %cst_7 : f32 to vector<4x32xf32>
    %12 = arith.mulf %10, %11 : vector<4x32xf32>
    %13 = arith.mulf %9, %9 : vector<4x32xf32>
    %14 = arith.subf %12, %13 : vector<4x32xf32>
    %cst_8 = arith.constant 9.99999974E-6 : f32
    %15 = vector.broadcast %cst_8 : f32 to vector<4x32xf32>
    %16 = arith.addf %14, %15 : vector<4x32xf32>
    %17 = math.rsqrt %16 : vector<4x32xf32>
    %18 = tpu.concatenate %9, %17 in 0 : vector<4x32xf32>, vector<4x32xf32> -> vector<8x32xf32>
    %c0_9 = arith.constant 0 : index
    %c0_10 = arith.constant 0 : index
    %19 = vector.load %arg6[%c0_9, %c0_10] : memref<32x256xf32, #tpu.memory_space<vmem>>, vector<32x256xf32>
    %cst_11 = arith.constant dense<0.000000e+00> : vector<8x256xf32>
    %20 = tpu.matmul %18, %19, %cst_11 {dimension_numbers = #tpu.dot_dimension_numbers<[1], [0], [0], [1], [0, 0, 1, 1], [], []>} : vector<8x32xf32>, vector<32x256xf32>, vector<8x256xf32> -> vector<8x256xf32>
    %21 = vector.extract_strided_slice %20 {offsets = [4, 0], sizes = [4, 256], strides = [1, 1]} : vector<8x256xf32> to vector<4x256xf32>
    %c0_12 = arith.constant 0 : index
    %c0_13 = arith.constant 0 : index
    %22 = vector.load %arg3[%c0_12, %c0_13] : memref<1x256xf32, #tpu.memory_space<vmem>>, vector<1x256xf32>
    %23 = vector.broadcast %22 : vector<1x256xf32> to vector<4x256xf32>
    %24 = arith.mulf %21, %23 : vector<4x256xf32>
    %c0_14 = arith.constant 0 : index
    %c0_15 = arith.constant 0 : index
    %25 = vector.load %arg4[%c0_14, %c0_15] : memref<1x256xf32, #tpu.memory_space<vmem>>, vector<1x256xf32>
    %26 = vector.extract_strided_slice %20 {offsets = [0, 0], sizes = [4, 256], strides = [1, 1]} : vector<8x256xf32> to vector<4x256xf32>
    %27 = arith.mulf %26, %24 : vector<4x256xf32>
    %28 = vector.broadcast %25 : vector<1x256xf32> to vector<4x256xf32>
    %29 = arith.subf %28, %27 : vector<4x256xf32>
    %30 = vector.shape_cast %24 : vector<4x256xf32> to vector<4x1x256xf32>
    %31 = vector.broadcast %30 : vector<4x1x256xf32> to vector<4x8x256xf32>
    %32 = arith.mulf %0, %31 : vector<4x8x256xf32>
    %33 = vector.shape_cast %29 : vector<4x256xf32> to vector<4x1x256xf32>
    %34 = vector.broadcast %33 : vector<4x1x256xf32> to vector<4x8x256xf32>
    %35 = arith.addf %32, %34 : vector<4x8x256xf32>
    %36 = arith.negf %35 : vector<4x8x256xf32>
    %37 = math.exp %36 : vector<4x8x256xf32>
    %cst_16 = arith.constant 1.000000e+00 : f32
    %38 = vector.broadcast %cst_16 : f32 to vector<4x8x256xf32>
    %39 = arith.addf %38, %37 : vector<4x8x256xf32>
    %40 = arith.divf %38, %39 : vector<4x8x256xf32>
    %41 = arith.mulf %35, %40 : vector<4x8x256xf32>
    %42 = vector.shape_cast %41 : vector<4x8x256xf32> to vector<32x256xf32>
    %43 = arith.truncf %42 : vector<32x256xf32> to vector<32x256xbf16>
    %c0_17 = arith.constant 0 : index
    %c0_18 = arith.constant 0 : index
    %44 = vector.load %arg7[%c0_17, %c0_18] : memref<256x1536xbf16, #tpu.memory_space<vmem>>, vector<256x1536xbf16>
    %cst_19 = arith.constant dense<0.000000e+00> : vector<32x1536xf32>
    %45 = tpu.matmul %43, %44, %cst_19 {dimension_numbers = #tpu.dot_dimension_numbers<[1], [0], [0], [1], [0, 0, 1, 1], [], []>} : vector<32x256xbf16>, vector<256x1536xbf16>, vector<32x1536xf32> -> vector<32x1536xf32>
    %cst_20 = arith.constant 0.000000e+00 : f32
    %46 = vector.broadcast %cst_20 : f32 to vector<1x512xf32>
    %47 = vector.extract_strided_slice %45 {offsets = [0, 0], sizes = [31, 512], strides = [1, 1]} : vector<32x1536xf32> to vector<31x512xf32>
    %48 = tpu.concatenate %46, %47 in 0 : vector<1x512xf32>, vector<31x512xf32> -> vector<32x512xf32>
    %49 = vector.extract_strided_slice %45 {offsets = [0, 512], sizes = [32, 512], strides = [1, 1]} : vector<32x1536xf32> to vector<32x512xf32>
    %50 = vector.extract_strided_slice %45 {offsets = [1, 1024], sizes = [31, 512], strides = [1, 1]} : vector<32x1536xf32> to vector<31x512xf32>
    %51 = tpu.concatenate %50, %46 in 0 : vector<31x512xf32>, vector<1x512xf32> -> vector<32x512xf32>
    %52 = tpu.iota {dimensions = array<i32: 0>} : vector<32x512xi32>
    %c8_i32 = arith.constant 8 : i32
    %c0_i32 = arith.constant 0 : i32
    %53 = arith.cmpi eq, %c8_i32, %c0_i32 : i32
    %c1_i32 = arith.constant 1 : i32
    %54 = arith.select %53, %c1_i32, %c8_i32 : i32
    %55 = vector.broadcast %54 : i32 to vector<32x512xi32>
    %56 = arith.remsi %52, %55 : vector<32x512xi32>
    %c0_i32_21 = arith.constant 0 : i32
    %57 = vector.broadcast %c0_i32_21 : i32 to vector<32x512xi32>
    %58 = arith.cmpi ne, %56, %57 : vector<32x512xi32>
    %c0_i32_22 = arith.constant 0 : i32
    %59 = vector.broadcast %c0_i32_22 : i32 to vector<32x512xi32>
    %60 = arith.cmpi slt, %56, %59 : vector<32x512xi32>
    %c0_i32_23 = arith.constant 0 : i32
    %61 = arith.cmpi slt, %54, %c0_i32_23 : i32
    %62 = vector.broadcast %61 : i1 to vector<32x512xi1>
    %63 = vector.broadcast %62 : vector<32x512xi1> to vector<32x512xi1>
    %64 = arith.xori %60, %63 : vector<32x512xi1>
    %65 = arith.andi %64, %58 : vector<32x512xi1>
    %66 = vector.broadcast %54 : i32 to vector<32x512xi32>
    %67 = arith.addi %56, %66 : vector<32x512xi32>
    %68 = arith.select %65, %67, %56 : vector<32x512xi1>, vector<32x512xi32>
    %c0_i32_24 = arith.constant 0 : i32
    %69 = vector.broadcast %c0_i32_24 : i32 to vector<32x512xi32>
    %70 = arith.cmpi eq, %68, %69 : vector<32x512xi32>
    %cst_25 = arith.constant 0.000000e+00 : f32
    %71 = vector.broadcast %cst_25 : f32 to vector<32x512xf32>
    %72 = arith.select %70, %71, %48 : vector<32x512xi1>, vector<32x512xf32>
    %c7_i32 = arith.constant 7 : i32
    %73 = vector.broadcast %c7_i32 : i32 to vector<32x512xi32>
    %74 = arith.cmpi eq, %68, %73 : vector<32x512xi32>
    %cst_26 = arith.constant 0.000000e+00 : f32
    %75 = vector.broadcast %cst_26 : f32 to vector<32x512xf32>
    %76 = arith.select %74, %75, %51 : vector<32x512xi1>, vector<32x512xf32>
    %77 = arith.addf %72, %49 : vector<32x512xf32>
    %78 = arith.addf %77, %76 : vector<32x512xf32>
    %79 = vector.shape_cast %78 : vector<32x512xf32> to vector<4x8x512xf32>
    %c0_27 = arith.constant 0 : index
    %c0_28 = arith.constant 0 : index
    %c0_29 = arith.constant 0 : index
    %80 = vector.load %arg2[%c0_27, %c0_28, %c0_29] : memref<4x1x512xf32, #tpu.memory_space<vmem>>, vector<4x1x512xf32>
    %81 = vector.broadcast %80 : vector<4x1x512xf32> to vector<4x8x512xf32>
    %82 = arith.addf %79, %81 : vector<4x8x512xf32>
    %cst_30 = arith.constant dense<0.000000e+00> : vector<4x512xf32>
    %83 = vector.multi_reduction <add>, %82, %cst_30 [1] : vector<4x8x512xf32> to vector<4x512xf32>
    %84 = arith.mulf %82, %82 : vector<4x8x512xf32>
    %cst_31 = arith.constant dense<0.000000e+00> : vector<4x512xf32>
    %85 = vector.multi_reduction <add>, %84, %cst_31 [1] : vector<4x8x512xf32> to vector<4x512xf32>
    %86 = tpu.concatenate %83, %85 in 0 : vector<4x512xf32>, vector<4x512xf32> -> vector<8x512xf32>
    %c0_32 = arith.constant 0 : index
    %c0_33 = arith.constant 0 : index
    %87 = vector.load %arg10[%c0_32, %c0_33] : memref<512x32xf32, #tpu.memory_space<vmem>>, vector<512x32xf32>
    %cst_34 = arith.constant dense<0.000000e+00> : vector<8x32xf32>
    %88 = tpu.matmul %86, %87, %cst_34 {dimension_numbers = #tpu.dot_dimension_numbers<[1], [0], [0], [1], [0, 0, 1, 1], [], []>} : vector<8x512xf32>, vector<512x32xf32>, vector<8x32xf32> -> vector<8x32xf32>
    %89 = vector.extract_strided_slice %88 {offsets = [0, 0], sizes = [4, 32], strides = [1, 1]} : vector<8x32xf32> to vector<4x32xf32>
    %cst_35 = arith.constant 7.812500e-03 : f32
    %90 = vector.broadcast %cst_35 : f32 to vector<4x32xf32>
    %91 = arith.mulf %89, %90 : vector<4x32xf32>
    %92 = vector.extract_strided_slice %88 {offsets = [4, 0], sizes = [4, 32], strides = [1, 1]} : vector<8x32xf32> to vector<4x32xf32>
    %cst_36 = arith.constant 7.812500e-03 : f32
    %93 = vector.broadcast %cst_36 : f32 to vector<4x32xf32>
    %94 = arith.mulf %92, %93 : vector<4x32xf32>
    %95 = arith.mulf %91, %91 : vector<4x32xf32>
    %96 = arith.subf %94, %95 : vector<4x32xf32>
    %cst_37 = arith.constant 9.99999974E-6 : f32
    %97 = vector.broadcast %cst_37 : f32 to vector<4x32xf32>
    %98 = arith.addf %96, %97 : vector<4x32xf32>
    %99 = math.rsqrt %98 : vector<4x32xf32>
    %100 = tpu.concatenate %91, %99 in 0 : vector<4x32xf32>, vector<4x32xf32> -> vector<8x32xf32>
    %c0_38 = arith.constant 0 : index
    %c0_39 = arith.constant 0 : index
    %101 = vector.load %arg11[%c0_38, %c0_39] : memref<32x512xf32, #tpu.memory_space<vmem>>, vector<32x512xf32>
    %cst_40 = arith.constant dense<0.000000e+00> : vector<8x512xf32>
    %102 = tpu.matmul %100, %101, %cst_40 {dimension_numbers = #tpu.dot_dimension_numbers<[1], [0], [0], [1], [0, 0, 1, 1], [], []>} : vector<8x32xf32>, vector<32x512xf32>, vector<8x512xf32> -> vector<8x512xf32>
    %103 = vector.extract_strided_slice %102 {offsets = [4, 0], sizes = [4, 512], strides = [1, 1]} : vector<8x512xf32> to vector<4x512xf32>
    %c0_41 = arith.constant 0 : index
    %c0_42 = arith.constant 0 : index
    %104 = vector.load %arg8[%c0_41, %c0_42] : memref<1x512xf32, #tpu.memory_space<vmem>>, vector<1x512xf32>
    %105 = vector.broadcast %104 : vector<1x512xf32> to vector<4x512xf32>
    %106 = arith.mulf %103, %105 : vector<4x512xf32>
    %c0_43 = arith.constant 0 : index
    %c0_44 = arith.constant 0 : index
    %107 = vector.load %arg9[%c0_43, %c0_44] : memref<1x512xf32, #tpu.memory_space<vmem>>, vector<1x512xf32>
    %108 = vector.extract_strided_slice %102 {offsets = [0, 0], sizes = [4, 512], strides = [1, 1]} : vector<8x512xf32> to vector<4x512xf32>
    %109 = arith.mulf %108, %106 : vector<4x512xf32>
    %110 = vector.broadcast %107 : vector<1x512xf32> to vector<4x512xf32>
    %111 = arith.subf %110, %109 : vector<4x512xf32>
    %112 = vector.shape_cast %106 : vector<4x512xf32> to vector<4x1x512xf32>
    %113 = vector.broadcast %112 : vector<4x1x512xf32> to vector<4x8x512xf32>
    %114 = arith.mulf %82, %113 : vector<4x8x512xf32>
    %115 = vector.shape_cast %111 : vector<4x512xf32> to vector<4x1x512xf32>
    %116 = vector.broadcast %115 : vector<4x1x512xf32> to vector<4x8x512xf32>
    %117 = arith.addf %114, %116 : vector<4x8x512xf32>
    %118 = arith.negf %117 : vector<4x8x512xf32>
    %119 = math.exp %118 : vector<4x8x512xf32>
    %cst_45 = arith.constant 1.000000e+00 : f32
    %120 = vector.broadcast %cst_45 : f32 to vector<4x8x512xf32>
    %121 = arith.addf %120, %119 : vector<4x8x512xf32>
    %122 = arith.divf %120, %121 : vector<4x8x512xf32>
    %123 = arith.mulf %117, %122 : vector<4x8x512xf32>
    %124 = vector.shape_cast %123 : vector<4x8x512xf32> to vector<32x512xf32>
    %125 = arith.truncf %124 : vector<32x512xf32> to vector<32x512xbf16>
    %c0_46 = arith.constant 0 : index
    %c0_47 = arith.constant 0 : index
    %126 = vector.load %arg12[%c0_46, %c0_47] : memref<512x1536xbf16, #tpu.memory_space<vmem>>, vector<512x1536xbf16>
    %cst_48 = arith.constant dense<0.000000e+00> : vector<32x1536xf32>
    %127 = tpu.matmul %125, %126, %cst_48 {dimension_numbers = #tpu.dot_dimension_numbers<[1], [0], [0], [1], [0, 0, 1, 1], [], []>} : vector<32x512xbf16>, vector<512x1536xbf16>, vector<32x1536xf32> -> vector<32x1536xf32>
    %cst_49 = arith.constant 0.000000e+00 : f32
    %128 = vector.broadcast %cst_49 : f32 to vector<1x512xf32>
    %129 = vector.extract_strided_slice %127 {offsets = [0, 0], sizes = [31, 512], strides = [1, 1]} : vector<32x1536xf32> to vector<31x512xf32>
    %130 = tpu.concatenate %128, %129 in 0 : vector<1x512xf32>, vector<31x512xf32> -> vector<32x512xf32>
    %131 = vector.extract_strided_slice %127 {offsets = [0, 512], sizes = [32, 512], strides = [1, 1]} : vector<32x1536xf32> to vector<32x512xf32>
    %132 = vector.extract_strided_slice %127 {offsets = [1, 1024], sizes = [31, 512], strides = [1, 1]} : vector<32x1536xf32> to vector<31x512xf32>
    %133 = tpu.concatenate %132, %128 in 0 : vector<31x512xf32>, vector<1x512xf32> -> vector<32x512xf32>
    %134 = tpu.iota {dimensions = array<i32: 0>} : vector<32x512xi32>
    %c8_i32_50 = arith.constant 8 : i32
    %c0_i32_51 = arith.constant 0 : i32
    %135 = arith.cmpi eq, %c8_i32_50, %c0_i32_51 : i32
    %c1_i32_52 = arith.constant 1 : i32
    %136 = arith.select %135, %c1_i32_52, %c8_i32_50 : i32
    %137 = vector.broadcast %136 : i32 to vector<32x512xi32>
    %138 = arith.remsi %134, %137 : vector<32x512xi32>
    %c0_i32_53 = arith.constant 0 : i32
    %139 = vector.broadcast %c0_i32_53 : i32 to vector<32x512xi32>
    %140 = arith.cmpi ne, %138, %139 : vector<32x512xi32>
    %c0_i32_54 = arith.constant 0 : i32
    %141 = vector.broadcast %c0_i32_54 : i32 to vector<32x512xi32>
    %142 = arith.cmpi slt, %138, %141 : vector<32x512xi32>
    %c0_i32_55 = arith.constant 0 : i32
    %143 = arith.cmpi slt, %136, %c0_i32_55 : i32
    %144 = vector.broadcast %143 : i1 to vector<32x512xi1>
    %145 = vector.broadcast %144 : vector<32x512xi1> to vector<32x512xi1>
    %146 = arith.xori %142, %145 : vector<32x512xi1>
    %147 = arith.andi %146, %140 : vector<32x512xi1>
    %148 = vector.broadcast %136 : i32 to vector<32x512xi32>
    %149 = arith.addi %138, %148 : vector<32x512xi32>
    %150 = arith.select %147, %149, %138 : vector<32x512xi1>, vector<32x512xi32>
    %c0_i32_56 = arith.constant 0 : i32
    %151 = vector.broadcast %c0_i32_56 : i32 to vector<32x512xi32>
    %152 = arith.cmpi eq, %150, %151 : vector<32x512xi32>
    %cst_57 = arith.constant 0.000000e+00 : f32
    %153 = vector.broadcast %cst_57 : f32 to vector<32x512xf32>
    %154 = arith.select %152, %153, %130 : vector<32x512xi1>, vector<32x512xf32>
    %c7_i32_58 = arith.constant 7 : i32
    %155 = vector.broadcast %c7_i32_58 : i32 to vector<32x512xi32>
    %156 = arith.cmpi eq, %150, %155 : vector<32x512xi32>
    %cst_59 = arith.constant 0.000000e+00 : f32
    %157 = vector.broadcast %cst_59 : f32 to vector<32x512xf32>
    %158 = arith.select %156, %157, %133 : vector<32x512xi1>, vector<32x512xf32>
    %159 = arith.addf %154, %131 : vector<32x512xf32>
    %160 = arith.addf %159, %158 : vector<32x512xf32>
    %161 = vector.shape_cast %160 : vector<32x512xf32> to vector<4x8x512xf32>
    %c0_60 = arith.constant 0 : index
    %c0_61 = arith.constant 0 : index
    %162 = vector.load %arg13[%c0_60, %c0_61] : memref<1x512xf32, #tpu.memory_space<vmem>>, vector<1x512xf32>
    %163 = vector.shape_cast %162 : vector<1x512xf32> to vector<1x1x512xf32>
    %164 = vector.broadcast %163 : vector<1x1x512xf32> to vector<4x8x512xf32>
    %165 = arith.addf %161, %164 : vector<4x8x512xf32>
    %166 = vector.shape_cast %0 : vector<4x8x256xf32> to vector<32x256xf32>
    %167 = arith.truncf %166 : vector<32x256xf32> to vector<32x256xbf16>
    %c0_62 = arith.constant 0 : index
    %c0_63 = arith.constant 0 : index
    %168 = vector.load %arg14[%c0_62, %c0_63] : memref<256x512xbf16, #tpu.memory_space<vmem>>, vector<256x512xbf16>
    %cst_64 = arith.constant dense<0.000000e+00> : vector<32x512xf32>
    %169 = tpu.matmul %167, %168, %cst_64 {dimension_numbers = #tpu.dot_dimension_numbers<[1], [0], [0], [1], [0, 0, 1, 1], [], []>} : vector<32x256xbf16>, vector<256x512xbf16>, vector<32x512xf32> -> vector<32x512xf32>
    %170 = vector.shape_cast %169 : vector<32x512xf32> to vector<4x8x512xf32>
    %171 = arith.addf %165, %170 : vector<4x8x512xf32>
    %c0_65 = arith.constant 0 : index
    %c0_66 = arith.constant 0 : index
    %172 = vector.load %arg15[%c0_65, %c0_66] : memref<1x512xf32, #tpu.memory_space<vmem>>, vector<1x512xf32>
    %173 = vector.shape_cast %172 : vector<1x512xf32> to vector<1x1x512xf32>
    %174 = vector.broadcast %173 : vector<1x1x512xf32> to vector<4x8x512xf32>
    %175 = arith.addf %171, %174 : vector<4x8x512xf32>
    %c0_67 = arith.constant 0 : index
    %c0_68 = arith.constant 0 : index
    %c0_69 = arith.constant 0 : index
    %176 = vector.load %arg16[%c0_67, %c0_68, %c0_69] : memref<4x8x512xf32, #tpu.memory_space<vmem>>, vector<4x8x512xf32>
    tpu.vector_store %arg16[%c0_67, %c0_68, %c0_69], %175 {strides = array<i32>} : memref<4x8x512xf32, #tpu.memory_space<vmem>>, vector<4x8x512xf32>,
    return
  }
  func.func @transform_0(%arg0: i32) -> (i32, i32, i32) {
    %c0_i32 = arith.constant 0 : i32
    %c0_i32_0 = arith.constant 0 : i32
    %c0_i32_1 = arith.constant 0 : i32
    return %arg0, %c0_i32, %c0_i32_0 : i32, i32, i32
  }
  func.func @transform_1(%arg0: i32) -> (i32, i32, i32) {
    %c0_i32 = arith.constant 0 : i32
    %c0_i32_0 = arith.constant 0 : i32
    %c0_i32_1 = arith.constant 0 : i32
    return %arg0, %c0_i32, %c0_i32_0 : i32, i32, i32
  }
  func.func @transform_2(%arg0: i32) -> (i32, i32) {
    %c0_i32 = arith.constant 0 : i32
    %c0_i32_0 = arith.constant 0 : i32
    %c0_i32_1 = arith.constant 0 : i32
    return %c0_i32, %c0_i32_0 : i32, i32
  }
  func.func @transform_3(%arg0: i32) -> (i32, i32) {
    %c0_i32 = arith.constant 0 : i32
    %c0_i32_0 = arith.constant 0 : i32
    %c0_i32_1 = arith.constant 0 : i32
    return %c0_i32, %c0_i32_0 : i32, i32
  }
  func.func @transform_4(%arg0: i32) -> (i32, i32) {
    %c0_i32 = arith.constant 0 : i32
    %c0_i32_0 = arith.constant 0 : i32
    %c0_i32_1 = arith.constant 0 : i32
    return %c0_i32, %c0_i32_0 : i32, i32
  }
  func.func @transform_5(%arg0: i32) -> (i32, i32) {
    %c0_i32 = arith.constant 0 : i32
    %c0_i32_0 = arith.constant 0 : i32
    %c0_i32_1 = arith.constant 0 : i32
    return %c0_i32, %c0_i32_0 : i32, i32
  }
  func.func @transform_6(%arg0: i32) -> (i32, i32) {
    %c0_i32 = arith.constant 0 : i32
    %c0_i32_0 = arith.constant 0 : i32
    %c0_i32_1 = arith.constant 0 : i32
    return %c0_i32, %c0_i32_0 : i32, i32
  }
  func.func @transform_7(%arg0: i32) -> (i32, i32) {
    %c0_i32 = arith.constant 0 : i32
    %c0_i32_0 = arith.constant 0 : i32
    %c0_i32_1 = arith.constant 0 : i32
    return %c0_i32, %c0_i32_0 : i32, i32
  }
  func.func @transform_8(%arg0: i32) -> (i32, i32) {
    %c0_i32 = arith.constant 0 : i32
    %c0_i32_0 = arith.constant 0 : i32
    %c0_i32_1 = arith.constant 0 : i32
    return %c0_i32, %c0_i32_0 : i32, i32
  }
  func.func @transform_9(%arg0: i32) -> (i32, i32) {
    %c0_i32 = arith.constant 0 : i32
    %c0_i32_0 = arith.constant 0 : i32
    %c0_i32_1 = arith.constant 0 : i32
    return %c0_i32, %c0_i32_0 : i32, i32
  }
  func.func @transform_10(%arg0: i32) -> (i32, i32) {
    %c0_i32 = arith.constant 0 : i32
    %c0_i32_0 = arith.constant 0 : i32
    %c0_i32_1 = arith.constant 0 : i32
    return %c0_i32, %c0_i32_0 : i32, i32
  }
  func.func @transform_11(%arg0: i32) -> (i32, i32) {
    %c0_i32 = arith.constant 0 : i32
    %c0_i32_0 = arith.constant 0 : i32
    %c0_i32_1 = arith.constant 0 : i32
    return %c0_i32, %c0_i32_0 : i32, i32
  }
  func.func @transform_12(%arg0: i32) -> (i32, i32) {
    %c0_i32 = arith.constant 0 : i32
    %c0_i32_0 = arith.constant 0 : i32
    %c0_i32_1 = arith.constant 0 : i32
    return %c0_i32, %c0_i32_0 : i32, i32
  }
  func.func @transform_13(%arg0: i32) -> (i32, i32) {
    %c0_i32 = arith.constant 0 : i32
    %c0_i32_0 = arith.constant 0 : i32
    %c0_i32_1 = arith.constant 0 : i32
    return %c0_i32, %c0_i32_0 : i32, i32
  }
  func.func @transform_14(%arg0: i32) -> (i32, i32) {
    %c0_i32 = arith.constant 0 : i32
    %c0_i32_0 = arith.constant 0 : i32
    %c0_i32_1 = arith.constant 0 : i32
    return %c0_i32, %c0_i32_0 : i32, i32
  }
  func.func @transform_15(%arg0: i32) -> (i32, i32, i32) {
    %c0_i32 = arith.constant 0 : i32
    %c0_i32_0 = arith.constant 0 : i32
    %c0_i32_1 = arith.constant 0 : i32
    return %arg0, %c0_i32, %c0_i32_0 : i32, i32, i32
  }
}

</mosaic_0001>

<bundles_post_ra>
// kernel: _lambda_.1
= control target key start
LH: loop header
LB: loop body
LE: loop exit
PB: predicated region body
PF: predicated region fallthrough
CT: control target
= control target key end

     0   :  { %s13822_s0 = inlined_call_operand.vmem [shape: f32[8,8,256], index: 0, kind: input, shape index: {}]   ;;  %s13823_s1 = inlined_call_operand.vmem [shape: f32[8,1,512], index: 1, kind: input, shape index: {}]   ;;  %s13824_s2 = inlined_call_operand.vmem [shape: f32[1,256], index: 2, kind: input, shape index: {}]   ;;  %s13825_s3 = inlined_call_operand.vmem [shape: f32[1,256], index: 3, kind: input, shape index: {}]   ;;  %s13826_s4 = inlined_call_operand.vmem [shape: f32[256,32], index: 4, kind: input, shape index: {}]   ;;  %s13827_s5 = inlined_call_operand.vmem [shape: f32[32,256], index: 5, kind: input, shape index: {}]   ;;  %s13828_s6 = inlined_call_operand.vmem [shape: bf16[256,1536], index: 6, kind: input, shape index: {}]   ;;  %s13829_s7 = inlined_call_operand.vmem [shape: f32[1,512], index: 7, kind: input, shape index: {}]   ;;  %s13830_s8 = inlined_call_operand.vmem [shape: f32[1,512], index: 8, kind: input, shape index: {}]   ;;  %s13831_s9 = inlined_call_operand.vmem [shape: f32[512,32], index: 9, kind: input, shape index: {}]   ;;  %s13832_s10 = inlined_call_operand.vmem [shape: f32[32,512], index: 10, kind: input, shape index: {}]   ;;  %s13833_s11 = inlined_call_operand.vmem [shape: bf16[512,1536], index: 11, kind: input, shape index: {}]   ;;  %s13834_s12 = inlined_call_operand.vmem [shape: f32[1,512], index: 12, kind: input, shape index: {}]   ;;  %s13835_s13 = inlined_call_operand.vmem [shape: bf16[256,512], index: 13, kind: input, shape index: {}]   ;;  %s13836_s14 = inlined_call_operand.vmem [shape: f32[1,512], index: 14, kind: input, shape index: {}]   ;;  %s13837_s15 = inlined_call_operand.hbm [shape: f32[8,8,512], index: 15, kind: output, shape index: {}]  }
   0x1   :  { %13870 = sst [smem:[#allocation23_spill]] %s13822_s0 }
   0x2   :  { %13871 = sst [smem:[#allocation24_spill]] %s13824_s2 }
   0x3   :  { %20 = vsyncpa [#allocation3], 0 }
   0x4   :  { %22 = vsyncpa [#allocation3 + $0x1], 0  ;;  %s10157_s18 = smov 0   ;;  %s10159_s19 = smov 0  }
   0x5   :  { %s10161_s20 = smov 0   ;;  %s10163_s21 = smov 0  }
   0x6 LB: > { %13872 = sst [smem:[#allocation5_spill]] %s10058_s18  ;;  %s10178_s22 = sadd.s32 4294967295, %s10070_s21   ;;  %s10070_s21 = sphi %s10163_s21, %s13966_s21   ;;  %s10066_s20 = sphi %s10161_s20, %s13968_s20   ;;  %s10062_s19 = sphi %s10159_s19, %s13970_s19   ;;  %s10058_s18 = sphi %s10157_s18, %s13969_s18  }
   0x7   : > { %13873 = sst [smem:[#allocation6_spill]] %s10066_s20  ;;  %s7866_s23 = sadd.s32 4294967294, %s10070_s21  }
   0x8   : > { %13874 = sst [smem:[#allocation7_spill]] %s10070_s21  ;;  %s10182_s24 = sadd.s32 1, %s10070_s21  }
   0x9   : > { %13875 = sst [smem:[#allocation8_spill]] %s10182_s24  ;;  %s360_s25 = sadd.s32 1, %s10066_s20 }
   0xa   : > { %s357_s26 = ssub.s32 %s10070_s21, %s10182_s24  ;;  %p370_p0 = scmp.ne.s32.totalorder %s10066_s20, %s10062_s19 }
   0xb   : > { %p358_p1 = scmp.eq.s32.totalorder %s357_s26, 0  ;;  %p371_p2 = scmp.eq.s32.totalorder %s10178_s22, 1 }
   0xc   : > { %p376_p3 = scmp.ne.s32.totalorder %s10062_s19, %s10058_s18  ;;  %p377_p4 = scmp.eq.s32.totalorder %s7866_s23, 1 }
   0xd   : > { %s10193_s27 = scalar_select %p358_p1, %s10066_s20, %s360_s25  }
   0xe   : > { %p10195_p5 = por %p371_p2, %p370_p0  ;;  %p10199_p6 = por %p377_p4, %p376_p3 }
   0xf   : > { %13876 = sst [smem:[#allocation9_spill]] %s10193_s27  ;;  %p7869_p7 = scmp.ge.s32.totalorder %s10070_s21, 1 }
  0x10   : > { %s13878_s29 = scalar_select %p10199_p6, 1, 0 }
  0x11   : > { %p453_p8 = scmp.lt.s32.totalorder %s10070_s21, 3 }
  0x12   : > { %13879 = sst [smem:[#allocation10_spill]] %s13878_s29 }
  0x13   : > { %p454_p9 = pnand %p7869_p7, %p453_p8 }
  0x15   : > { %457 = sbr.rel (%p454_p9) target bundleno = 2156 (0x86c), region = 80 }
  0x1c   : > { %v690_v0 = vld [vmem:[%s13826_s4 + $0x80] sm:$0xff]  ;;  %v691_v1 = vld [vmem:[%s13826_s4 + $0x88] sm:$0xff]  ;;  %s7871_s27 = sshll.u32 %s10178_s22, 2  ;;  %v692_v5 = vld [vmem:[%s13826_s4 + $0x90] sm:$0xff]  ;;  %s13880_s0 = sld [smem:[#allocation23_spill]]  ;;  %vm641_vm0 = vcmask 1041409  }
  0x1d   : > { %v674_v2 = vld [vmem:[%s13826_s4] sm:$0xff]  ;;  %v8657_v3 = vpack.c.bf16 %v691_v1, %v690_v0  ;;  %v675_v4 = vld [vmem:[%s13826_s4 + $0x8] sm:$0xff]  ;;  %v693_v6 = vld [vmem:[%s13826_s4 + $0x98] sm:$0xff]  ;;  %p508_p10 = scmp.lt.s32.totalorder %s7871_s27, 7  ;;  %vm643_vm1 = vcmask 1042434   ;;  %vm645_vm2 = vcmask 1043459  }
  0x1e   : > { %v8659_v7 = vpack.c.bf16 %v675_v4, %v674_v2  ;;  %v8661_v8 = vpack.c.bf16 %v693_v6, %v692_v5  ;;  %v676_v9 = vld [vmem:[%s13826_s4 + $0x10] sm:$0xff]  ;;  %v677_v10 = vld [vmem:[%s13826_s4 + $0x18] sm:$0xff]  ;;  %v694_v11 = vld [vmem:[%s13826_s4 + $0xa0] sm:$0xff]  ;;  %vm660_vm3 = vcmask 1045509   ;;  %vm662_vm4 = vcmask 1046534   ;;  %s13881_s2 = sld [smem:[#allocation24_spill]] }
  0x1f   : > { %8658 = vmatprep.subr.bf16.mxu0 %v8657_v3  ;;  %v695_v12 = vld [vmem:[%s13826_s4 + $0xa8] sm:$0xff]  ;;  %v678_v13 = vld [vmem:[%s13826_s4 + $0x20] sm:$0xff]  ;;  %s13972_s27 = smov (!%p508_p10, %s7871_s27), 7  ;;  %v8663_v15 = vpack.c.bf16 %v677_v10, %v676_v9  ;;  %v696_v16 = vld [vmem:[%s13826_s4 + $0xb0] sm:$0xff]  ;;  %vm664_vm5 = vcmask 1047559   ;;  %vm671_vm6 = vcmask 1043456  }
  0x20   : > { %v679_v14 = vld [vmem:[%s13826_s4 + $0x28] sm:$0xff]  ;;  %8660 = vmatpush3.bf16.msra.mxu0 %v8659_v7  ;;  %v697_v17 = vld [vmem:[%s13826_s4 + $0xb8] sm:$0xff]  ;;  %v10253_v18 = vld [vmem:[%s13826_s4 + $0x30] sm:$0xff]  ;;  %v8665_v19 = vpack.c.bf16 %v695_v12, %v694_v11  ;;  %s8549_s25 = sshll.u32 %s13972_s27, 4  ;;  %vm13847_vm7 = vcmask 261120   ;;  %vm13846_vm8 = vcmask 1040384  }
  0x21   : > { %8662 = vmatprep.subr.bf16.mxu0 %v8661_v8  ;;  %v681_v20 = vld [vmem:[%s13826_s4 + $0x38] sm:$0xff]  ;;  %v10261_v21 = vld [vmem:[%s13826_s4 + $0xc0] sm:$0xff]  ;;  %v10266_v22 = vld [vmem:[%s13826_s4 + $0xc8] sm:$0xff]  ;;  %v8667_v29 = vpack.c.bf16 %v679_v14, %v678_v13  ;;  %v8669_v33 = vpack.c.bf16 %v697_v17, %v696_v16  ;;  %s7875_s20 = sshll.u32 %s13972_s27, 2  ;;  %vm2663_vm14 = vcmask 1046528   ;;  %s504_s24 = sand.u32 1, %s10062_s19  }
  0x22   : > { %v10272_v23 = vld [vmem:[%s13826_s4 + $0x40] sm:$0xff]  ;;  %v10277_v24 = vld [vmem:[%s13826_s4 + $0x48] sm:$0xff]  ;;  %v10282_v25 = vld [vmem:[%s13826_s4 + $0xd0] sm:$0xff]  ;;  %s10302_s21 = scalar_lea.vmem %s13880_s0, %s8549_s25  ;;  %v8671_v34 = vpack.c.bf16 %v681_v20, %v10253_v18  ;;  %v8673_v35 = vpack.c.bf16 %v10266_v22, %v10261_v21  ;;  %s518_s18 = scalar_lea.vmem %s13823_s1, %s7875_s20 }
  0x23   : > { %v10287_v26 = vld [vmem:[%s13826_s4 + $0xd8] sm:$0xff]  ;;  %v10292_v27 = vld [vmem:[%s13826_s4 + $0x50] sm:$0xff]  ;;  %v10307_v30 = vld [vmem:[%s13826_s4 + $0xe0] sm:$0xff]  ;;  %v8675_v36 = vpack.c.bf16 %v10277_v24, %v10272_v23  ;;  %s13705_s27 = sshll.u32 %s504_s24, 7  ;;  %s8551_s0 = sshll.u32 %s10178_s22, 11 }
  0x24   : > { %v10297_v28 = vld [vmem:[%s13826_s4 + $0x58] sm:$0xff]  ;;  %8664 = vmatpush3.bf16.msra.mxu0 %v8663_v15  ;;  %v10312_v31 = vld [vmem:[%s13826_s4 + $0xe8] sm:$0xff]  ;;  %v10317_v32 = vld [vmem:[%s13826_s4 + $0x60] sm:$0xff]  ;;  %v8677_v40 = vpack.c.bf16 %v10287_v26, %v10282_v25  ;;  %s13729_s29 = scalar_lea.vmem [#allocation2], %s13705_s27  ;;  %s13769_s17 = scalar_lea.hbm %s13837_s15, %s8551_s0 }
  0x25   : > { %8666 = vmatprep.subr.bf16.mxu0 %v8665_v19  ;;  %v10327_v37 = vld [vmem:[%s13826_s4 + $0x68] sm:$0xff]  ;;  %v10332_v38 = vld [vmem:[%s13826_s4 + $0xf0] sm:$0xff]  ;;  %v10337_v39 = vld [vmem:[%s13826_s4 + $0xf8] sm:$0xff]  ;;  %v8679_v41 = vpack.c.bf16 %v10297_v28, %v10292_v27  ;;  %v8681_v42 = vpack.c.bf16 %v10312_v31, %v10307_v30  ;;  %s7792_s30 = sshll.u32 %s13729_s29, 4  ;;  %s13781_s23 = scalar_lea.sflag [#allocation3], %s504_s24  ;;  %s13771_s30 = int_to_ptr.vmem [resolvable:$true] %s7792_s30 }
  0x26   : > { %v8683_v43 = vpack.c.bf16 %v10327_v37, %v10317_v32  ;;  %v10350_v44 = vld [vmem:[%s13826_s4 + $0x70] sm:$0xff]  ;;  %v10355_v45 = vld [vmem:[%s13826_s4 + $0x78] sm:$0xff]  ;;  %v522_v46 = vld [vmem:[%s10302_s21 + $0x8] sm:$0xff]  ;;  %v8685_v47 = vpack.c.bf16 %v10337_v39, %v10332_v38  ;;  %s10008_s26 = scalar_lea.vmem %s13771_s30, 2048  ;;  %s10074_s25 = smov [#allocation2]  }
  0x27   : > { %v8687_v48 = vpack.c.bf16 %v10355_v45, %v10350_v44  ;;  %v524_v49 = vld [vmem:[%s10302_s21 + $0x18] sm:$0xff]  ;;  %v526_v50 = vld [vmem:[%s10302_s21 + $0x28] sm:$0xff]  ;;  %v535_v52 = vrot.slane %v522_v46, 4  ;;  %v578_v53 = vmul.f32 %v522_v46, %v522_v46  ;;  %v521_v26 = vld [vmem:[%s10302_s21] sm:$0xff]  ;;  %p10009_p11 = scmp.ne.s32.totalorder %s13771_s30, %s10008_s26 }
  0x28   : > { %v528_v51 = vld [vmem:[%s10302_s21 + $0x38] sm:$0xff]  ;;  %8668 = vmatpush3.bf16.msra.mxu0 %v8667_v29  ;;  %v547_v54 = vrot.slane %v524_v49, 4  ;;  %v559_v55 = vrot.slane %v526_v50, 4  ;;  %v580_v57 = vmul.f32 %v524_v49, %v524_v49  ;;  %v582_v59 = vmul.f32 %v526_v50, %v526_v50 }
  0x29   : > { %v571_v56 = vrot.slane %v528_v51, 4  ;;  %8670 = vmatprep.subr.bf16.mxu0 %v8669_v33  ;;  %v536_v58 = vadd.f32 %v535_v52, %v522_v46  ;;  %v584_v60 = vmul.f32 %v528_v51, %v528_v51  ;;  %v591_v61 = vrot.slane %v578_v53, 4  ;;  %v523_v46 = vld [vmem:[%s10302_s21 + $0x10] sm:$0xff]  ;;  %p10010_p12 = pnand %p10009_p11, %p10195_p5 }
  0x2a   : > { %v548_v62 = vadd.f32 %v547_v54, %v524_v49  ;;  %v560_v63 = vadd.f32 %v559_v55, %v526_v50  ;;  %v603_v1 = vrot.slane %v580_v57, 4  ;;  %v615_v4 = vrot.slane %v582_v59, 4  ;;  %v525_v49 = vld [vmem:[%s10302_s21 + $0x20] sm:$0xff] }
  0x2b   : > { %v572_v0 = vadd.f32 %v571_v56, %v528_v51  ;;  %v537_v2 = vrot.slane %v536_v58, 2  ;;  %v592_v3 = vadd.f32 %v591_v61, %v578_v53  ;;  %v627_v5 = vrot.slane %v584_v60, 4  ;;  %p10011_p13 = pneg %p10010_p12 }
  0x2c   : > { %8672 = vmatpush3.bf16.msra.mxu0 %v8671_v34  ;;  %v549_v6 = vrot.slane %v548_v62, 2  ;;  %v561_v7 = vrot.slane %v560_v63, 2  ;;  %v604_v9 = vadd.f32 %v603_v1, %v580_v57  ;;  %v616_v12 = vadd.f32 %v615_v4, %v582_v59 }
  0x2d   : > { %v573_v8 = vrot.slane %v572_v0, 2  ;;  %8674 = vmatprep.subr.bf16.mxu0 %v8673_v35  ;;  %v538_v10 = vadd.f32 %v537_v2, %v536_v58  ;;  %v593_v11 = vrot.slane %v592_v3, 2  ;;  %v628_v13 = vadd.f32 %v627_v5, %v584_v60  ;;  %v527_v58 = vld [vmem:[%s10302_s21 + $0x30] sm:$0xff] }
  0x2e   : > { %v550_v14 = vadd.f32 %v549_v6, %v548_v62  ;;  %v562_v15 = vadd.f32 %v561_v7, %v560_v63  ;;  %v605_v17 = vrot.slane %v604_v9, 2  ;;  %v617_v20 = vrot.slane %v616_v12, 2 }
  0x2f   : > { %v574_v16 = vadd.f32 %v573_v8, %v572_v0  ;;  %v539_v18 = vrot.slane %v538_v10, 1  ;;  %v594_v19 = vadd.f32 %v593_v11, %v592_v3  ;;  %v629_v21 = vrot.slane %v628_v13, 2 }
  0x30   : > { %8676 = vmatpush3.bf16.msra.mxu0 %v8675_v36  ;;  %v551_v22 = vrot.slane %v550_v14, 1  ;;  %v563_v23 = vrot.slane %v562_v15, 1  ;;  %v606_v25 = vadd.f32 %v605_v17, %v604_v9  ;;  %v618_v34 = vadd.f32 %v617_v20, %v616_v12 }
  0x31   : > { %v575_v24 = vrot.slane %v574_v16, 1  ;;  %8678 = vmatprep.subr.bf16.mxu0 %v8677_v40  ;;  %v540_v29 = vadd.f32 %v539_v18, %v538_v10  ;;  %v595_v33 = vrot.slane %v594_v19, 1  ;;  %v630_v35 = vadd.f32 %v629_v21, %v628_v13 }
  0x32   : > { %v552_v50 = vadd.f32 %v551_v22, %v550_v14  ;;  %v564_v51 = vadd.f32 %v563_v23, %v562_v15  ;;  %v607_v53 = vrot.slane %v606_v25, 1  ;;  %v619_v55 = vrot.slane %v618_v34, 1 }
  0x33   : > { %v576_v52 = vadd.f32 %v575_v24, %v574_v16  ;;  %v596_v54 = vadd.f32 %v595_v33, %v594_v19  ;;  %v631_v36 = vrot.slane %v630_v35, 1  ;;  %v529_v56 = vrot.slane %v521_v26, 4 }
  0x34   : > { %8680 = vmatpush3.bf16.msra.mxu0 %v8679_v41  ;;  %v608_v40 = vadd.f32 %v607_v53, %v606_v25  ;;  %v647_v57 = vsel %vm641_vm0, %v552_v50, %v540_v29  ;;  %v541_v59 = vrot.slane %v523_v46, 4  ;;  %v553_v60 = vrot.slane %v525_v49, 4 }
  0x35   : > { %8682 = vmatprep.subr.bf16.mxu0 %v8681_v42  ;;  %v620_v61 = vadd.f32 %v619_v55, %v618_v34  ;;  %v632_v62 = vadd.f32 %v631_v36, %v630_v35  ;;  %v648_v63 = vsel %vm643_vm1, %v564_v51, %v647_v57  ;;  %v530_v0 = vadd.f32 %v529_v56, %v521_v26 }
  0x36   : > { %v649_v1 = vsel %vm645_vm2, %v576_v52, %v648_v63  ;;  %v666_v27 = vsel %vm660_vm3, %v608_v40, %v596_v54  ;;  %v542_v28 = vadd.f32 %v541_v59, %v523_v46  ;;  %v554_v41 = vadd.f32 %v553_v60, %v525_v49  ;;  %v785_v63 = vld [vmem:[%s13827_s5] sm:$0xff] }
  0x37   : > { %v667_v2 = vsel %vm662_vm4, %v620_v61, %v666_v27  ;;  %v531_v3 = vrot.slane %v530_v0, 2  ;;  %v565_v4 = vrot.slane %v527_v58, 4  ;;  %v577_v5 = vmul.f32 %v521_v26, %v521_v26  ;;  %v786_v61 = vld [vmem:[%s13827_s5 + $0x8] sm:$0xff] }
  0x38   : > { %8684 = vmatpush3.bf16.msra.mxu0 %v8683_v43  ;;  %v668_v30 = vsel %vm664_vm5, %v632_v62, %v667_v2  ;;  %v543_v31 = vrot.slane %v542_v28, 2  ;;  %v555_v42 = vrot.slane %v554_v41, 2  ;;  %v579_v6 = vmul.f32 %v523_v46, %v523_v46  ;;  %v788_v62 = vld [vmem:[%s13827_s5 + $0x18] sm:$0xff]  ;;  %v790_v27 = vld [vmem:[%s13827_s5 + $0x28] sm:$0xff] }
  0x39   : > { %8686 = vmatprep.subr.bf16.mxu0 %v8685_v47  ;;  %v673_v7 = vsel %vm671_vm6, %v649_v1, %v668_v30  ;;  %v532_v8 = vadd.f32 %v531_v3, %v530_v0  ;;  %v566_v9 = vadd.f32 %v565_v4, %v527_v58  ;;  %v581_v10 = vmul.f32 %v525_v49, %v525_v49  ;;  %v787_v1 = vld [vmem:[%s13827_s5 + $0x10] sm:$0xff]  ;;  %v789_v4 = vld [vmem:[%s13827_s5 + $0x20] sm:$0xff] }
  0x3a   : > { %770 = vmatprep.mubr.f32.mxu0 %v673_v7  ;;  %v544_v11 = vadd.f32 %v543_v31, %v542_v28  ;;  %v556_v12 = vadd.f32 %v555_v42, %v554_v41  ;;  %v583_v13 = vmul.f32 %v527_v58, %v527_v58  ;;  %v585_v32 = vrot.slane %v577_v5, 4  ;;  %v792_v28 = vld [vmem:[%s13827_s5 + $0x38] sm:$0xff]  ;;  %v8934_v31 = vld [vmem:[%s13828_s6 + $0x4] ss:$48 sps:$4 sm:$0xff]  }
  0x3b   : > { %v533_v37 = vrot.slane %v532_v8, 1  ;;  %v567_v43 = vrot.slane %v566_v9, 2  ;;  %v597_v14 = vrot.slane %v579_v6, 4  ;;  %v609_v15 = vrot.slane %v581_v10, 4  ;;  %v8935_v42 = vld [vmem:[%s13828_s6 + $0x8] ss:$48 sps:$4 sm:$0xff]  }
  0x3c   : > { %8688 = vmatpush3.bf16.msra.mxu0 %v8687_v48  ;;  %v545_v38 = vrot.slane %v544_v11, 1  ;;  %v557_v39 = vrot.slane %v556_v12, 1  ;;  %v586_v47 = vadd.f32 %v585_v32, %v577_v5  ;;  %v621_v16 = vrot.slane %v583_v13, 4  ;;  %v791_v5 = vld [vmem:[%s13827_s5 + $0x30] sm:$0xff]  ;;  %v8941_v7 = vld [vmem:[%s13828_s6 + $0x68] ss:$48 sps:$4 sm:$0xff]  }
  0x3d   : > { %v534_v17 = vadd.f32 %v533_v37, %v532_v8  ;;  %v568_v18 = vadd.f32 %v567_v43, %v566_v9  ;;  %v598_v19 = vadd.f32 %v597_v14, %v579_v6  ;;  %v610_v20 = vadd.f32 %v609_v15, %v581_v10  ;;  %v8937_v6 = vld [vmem:[%s13828_s6 + $0xc] ss:$48 sps:$4 sm:$0xff]   ;;  %v8947_v9 = vld [vmem:[%s13828_s6 + $0xc8] ss:$48 sps:$4 sm:$0xff]  }
  0x3e   : > { %v546_v21 = vadd.f32 %v545_v38, %v544_v11  ;;  %v587_v22 = vrot.slane %v586_v47, 2  ;;  %v622_v23 = vadd.f32 %v621_v16, %v583_v13  ;;  %v558_v29 = vadd.f32 %v557_v39, %v556_v12  ;;  %v8943_v8 = vld [vmem:[%s13828_s6 + $0x6c] ss:$48 sps:$4 sm:$0xff]   ;;  %2317 = vmatprep.subr.bf16.mxu0 %v8937_v6  ;;  %v8932_v38 = vld [vmem:[%s13828_s6] ss:$48 sps:$4 sm:$0xff]  }
  0x3f   : > { %v569_v24 = vrot.slane %v568_v18, 1  ;;  %v599_v25 = vrot.slane %v598_v19, 2  ;;  %v611_v26 = vrot.slane %v610_v20, 2  ;;  %v8689_v0 = vpack.c.bf16 %v788_v62, %v786_v61  ;;  %v8949_v10 = vld [vmem:[%s13828_s6 + $0xcc] ss:$48 sps:$4 sm:$0xff]  }
  0x40   : > { %v588_v33 = vadd.f32 %v587_v22, %v586_v47  ;;  %v623_v34 = vrot.slane %v622_v23, 2  ;;  %v642_v45 = vsel %vm641_vm0, %v546_v21, %v534_v17  ;;  %v13844_v41 = vmov 0.0   ;;  %v8940_v47 = vld [vmem:[%s13828_s6 + $0x64] ss:$48 sps:$4 sm:$0xff]   ;;  %v8938_v17 = vld [vmem:[%s13828_s6 + $0x60] ss:$48 sps:$4 sm:$0xff]  }
  0x41   : > { %v600_v35 = vadd.f32 %v599_v25, %v598_v19  ;;  %v612_v44 = vadd.f32 %v611_v26, %v610_v20  ;;  %v570_v49 = vadd.f32 %v569_v24, %v568_v18  ;;  %v644_v54 = vsel %vm643_vm1, %v558_v29, %v642_v45  ;;  %861 = vmatprep.mubr.f32.mxu1 %v13844_v41  ;;  %v8946_v18 = vld [vmem:[%s13828_s6 + $0xc4] ss:$48 sps:$4 sm:$0xff]   ;;  %v8944_v19 = vld [vmem:[%s13828_s6 + $0xc0] ss:$48 sps:$4 sm:$0xff]   ;;  %v8955_v21 = vld [vmem:[%s13828_s6 + $0x12c] ss:$48 sps:$4 sm:$0xff]  }
  0x42   : > { %v589_v48 = vrot.slane %v588_v33, 1  ;;  %v624_v46 = vadd.f32 %v623_v34, %v622_v23  ;;  %v8691_v2 = vpack.c.bf16 %v787_v1, %v785_v63  ;;  %v8693_v3 = vpack.c.bf16 %v792_v28, %v790_v27  ;;  %8690 = vmatprep.subr.bf16.mxu1 %v8689_v0  ;;  %v8952_v20 = vld [vmem:[%s13828_s6 + $0x124] ss:$48 sps:$4 sm:$0xff]   ;;  %v8950_v22 = vld [vmem:[%s13828_s6 + $0x120] ss:$48 sps:$4 sm:$0xff]  }
  0x43   : > { %v601_v50 = vrot.slane %v600_v35, 1  ;;  %v613_v51 = vrot.slane %v612_v44, 1  ;;  %v646_v40 = vsel %vm645_vm2, %v570_v49, %v644_v54  ;;  %v8695_v30 = vpack.c.bf16 %v791_v5, %v789_v4  ;;  %v8953_v23 = vld [vmem:[%s13828_s6 + $0x128] ss:$48 sps:$4 sm:$0xff]   ;;  %v8958_v24 = vld [vmem:[%s13828_s6 + $0x184] ss:$48 sps:$4 sm:$0xff]  }
  0x44   : > { %v590_v52 = vadd.f32 %v589_v48, %v588_v33  ;;  %v625_v53 = vrot.slane %v624_v46, 1  ;;  %8692 = vmatpush1.bf16.msra.mxu1 %v8691_v2  ;;  %v8961_v25 = vld [vmem:[%s13828_s6 + $0x18c] ss:$48 sps:$4 sm:$0xff]   ;;  %v8956_v26 = vld [vmem:[%s13828_s6 + $0x180] ss:$48 sps:$4 sm:$0xff]  }
  0x45   : > { %v602_v55 = vadd.f32 %v601_v50, %v600_v35  ;;  %v614_v36 = vadd.f32 %v613_v51, %v612_v44  ;;  %8694 = vmatprep.subr.bf16.mxu1 %v8693_v3  ;;  %v8959_v29 = vld [vmem:[%s13828_s6 + $0x188] ss:$48 sps:$4 sm:$0xff]   ;;  %v8964_v33 = vld [vmem:[%s13828_s6 + $0x1e4] ss:$48 sps:$4 sm:$0xff]   ;;  %v8967_v34 = vld [vmem:[%s13828_s6 + $0x1ec] ss:$48 sps:$4 sm:$0xff]  }
  0x46   : > { %v626_v56 = vadd.f32 %v625_v53, %v624_v46  ;;  %v8962_v35 = vld [vmem:[%s13828_s6 + $0x1e0] ss:$48 sps:$4 sm:$0xff]   ;;  %v8965_v44 = vld [vmem:[%s13828_s6 + $0x1e8] ss:$48 sps:$4 sm:$0xff]   ;;  %v8970_v45 = vld [vmem:[%s13828_s6 + $0x244] ss:$48 sps:$4 sm:$0xff]  }
  0x47   : > { %v661_v57 = vsel %vm660_vm3, %v602_v55, %v590_v52  ;;  %v8973_v48 = vld [vmem:[%s13828_s6 + $0x24c] ss:$48 sps:$4 sm:$0xff]   ;;  %v8968_v46 = vld [vmem:[%s13828_s6 + $0x240] ss:$48 sps:$4 sm:$0xff]   ;;  %v8971_v49 = vld [vmem:[%s13828_s6 + $0x248] ss:$48 sps:$4 sm:$0xff]  }
  0x48   : > { %v663_v58 = vsel %vm662_vm4, %v614_v36, %v661_v57  ;;  %8696 = vmatpush1.bf16.msra.mxu1 %v8695_v30  ;;  %v8976_v50 = vld [vmem:[%s13828_s6 + $0x2a4] ss:$48 sps:$4 sm:$0xff]   ;;  %v8979_v51 = vld [vmem:[%s13828_s6 + $0x2ac] ss:$48 sps:$4 sm:$0xff]   ;;  %v8974_v52 = vld [vmem:[%s13828_s6 + $0x2a0] ss:$48 sps:$4 sm:$0xff]  }
  0x49   : > { %v665_v59 = vsel %vm664_vm5, %v626_v56, %v663_v58  ;;  %2264 = vmatprep.subr.bf16.mxu1 %v8934_v31  ;;  %v8977_v53 = vld [vmem:[%s13828_s6 + $0x2a8] ss:$48 sps:$4 sm:$0xff]   ;;  %v8982_v54 = vld [vmem:[%s13828_s6 + $0x304] ss:$48 sps:$4 sm:$0xff]   ;;  %v8985_v55 = vld [vmem:[%s13828_s6 + $0x30c] ss:$48 sps:$4 sm:$0xff]  }
  0x4a   : > { %v672_v60 = vsel %vm671_vm6, %v646_v40, %v665_v59  ;;  %v8980_v36 = vld [vmem:[%s13828_s6 + $0x300] ss:$48 sps:$4 sm:$0xff]   ;;  %v8983_v56 = vld [vmem:[%s13828_s6 + $0x308] ss:$48 sps:$4 sm:$0xff]   ;;  %v8988_v40 = vld [vmem:[%s13828_s6 + $0x364] ss:$48 sps:$4 sm:$0xff]  }
  0x4b   : > { %771 = vmatmul.mubr.f32.vlgmr.msra.gmra.mrb[0].mxu0 %v672_v60  ;;  %v8991_v57 = vld [vmem:[%s13828_s6 + $0x36c] ss:$48 sps:$4 sm:$0xff]   ;;  %v8986_v58 = vld [vmem:[%s13828_s6 + $0x360] ss:$48 sps:$4 sm:$0xff]   ;;  %v8989_v59 = vld [vmem:[%s13828_s6 + $0x368] ss:$48 sps:$4 sm:$0xff]  }
  0x4c   : > { %2318 = vmatpush1.bf16.msra.mxu0 %v8935_v42  ;;  %v8994_v60 = vld [vmem:[%s13828_s6 + $0x3c4] ss:$48 sps:$4 sm:$0xff]   ;;  %v8997_v61 = vld [vmem:[%s13828_s6 + $0x3cc] ss:$48 sps:$4 sm:$0xff]   ;;  %v8992_v62 = vld [vmem:[%s13828_s6 + $0x3c0] ss:$48 sps:$4 sm:$0xff]  }
  0x4d   : > { %2319 = vmatprep.subr.bf16.mxu0 %v8943_v8  ;;  %v8995_v63 = vld [vmem:[%s13828_s6 + $0x3c8] ss:$48 sps:$4 sm:$0xff]   ;;  %v9000_v0 = vld [vmem:[%s13828_s6 + $0x424] ss:$48 sps:$4 sm:$0xff]   ;;  %v9003_v1 = vld [vmem:[%s13828_s6 + $0x42c] ss:$48 sps:$4 sm:$0xff]  }
  0x4e   : > { %v8998_v27 = vld [vmem:[%s13828_s6 + $0x420] ss:$48 sps:$4 sm:$0xff]   ;;  %v9001_v28 = vld [vmem:[%s13828_s6 + $0x428] ss:$48 sps:$4 sm:$0xff]   ;;  %v9006_v2 = vld [vmem:[%s13828_s6 + $0x484] ss:$48 sps:$4 sm:$0xff]  }
  0x4f   : > { %v9009_v3 = vld [vmem:[%s13828_s6 + $0x48c] ss:$48 sps:$4 sm:$0xff]   ;;  %v9004_v4 = vld [vmem:[%s13828_s6 + $0x480] ss:$48 sps:$4 sm:$0xff]   ;;  %v9007_v5 = vld [vmem:[%s13828_s6 + $0x488] ss:$48 sps:$4 sm:$0xff]  }
  0x50   : > { %2320 = vmatpush1.bf16.msra.mxu0 %v8941_v7  ;;  %v9012_v30 = vld [vmem:[%s13828_s6 + $0x4e4] ss:$48 sps:$4 sm:$0xff]   ;;  %v9015_v31 = vld [vmem:[%s13828_s6 + $0x4ec] ss:$48 sps:$4 sm:$0xff]   ;;  %v9010_v42 = vld [vmem:[%s13828_s6 + $0x4e0] ss:$48 sps:$4 sm:$0xff]  }
  0x51   : > { %2321 = vmatprep.subr.bf16.mxu0 %v8949_v10  ;;  %v9013_v6 = vld [vmem:[%s13828_s6 + $0x4e8] ss:$48 sps:$4 sm:$0xff]   ;;  %v9018_v7 = vld [vmem:[%s13828_s6 + $0x544] ss:$48 sps:$4 sm:$0xff]   ;;  %v9021_v8 = vld [vmem:[%s13828_s6 + $0x54c] ss:$48 sps:$4 sm:$0xff]  }
  0x52   : > { %v9019_v10 = vld [vmem:[%s13828_s6 + $0x548] ss:$48 sps:$4 sm:$0xff]  }
  0x54   : > { %2322 = vmatpush1.bf16.msra.mxu0 %v8947_v9  ;;  %v9016_v9 = vld [vmem:[%s13828_s6 + $0x540] ss:$48 sps:$4 sm:$0xff]  }
  0x55   : > { %2323 = vmatprep.subr.bf16.mxu0 %v8955_v21 }
  0x58   : > { %2324 = vmatpush1.bf16.msra.mxu0 %v8953_v23 }
  0x59   : > { %2325 = vmatprep.subr.bf16.mxu0 %v8961_v25 }
  0x5c   : > { %2326 = vmatpush1.bf16.msra.mxu0 %v8959_v29 }
  0x5d   : > { %2327 = vmatprep.subr.bf16.mxu0 %v8967_v34 }
  0x60   : > { %2328 = vmatpush1.bf16.msra.mxu0 %v8965_v44 }
  0x61   : > { %2329 = vmatprep.subr.bf16.mxu0 %v8973_v48 }
  0x64   : > { %2330 = vmatpush1.bf16.msra.mxu0 %v8971_v49 }
  0x65   : > { %2331 = vmatprep.subr.bf16.mxu0 %v8979_v51 }
  0x68   : > { %2332 = vmatpush1.bf16.msra.mxu0 %v8977_v53 }
  0x69   : > { %2333 = vmatprep.subr.bf16.mxu0 %v8985_v55 }
  0x6c   : > { %2334 = vmatpush1.bf16.msra.mxu0 %v8983_v56 }
  0x6d   : > { %2335 = vmatprep.subr.bf16.mxu0 %v8991_v57 }
  0x70   : > { %2336 = vmatpush1.bf16.msra.mxu0 %v8989_v59 }
  0x71   : > { %2337 = vmatprep.subr.bf16.mxu0 %v8997_v61 }
  0x74   : > { %2338 = vmatpush1.bf16.msra.mxu0 %v8995_v63 }
  0x75   : > { %2339 = vmatprep.subr.bf16.mxu0 %v9003_v1 }
  0x78   : > { %2340 = vmatpush1.bf16.msra.mxu0 %v9001_v28 }
  0x79   : > { %2341 = vmatprep.subr.bf16.mxu0 %v9009_v3 }
  0x7c   : > { %2342 = vmatpush1.bf16.msra.mxu0 %v9007_v5 }
  0x7d   : > { %2343 = vmatprep.subr.bf16.mxu0 %v9015_v31 }
  0x80   : > { %2344 = vmatpush1.bf16.msra.mxu0 %v9013_v6 }
  0x81   : > { %2345 = vmatprep.subr.bf16.mxu0 %v9021_v8 }
  0x84   : > { %2346 = vmatpush1.bf16.msra.mxu0 %v9019_v10 }
 0x11e   : > { %v8584_v11 = vpop.f32.mrb[0].mxu0 }
 0x11f   : > { %v8585_v12 = vpop.f32.mrb[1].mxu0 }
 0x120   : > { %v8586_v13 = vadd.f32 %v8585_v12, %v8584_v11  ;;  %v9024_v11 = vld [vmem:[%s13828_s6 + $0x5a4] ss:$48 sps:$4 sm:$0xff]   ;;  %v9022_v12 = vld [vmem:[%s13828_s6 + $0x5a0] ss:$48 sps:$4 sm:$0xff]  }
 0x122   : > { %v776_v32 = vmul.f32 0.015625, %v8586_v13  ;;  %v9025_v13 = vld [vmem:[%s13828_s6 + $0x5a8] ss:$48 sps:$4 sm:$0xff]  }
 0x124   : > { %v777_v37 = vmul.f32 %v776_v32, %v776_v32 }
 0x126   : > { %v779_v43 = vrot.slane %v777_v37, 4  ;;  %v9030_v37 = vld [vmem:[%s13828_s6 + $0x14] ss:$48 sps:$4 sm:$0xff]  }
 0x128   : > { %v781_v14 = vsub.f32 %v776_v32, %v779_v43  ;;  %v9033_v43 = vld [vmem:[%s13828_s6 + $0x1c] ss:$48 sps:$4 sm:$0xff]  }
 0x12a   : > { %v782_v15 = vadd.f32 1e-05, %v781_v14  ;;  %v870_v14 = vlaneseq }
 0x12c   : > { %9892 = vrsqrt.f32 %v782_v15  ;;  %v10623_v15 = vshrl.u32 %v870_v14, 7 }
 0x136   : > { %v9893_v39 = vpop.eup %9892 }
 0x137   : > { %v784_v16 = vsel %vm671_vm6, %v776_v32, %v9893_v39  ;;  %v9027_v32 = vld [vmem:[%s13828_s6 + $0x5ac] ss:$48 sps:$4 sm:$0xff]   ;;  %v868_v39 = vld [vmem:[%s13881_s2] sm:$0x3] }
 0x138   : > { %7876 = vmatmul.mubr.msk.f32.vlgmr.msra.gmra.mrb[0].mxu1 %vm13847_vm7, %v784_v16  ;;  %2347 = vmatprep.subr.bf16.mxu0 %v9027_v32  ;;  %v10073_v16 = vmov 1966171168  }
 0x139   : > { %2265 = vmatpush1.bf16.msra.mxu1 %v8932_v38  ;;  %2348 = vmatpush1.bf16.msra.mxu0 %v9025_v13  ;;  %v10626_v38 = vsub.s32 0, %v10623_v15  ;;  %v9998_v13 = vld [vmem:[%s10302_s21 + $0x30] sm:$0xff] }
 0x13a   : > { %2266 = vmatprep.subr.bf16.mxu1 %v8940_v47  ;;  %2423 = vmatprep.subr.bf16.mxu0 %v9033_v43  ;;  %v10632_v47 = vsub.s32 1, %v10623_v15 }
 0x13d   : > { %2267 = vmatpush1.bf16.msra.mxu1 %v8938_v17  ;;  %v906_v17 = vunpack.c.l.s4 %v10073_v16  ;;  %v9999_v16 = vld [vmem:[%s10302_s21 + $0x38] sm:$0xff] }
 0x13e   : > { %2268 = vmatprep.subr.bf16.mxu1 %v8946_v18  ;;  %v873_v18 = vrot.slane %v868_v39, %v10626_v38 }
 0x141   : > { %2269 = vmatpush1.bf16.msra.mxu1 %v8944_v19  ;;  %v877_v19 = vrot.slane %v868_v39, %v10632_v47 }
 0x142   : > { %2270 = vmatprep.subr.bf16.mxu1 %v8952_v20  ;;  %v907_v20 = vunpack.c.0.s8 %v906_v17 }
 0x145   : > { %2271 = vmatpush1.bf16.msra.mxu1 %v8950_v22  ;;  %v882_v22 = vld [vmem:[%s13825_s3] sm:$0x3] }
 0x146   : > { %2272 = vmatprep.subr.bf16.mxu1 %v8958_v24 }
 0x149   : > { %2273 = vmatpush1.bf16.msra.mxu1 %v8956_v26  ;;  %v10640_v26 = vsub.s32 %v907_v20, %v10623_v15 }
 0x14a   : > { %2274 = vmatprep.subr.bf16.mxu1 %v8964_v33  ;;  %v895_v33 = vrot.slane %v882_v22, %v10626_v38 }
 0x14d   : > { %2275 = vmatpush1.bf16.msra.mxu1 %v8962_v35  ;;  %v899_v35 = vrot.slane %v882_v22, %v10632_v47 }
 0x14e   : > { %2276 = vmatprep.subr.bf16.mxu1 %v8970_v45 }
 0x151   : > { %2277 = vmatpush1.bf16.msra.mxu1 %v8968_v46 }
 0x152   : > { %2278 = vmatprep.subr.bf16.mxu1 %v8976_v50 }
 0x155   : > { %2279 = vmatpush1.bf16.msra.mxu1 %v8974_v52 }
 0x156   : > { %2280 = vmatprep.subr.bf16.mxu1 %v8982_v54 }
 0x159   : > { %2281 = vmatpush1.bf16.msra.mxu1 %v8980_v36 }
 0x15a   : > { %2282 = vmatprep.subr.bf16.mxu1 %v8988_v40 }
 0x15d   : > { %2283 = vmatpush1.bf16.msra.mxu1 %v8986_v58 }
 0x15e   : > { %2284 = vmatprep.subr.bf16.mxu1 %v8994_v60 }
 0x161   : > { %2285 = vmatpush1.bf16.msra.mxu1 %v8992_v62 }
 0x162   : > { %2286 = vmatprep.subr.bf16.mxu1 %v9000_v0 }
 0x165   : > { %2287 = vmatpush1.bf16.msra.mxu1 %v8998_v27  ;;  %v9992_v27 = vld [vmem:[%s10302_s21] sm:$0xff] }
 0x166   : > { %2288 = vmatprep.subr.bf16.mxu1 %v9006_v2  ;;  %v9993_v2 = vld [vmem:[%s10302_s21 + $0x8] sm:$0xff] }
 0x169   : > { %2289 = vmatpush1.bf16.msra.mxu1 %v9004_v4  ;;  %v9994_v4 = vld [vmem:[%s10302_s21 + $0x10] sm:$0xff] }
 0x16a   : > { %2290 = vmatprep.subr.bf16.mxu1 %v9012_v30 }
 0x16d   : > { %2291 = vmatpush1.bf16.msra.mxu1 %v9010_v42 }
 0x16e   : > { %2292 = vmatprep.subr.bf16.mxu1 %v9018_v7  ;;  %v9995_v7 = vld [vmem:[%s10302_s21 + $0x18] sm:$0xff] }
 0x171   : > { %2293 = vmatpush1.bf16.msra.mxu1 %v9016_v9  ;;  %v9996_v9 = vld [vmem:[%s10302_s21 + $0x20] sm:$0xff] }
 0x172   : > { %2294 = vmatprep.subr.bf16.mxu1 %v9024_v11  ;;  %v9997_v11 = vld [vmem:[%s10302_s21 + $0x28] sm:$0xff] }
 0x175   : > { %2295 = vmatpush1.bf16.msra.mxu1 %v9022_v12 }
 0x176   : > { %2370 = vmatprep.subr.bf16.mxu1 %v9030_v37 }
 0x20b   : > { %v863_v21 = vpop.f32.mrb[0].mxu1 }
 0x20c   : > { %v880_v23 = vmul.f32 %v873_v18, %v863_v21  ;;  %v865_v24 = vpop.f32.mrb[1].mxu1 }
 0x20d   : > { %v881_v25 = vmul.f32 %v877_v19, %v865_v24 }
 0x20e   : > { %v885_v29 = vrot.slane %v880_v23, 4 }
 0x20f   : > { %v886_v34 = vrot.slane %v881_v25, 4  ;;  %v904_v44 = vcombine.high %v880_v23, %v881_v25 }
 0x210   : > { %v889_v45 = vmul.f32 %v885_v29, %v863_v21 }
 0x211   : > { %v890_v48 = vmul.f32 %v886_v34, %v865_v24  ;;  %v911_v46 = vrot.slane %v904_v44, %v10640_v26 }
 0x212   : > { %v902_v49 = vsub.f32 %v895_v33, %v889_v45 }
 0x213   : > { %v903_v50 = vsub.f32 %v899_v35, %v890_v48  ;;  %v912_v51 = vcombine.high %v911_v46, %v911_v46  ;;  %v919_v52 = vrot.slane %v911_v46, %v10640_v26 }
 0x215   : > { %v926_v53 = vrot.slane %v912_v51, %v10640_v26  ;;  %v927_v54 = vcombine.high %v919_v52, %v919_v52  ;;  %v979_v55 = vcombine.low %v902_v49, %v903_v50  ;;  %v932_v56 = vrot.slane %v919_v52, %v10626_v38 }
 0x216   : > { %v936_v40 = vrot.slane %v919_v52, %v10632_v47 }
 0x217   : > { %v928_v36 = vcombine.high %v926_v53, %v926_v53  ;;  %v940_v57 = vrot.slane %v926_v53, %v10626_v38  ;;  %v986_v58 = vrot.slane %v979_v55, %v10640_v26  ;;  %v944_v59 = vrot.slane %v926_v53, %v10632_v47 }
 0x218   : > { %v948_v60 = vrot.slane %v927_v54, %v10626_v38  ;;  %v952_v61 = vrot.slane %v927_v54, %v10632_v47  ;;  %v969_v28 = vmul.f32 %v9992_v27, %v932_v56  ;;  %v970_v3 = vmul.f32 %v9993_v2, %v936_v40 }
 0x219   : > { %v956_v62 = vrot.slane %v928_v36, %v10626_v38  ;;  %v987_v63 = vcombine.high %v986_v58, %v986_v58  ;;  %v994_v0 = vrot.slane %v986_v58, %v10640_v26  ;;  %v960_v1 = vrot.slane %v928_v36, %v10632_v47 }
 0x21a   : > { %v971_v5 = vmul.f32 %v9994_v4, %v940_v57  ;;  %v972_v8 = vmul.f32 %v9995_v7, %v944_v59  ;;  %v973_v10 = vmul.f32 %v9996_v9, %v948_v60  ;;  %v974_v12 = vmul.f32 %v9997_v11, %v952_v61  ;;  %v9031_v11 = vld [vmem:[%s13828_s6 + $0x18] ss:$48 sps:$4 sm:$0xff]  }
 0x21b   : > { %v1001_v30 = vrot.slane %v987_v63, %v10640_v26  ;;  %v1002_v31 = vcombine.high %v994_v0, %v994_v0  ;;  %v1007_v42 = vrot.slane %v994_v0, %v10626_v38  ;;  %v1011_v6 = vrot.slane %v994_v0, %v10632_v47 }
 0x21c   : > { %v975_v32 = vmul.f32 %v9998_v13, %v956_v62  ;;  %v976_v17 = vmul.f32 %v9999_v16, %v960_v1  ;;  %v9036_v13 = vld [vmem:[%s13828_s6 + $0x74] ss:$48 sps:$4 sm:$0xff]  }
 0x21d   : > { %v1003_v37 = vcombine.high %v1001_v30, %v1001_v30  ;;  %v1015_v43 = vrot.slane %v1001_v30, %v10626_v38  ;;  %v1019_v14 = vrot.slane %v1001_v30, %v10632_v47  ;;  %v1023_v39 = vrot.slane %v1002_v31, %v10626_v38 }
 0x21e   : > { %v1027_v18 = vrot.slane %v1002_v31, %v10632_v47  ;;  %v1044_v19 = vadd.f32 %v1007_v42, %v969_v28  ;;  %v1045_v20 = vadd.f32 %v1011_v6, %v970_v3 }
 0x21f   : > { %v1031_v21 = vrot.slane %v1003_v37, %v10626_v38  ;;  %v1035_v22 = vrot.slane %v1003_v37, %v10632_v47  ;;  %v1046_v23 = vadd.f32 %v1015_v43, %v971_v5  ;;  %v1047_v24 = vadd.f32 %v1019_v14, %v972_v8 }
 0x220   : > { %v1048_v25 = vadd.f32 %v1023_v39, %v973_v10  ;;  %v10674_v29 = vadd.f32 %v1027_v18, %v974_v12  ;;  %v7877_v33 = vmul.f32 -1.442695, %v1044_v19  ;;  %v7878_v34 = vmul.f32 -1.442695, %v1045_v20  ;;  %v9028_v10 = vld [vmem:[%s13828_s6 + $0x10] ss:$48 sps:$4 sm:$0xff]  }
 0x221   : > { %v1050_v35 = vadd.f32 %v1031_v21, %v975_v32  ;;  %v1051_v44 = vadd.f32 %v1035_v22, %v976_v17  ;;  %v7879_v45 = vmul.f32 -1.442695, %v1046_v23  ;;  %v7880_v48 = vmul.f32 -1.442695, %v1047_v24  ;;  %v9039_v32 = vld [vmem:[%s13828_s6 + $0x7c] ss:$48 sps:$4 sm:$0xff]  }
 0x222   : > { %9894 = vpow2.f32 %v7877_v33  ;;  %v7881_v46 = vmul.f32 -1.442695, %v1048_v25  ;;  %v7882_v49 = vmul.f32 -1.442695, %v10674_v29  ;;  %v9034_v18 = vld [vmem:[%s13828_s6 + $0x70] ss:$48 sps:$4 sm:$0xff]  }
 0x223   : > { %9896 = vpow2.f32 %v7878_v34  ;;  %v7883_v50 = vmul.f32 -1.442695, %v1050_v35  ;;  %v7884_v51 = vmul.f32 -1.442695, %v1051_v44  ;;  %v9045_v21 = vld [vmem:[%s13828_s6 + $0xdc] ss:$48 sps:$4 sm:$0xff]  }
 0x224   : > { %9898 = vpow2.f32 %v7879_v45  ;;  %v9040_v22 = vld [vmem:[%s13828_s6 + $0xd0] ss:$48 sps:$4 sm:$0xff]   ;;  %v9049_v33 = vld [vmem:[%s13828_s6 + $0x138] ss:$48 sps:$4 sm:$0xff]   ;;  %v9054_v34 = vld [vmem:[%s13828_s6 + $0x194] ss:$48 sps:$4 sm:$0xff]  }
 0x225   : > { %9900 = vpow2.f32 %v7880_v48  ;;  %v9055_v45 = vld [vmem:[%s13828_s6 + $0x198] ss:$48 sps:$4 sm:$0xff]   ;;  %v9060_v48 = vld [vmem:[%s13828_s6 + $0x1f4] ss:$48 sps:$4 sm:$0xff]  }
 0x226   : > { %9902 = vpow2.f32 %v7881_v46  ;;  %v9063_v46 = vld [vmem:[%s13828_s6 + $0x1fc] ss:$48 sps:$4 sm:$0xff]  }
 0x227   : > { %9904 = vpow2.f32 %v7882_v49  ;;  %v9058_v49 = vld [vmem:[%s13828_s6 + $0x1f0] ss:$48 sps:$4 sm:$0xff]  }
 0x228   : > { %9906 = vpow2.f32 %v7883_v50  ;;  %v9061_v50 = vld [vmem:[%s13828_s6 + $0x1f8] ss:$48 sps:$4 sm:$0xff]  }
 0x229   : > { %9908 = vpow2.f32 %v7884_v51  ;;  %v9066_v51 = vld [vmem:[%s13828_s6 + $0x254] ss:$48 sps:$4 sm:$0xff]  }
 0x22c   : > { %v9895_v52 = vpop.eup %9894 }
 0x22d   : > { %v9897_v53 = vpop.eup %9896  ;;  %v1076_v54 = vadd.f32 1.0, %v9895_v52  ;;  %v9069_v52 = vld [vmem:[%s13828_s6 + $0x25c] ss:$48 sps:$4 sm:$0xff]  }
 0x22e   : > { %v9899_v55 = vpop.eup %9898  ;;  %v1077_v36 = vadd.f32 1.0, %v9897_v53  ;;  %v9064_v53 = vld [vmem:[%s13828_s6 + $0x250] ss:$48 sps:$4 sm:$0xff]  }
 0x22f   : > { %v9901_v56 = vpop.eup %9900  ;;  %v1078_v40 = vadd.f32 1.0, %v9899_v55  ;;  %9910 = vrcp.f32 %v1076_v54  ;;  %v9067_v54 = vld [vmem:[%s13828_s6 + $0x258] ss:$48 sps:$4 sm:$0xff]   ;;  %v9072_v55 = vld [vmem:[%s13828_s6 + $0x2b4] ss:$48 sps:$4 sm:$0xff]  }
 0x230   : > { %v9903_v57 = vpop.eup %9902  ;;  %v1079_v58 = vadd.f32 1.0, %v9901_v56  ;;  %9912 = vrcp.f32 %v1077_v36  ;;  %v9075_v36 = vld [vmem:[%s13828_s6 + $0x2bc] ss:$48 sps:$4 sm:$0xff]   ;;  %v9070_v56 = vld [vmem:[%s13828_s6 + $0x2b0] ss:$48 sps:$4 sm:$0xff]  }
 0x231   : > { %v9905_v59 = vpop.eup %9904  ;;  %v1080_v60 = vadd.f32 1.0, %v9903_v57  ;;  %9914 = vrcp.f32 %v1078_v40  ;;  %v9073_v40 = vld [vmem:[%s13828_s6 + $0x2b8] ss:$48 sps:$4 sm:$0xff]   ;;  %v9078_v57 = vld [vmem:[%s13828_s6 + $0x314] ss:$48 sps:$4 sm:$0xff]  }
 0x232   : > { %v9907_v61 = vpop.eup %9906  ;;  %v1081_v62 = vadd.f32 1.0, %v9905_v59  ;;  %9916 = vrcp.f32 %v1079_v58  ;;  %v9081_v58 = vld [vmem:[%s13828_s6 + $0x31c] ss:$48 sps:$4 sm:$0xff]   ;;  %v9076_v59 = vld [vmem:[%s13828_s6 + $0x310] ss:$48 sps:$4 sm:$0xff]  }
 0x233   : > { %v9909_v63 = vpop.eup %9908  ;;  %v1082_v0 = vadd.f32 1.0, %v9907_v61  ;;  %9918 = vrcp.f32 %v1080_v60  ;;  %v9079_v60 = vld [vmem:[%s13828_s6 + $0x318] ss:$48 sps:$4 sm:$0xff]   ;;  %v9084_v61 = vld [vmem:[%s13828_s6 + $0x374] ss:$48 sps:$4 sm:$0xff]  }
 0x234   : > { %v1083_v1 = vadd.f32 1.0, %v9909_v63  ;;  %9920 = vrcp.f32 %v1081_v62  ;;  %v9087_v62 = vld [vmem:[%s13828_s6 + $0x37c] ss:$48 sps:$4 sm:$0xff]   ;;  %v9082_v63 = vld [vmem:[%s13828_s6 + $0x370] ss:$48 sps:$4 sm:$0xff]  }
 0x235   : > { %9922 = vrcp.f32 %v1082_v0  ;;  %v9085_v0 = vld [vmem:[%s13828_s6 + $0x378] ss:$48 sps:$4 sm:$0xff]  }
 0x236   : > { %9924 = vrcp.f32 %v1083_v1  ;;  %v9090_v1 = vld [vmem:[%s13828_s6 + $0x3d4] ss:$48 sps:$4 sm:$0xff]  }
 0x239   : > { %v9911_v27 = vpop.eup %9910 }
 0x23a   : > { %v9913_v28 = vpop.eup %9912  ;;  %v1100_v4 = vmul.f32 %v9911_v27, %v1044_v19  ;;  %v9037_v19 = vld [vmem:[%s13828_s6 + $0x78] ss:$48 sps:$4 sm:$0xff]   ;;  %v9093_v27 = vld [vmem:[%s13828_s6 + $0x3dc] ss:$48 sps:$4 sm:$0xff]  }
 0x23b   : > { %v9915_v2 = vpop.eup %9914  ;;  %v1101_v31 = vmul.f32 %v9913_v28, %v1045_v20  ;;  %v9042_v20 = vld [vmem:[%s13828_s6 + $0xd4] ss:$48 sps:$4 sm:$0xff]   ;;  %v9088_v28 = vld [vmem:[%s13828_s6 + $0x3d0] ss:$48 sps:$4 sm:$0xff]  }
 0x23c   : > { %v9917_v3 = vpop.eup %9916  ;;  %v1102_v5 = vmul.f32 %v9915_v2, %v1046_v23  ;;  %v9043_v23 = vld [vmem:[%s13828_s6 + $0xd8] ss:$48 sps:$4 sm:$0xff]  }
 0x23d   : > { %v9919_v30 = vpop.eup %9918  ;;  %v1103_v42 = vmul.f32 %v9917_v3, %v1047_v24  ;;  %v9048_v24 = vld [vmem:[%s13828_s6 + $0x134] ss:$48 sps:$4 sm:$0xff]   ;;  %v9091_v2 = vld [vmem:[%s13828_s6 + $0x3d8] ss:$48 sps:$4 sm:$0xff]  }
 0x23e   : > { %v9921_v6 = vpop.eup %9920  ;;  %v10677_v7 = vpack.c.bf16 %v1102_v5, %v1100_v4  ;;  %v1104_v37 = vmul.f32 %v9919_v30, %v1048_v25  ;;  %v9051_v25 = vld [vmem:[%s13828_s6 + $0x13c] ss:$48 sps:$4 sm:$0xff]   ;;  %v9096_v3 = vld [vmem:[%s13828_s6 + $0x434] ss:$48 sps:$4 sm:$0xff]   ;;  %v9094_v5 = vld [vmem:[%s13828_s6 + $0x430] ss:$48 sps:$4 sm:$0xff]  }
 0x23f   : > { %v9923_v8 = vpop.eup %9922  ;;  %v10679_v9 = vpack.c.bf16 %v1103_v42, %v1101_v31  ;;  %v1105_v14 = vmul.f32 %v9921_v6, %v10674_v29  ;;  %v9046_v29 = vld [vmem:[%s13828_s6 + $0x130] ss:$48 sps:$4 sm:$0xff]   ;;  %v9099_v4 = vld [vmem:[%s13828_s6 + $0x43c] ss:$48 sps:$4 sm:$0xff]   ;;  %v9097_v30 = vld [vmem:[%s13828_s6 + $0x438] ss:$48 sps:$4 sm:$0xff]  }
 0x240   : > { %v9925_v12 = vpop.eup %9924  ;;  %v1106_v43 = vmul.f32 %v9923_v8, %v1050_v35  ;;  %v9057_v35 = vld [vmem:[%s13828_s6 + $0x19c] ss:$48 sps:$4 sm:$0xff]   ;;  %v9102_v31 = vld [vmem:[%s13828_s6 + $0x494] ss:$48 sps:$4 sm:$0xff]   ;;  %v9100_v6 = vld [vmem:[%s13828_s6 + $0x490] ss:$48 sps:$4 sm:$0xff]  }
 0x241   : > { %2296 = vmatprep.mubr.bf16.mxu1 %v10679_v9  ;;  %2349 = vmatprep.mubr.bf16.mxu0 %v10679_v9  ;;  %v1107_v39 = vmul.f32 %v9925_v12, %v1051_v44  ;;  %v9052_v44 = vld [vmem:[%s13828_s6 + $0x190] ss:$48 sps:$4 sm:$0xff]   ;;  %v9105_v42 = vld [vmem:[%s13828_s6 + $0x49c] ss:$48 sps:$4 sm:$0xff]   ;;  %v9103_v8 = vld [vmem:[%s13828_s6 + $0x498] ss:$48 sps:$4 sm:$0xff]  }
 0x242   : > { %2297 = vmatmul.mubr.bf16.vlgmr.msra.gmra.mrb[4].mxu1 %v10677_v7  ;;  %2350 = vmatmul.mubr.bf16.vlgmr.msra.gmra.mrb[4].mxu0 %v10677_v7  ;;  %v10698_v16 = vpack.c.bf16 %v1106_v43, %v1104_v37  ;;  %v9106_v12 = vld [vmem:[%s13828_s6 + $0x4f0] ss:$48 sps:$4 sm:$0xff]   ;;  %v9117_v37 = vld [vmem:[%s13828_s6 + $0x55c] ss:$48 sps:$4 sm:$0xff]  }
 0x243   : > { %2371 = vmatpush1.bf16.msra.mxu1 %v9028_v10  ;;  %2424 = vmatpush1.bf16.msra.mxu0 %v9031_v11  ;;  %v10700_v17 = vpack.c.bf16 %v1107_v39, %v1105_v14  ;;  %v9108_v10 = vld [vmem:[%s13828_s6 + $0x4f4] ss:$48 sps:$4 sm:$0xff]   ;;  %v9111_v11 = vld [vmem:[%s13828_s6 + $0x4fc] ss:$48 sps:$4 sm:$0xff]   ;;  %v9112_v43 = vld [vmem:[%s13828_s6 + $0x550] ss:$48 sps:$4 sm:$0xff]  }
 0x244   : > { %2372 = vmatprep.subr.bf16.mxu1 %v9036_v13  ;;  %2425 = vmatprep.subr.bf16.mxu0 %v9039_v32  ;;  %v9109_v13 = vld [vmem:[%s13828_s6 + $0x4f8] ss:$48 sps:$4 sm:$0xff]   ;;  %v9114_v32 = vld [vmem:[%s13828_s6 + $0x554] ss:$48 sps:$4 sm:$0xff]  }
 0x245   : > { %2306 = vmatprep.mubr.bf16.mxu1 %v10700_v17  ;;  %2359 = vmatprep.mubr.bf16.mxu0 %v10700_v17  ;;  %v9115_v14 = vld [vmem:[%s13828_s6 + $0x558] ss:$48 sps:$4 sm:$0xff]   ;;  %v9120_v39 = vld [vmem:[%s13828_s6 + $0x5b4] ss:$48 sps:$4 sm:$0xff]  }
 0x247   : > { %2373 = vmatpush1.bf16.msra.mxu1 %v9034_v18  ;;  %2426 = vmatpush1.bf16.msra.mxu0 %v9037_v19  ;;  %v9123_v18 = vld [vmem:[%s13828_s6 + $0x5bc] ss:$48 sps:$4 sm:$0xff]   ;;  %v9118_v19 = vld [vmem:[%s13828_s6 + $0x5b0] ss:$48 sps:$4 sm:$0xff]  }
 0x248   : > { %2374 = vmatprep.subr.bf16.mxu1 %v9042_v20  ;;  %2427 = vmatprep.subr.bf16.mxu0 %v9045_v21  ;;  %v9121_v20 = vld [vmem:[%s13828_s6 + $0x5b8] ss:$48 sps:$4 sm:$0xff]   ;;  %v9126_v21 = vld [vmem:[%s13828_s6 + $0x24] ss:$48 sps:$4 sm:$0xff]  }
 0x24a   : > { %2307 = vmatmul.mubr.bf16.gmra.mrb[8].mxu1 %v10698_v16  ;;  %2360 = vmatmul.mubr.bf16.gmra.mrb[8].mxu0 %v10698_v16 }
 0x24b   : > { %2375 = vmatpush1.bf16.msra.mxu1 %v9040_v22  ;;  %2428 = vmatpush1.bf16.msra.mxu0 %v9043_v23  ;;  %v9129_v22 = vld [vmem:[%s13828_s6 + $0x2c] ss:$48 sps:$4 sm:$0xff]   ;;  %v9124_v23 = vld [vmem:[%s13828_s6 + $0x20] ss:$48 sps:$4 sm:$0xff]  }
 0x24c   : > { %2402 = vmatprep.mubr.bf16.mxu1 %v10679_v9  ;;  %2455 = vmatprep.mubr.bf16.mxu0 %v10679_v9 }
 0x24d   : > { %2376 = vmatprep.subr.bf16.mxu1 %v9048_v24  ;;  %2429 = vmatprep.subr.bf16.mxu0 %v9051_v25  ;;  %v9127_v24 = vld [vmem:[%s13828_s6 + $0x28] ss:$48 sps:$4 sm:$0xff]   ;;  %v9132_v25 = vld [vmem:[%s13828_s6 + $0x84] ss:$48 sps:$4 sm:$0xff]  }
 0x24f   : > { %2377 = vmatpush1.bf16.msra.mxu1 %v9046_v29  ;;  %2430 = vmatpush1.bf16.msra.mxu0 %v9049_v33  ;;  %v9135_v29 = vld [vmem:[%s13828_s6 + $0x8c] ss:$48 sps:$4 sm:$0xff]   ;;  %v9130_v33 = vld [vmem:[%s13828_s6 + $0x80] ss:$48 sps:$4 sm:$0xff]  }
 0x250   : > { %2378 = vmatprep.subr.bf16.mxu1 %v9054_v34  ;;  %2431 = vmatprep.subr.bf16.mxu0 %v9057_v35  ;;  %v9133_v34 = vld [vmem:[%s13828_s6 + $0x88] ss:$48 sps:$4 sm:$0xff]   ;;  %v9138_v35 = vld [vmem:[%s13828_s6 + $0xe4] ss:$48 sps:$4 sm:$0xff]  }
 0x253   : > { %2379 = vmatpush1.bf16.msra.mxu1 %v9052_v44  ;;  %2432 = vmatpush1.bf16.msra.mxu0 %v9055_v45  ;;  %v9141_v44 = vld [vmem:[%s13828_s6 + $0xec] ss:$48 sps:$4 sm:$0xff]   ;;  %v9136_v45 = vld [vmem:[%s13828_s6 + $0xe0] ss:$48 sps:$4 sm:$0xff]  }
 0x254   : > { %2380 = vmatprep.subr.bf16.mxu1 %v9060_v48  ;;  %2433 = vmatprep.subr.bf16.mxu0 %v9063_v46  ;;  %v9139_v48 = vld [vmem:[%s13828_s6 + $0xe8] ss:$48 sps:$4 sm:$0xff]   ;;  %v9144_v46 = vld [vmem:[%s13828_s6 + $0x144] ss:$48 sps:$4 sm:$0xff]  }
 0x257   : > { %2381 = vmatpush1.bf16.msra.mxu1 %v9058_v49  ;;  %2434 = vmatpush1.bf16.msra.mxu0 %v9061_v50  ;;  %v9147_v49 = vld [vmem:[%s13828_s6 + $0x14c] ss:$48 sps:$4 sm:$0xff]   ;;  %v9142_v50 = vld [vmem:[%s13828_s6 + $0x140] ss:$48 sps:$4 sm:$0xff]  }
 0x258   : > { %2382 = vmatprep.subr.bf16.mxu1 %v9066_v51  ;;  %2435 = vmatprep.subr.bf16.mxu0 %v9069_v52  ;;  %v9145_v51 = vld [vmem:[%s13828_s6 + $0x148] ss:$48 sps:$4 sm:$0xff]   ;;  %v9150_v52 = vld [vmem:[%s13828_s6 + $0x1a4] ss:$48 sps:$4 sm:$0xff]  }
 0x25b   : > { %2383 = vmatpush1.bf16.msra.mxu1 %v9064_v53  ;;  %2436 = vmatpush1.bf16.msra.mxu0 %v9067_v54  ;;  %v9148_v53 = vld [vmem:[%s13828_s6 + $0x1a0] ss:$48 sps:$4 sm:$0xff]   ;;  %v9151_v54 = vld [vmem:[%s13828_s6 + $0x1a8] ss:$48 sps:$4 sm:$0xff]  }
 0x25c   : > { %2384 = vmatprep.subr.bf16.mxu1 %v9072_v55  ;;  %2437 = vmatprep.subr.bf16.mxu0 %v9075_v36  ;;  %v9156_v55 = vld [vmem:[%s13828_s6 + $0x204] ss:$48 sps:$4 sm:$0xff]   ;;  %v9159_v36 = vld [vmem:[%s13828_s6 + $0x20c] ss:$48 sps:$4 sm:$0xff]  }
 0x25f   : > { %2385 = vmatpush1.bf16.msra.mxu1 %v9070_v56  ;;  %2438 = vmatpush1.bf16.msra.mxu0 %v9073_v40  ;;  %v9154_v56 = vld [vmem:[%s13828_s6 + $0x200] ss:$48 sps:$4 sm:$0xff]   ;;  %v9157_v40 = vld [vmem:[%s13828_s6 + $0x208] ss:$48 sps:$4 sm:$0xff]  }
 0x260   : > { %2386 = vmatprep.subr.bf16.mxu1 %v9078_v57  ;;  %2439 = vmatprep.subr.bf16.mxu0 %v9081_v58  ;;  %v9162_v57 = vld [vmem:[%s13828_s6 + $0x264] ss:$48 sps:$4 sm:$0xff]   ;;  %v9165_v58 = vld [vmem:[%s13828_s6 + $0x26c] ss:$48 sps:$4 sm:$0xff]  }
 0x263   : > { %2387 = vmatpush1.bf16.msra.mxu1 %v9076_v59  ;;  %2440 = vmatpush1.bf16.msra.mxu0 %v9079_v60  ;;  %v9160_v59 = vld [vmem:[%s13828_s6 + $0x260] ss:$48 sps:$4 sm:$0xff]   ;;  %v9163_v60 = vld [vmem:[%s13828_s6 + $0x268] ss:$48 sps:$4 sm:$0xff]  }
 0x264   : > { %2388 = vmatprep.subr.bf16.mxu1 %v9084_v61  ;;  %2441 = vmatprep.subr.bf16.mxu0 %v9087_v62  ;;  %v9168_v61 = vld [vmem:[%s13828_s6 + $0x2c4] ss:$48 sps:$4 sm:$0xff]   ;;  %v9171_v62 = vld [vmem:[%s13828_s6 + $0x2cc] ss:$48 sps:$4 sm:$0xff]  }
 0x267   : > { %2389 = vmatpush1.bf16.msra.mxu1 %v9082_v63  ;;  %2442 = vmatpush1.bf16.msra.mxu0 %v9085_v0  ;;  %v9166_v63 = vld [vmem:[%s13828_s6 + $0x2c0] ss:$48 sps:$4 sm:$0xff]   ;;  %v9169_v0 = vld [vmem:[%s13828_s6 + $0x2c8] ss:$48 sps:$4 sm:$0xff]  }
 0x268   : > { %2390 = vmatprep.subr.bf16.mxu1 %v9090_v1  ;;  %2443 = vmatprep.subr.bf16.mxu0 %v9093_v27  ;;  %v9174_v1 = vld [vmem:[%s13828_s6 + $0x324] ss:$48 sps:$4 sm:$0xff]   ;;  %v9177_v27 = vld [vmem:[%s13828_s6 + $0x32c] ss:$48 sps:$4 sm:$0xff]  }
 0x26b   : > { %2391 = vmatpush1.bf16.msra.mxu1 %v9088_v28  ;;  %2444 = vmatpush1.bf16.msra.mxu0 %v9091_v2  ;;  %v9172_v28 = vld [vmem:[%s13828_s6 + $0x320] ss:$48 sps:$4 sm:$0xff]   ;;  %v9175_v2 = vld [vmem:[%s13828_s6 + $0x328] ss:$48 sps:$4 sm:$0xff]  }
 0x26c   : > { %2392 = vmatprep.subr.bf16.mxu1 %v9096_v3  ;;  %2445 = vmatprep.subr.bf16.mxu0 %v9099_v4  ;;  %v9180_v3 = vld [vmem:[%s13828_s6 + $0x384] ss:$48 sps:$4 sm:$0xff]   ;;  %v9183_v4 = vld [vmem:[%s13828_s6 + $0x38c] ss:$48 sps:$4 sm:$0xff]  }
 0x26f   : > { %2393 = vmatpush1.bf16.msra.mxu1 %v9094_v5  ;;  %2446 = vmatpush1.bf16.msra.mxu0 %v9097_v30  ;;  %v9178_v5 = vld [vmem:[%s13828_s6 + $0x380] ss:$48 sps:$4 sm:$0xff]   ;;  %v9181_v30 = vld [vmem:[%s13828_s6 + $0x388] ss:$48 sps:$4 sm:$0xff]  }
 0x270   : > { %2394 = vmatprep.subr.bf16.mxu1 %v9102_v31  ;;  %2447 = vmatprep.subr.bf16.mxu0 %v9105_v42  ;;  %v9186_v31 = vld [vmem:[%s13828_s6 + $0x3e4] ss:$48 sps:$4 sm:$0xff]   ;;  %v9189_v42 = vld [vmem:[%s13828_s6 + $0x3ec] ss:$48 sps:$4 sm:$0xff]  }
 0x273   : > { %2395 = vmatpush1.bf16.msra.mxu1 %v9100_v6  ;;  %2448 = vmatpush1.bf16.msra.mxu0 %v9103_v8  ;;  %v9184_v6 = vld [vmem:[%s13828_s6 + $0x3e0] ss:$48 sps:$4 sm:$0xff]   ;;  %v9187_v8 = vld [vmem:[%s13828_s6 + $0x3e8] ss:$48 sps:$4 sm:$0xff]  }
 0x274   : > { %2396 = vmatprep.subr.bf16.mxu1 %v9108_v10  ;;  %2449 = vmatprep.subr.bf16.mxu0 %v9111_v11  ;;  %v9192_v10 = vld [vmem:[%s13828_s6 + $0x444] ss:$48 sps:$4 sm:$0xff]   ;;  %v9195_v11 = vld [vmem:[%s13828_s6 + $0x44c] ss:$48 sps:$4 sm:$0xff]  }
 0x277   : > { %2397 = vmatpush1.bf16.msra.mxu1 %v9106_v12  ;;  %2450 = vmatpush1.bf16.msra.mxu0 %v9109_v13  ;;  %v9190_v12 = vld [vmem:[%s13828_s6 + $0x440] ss:$48 sps:$4 sm:$0xff]   ;;  %v9193_v13 = vld [vmem:[%s13828_s6 + $0x448] ss:$48 sps:$4 sm:$0xff]  }
 0x278   : > { %2398 = vmatprep.subr.bf16.mxu1 %v9114_v32  ;;  %2451 = vmatprep.subr.bf16.mxu0 %v9117_v37  ;;  %v9198_v32 = vld [vmem:[%s13828_s6 + $0x4a4] ss:$48 sps:$4 sm:$0xff]   ;;  %v9201_v37 = vld [vmem:[%s13828_s6 + $0x4ac] ss:$48 sps:$4 sm:$0xff]  }
 0x27b   : > { %2399 = vmatpush1.bf16.msra.mxu1 %v9112_v43  ;;  %2452 = vmatpush1.bf16.msra.mxu0 %v9115_v14  ;;  %v9196_v43 = vld [vmem:[%s13828_s6 + $0x4a0] ss:$48 sps:$4 sm:$0xff]   ;;  %v9199_v14 = vld [vmem:[%s13828_s6 + $0x4a8] ss:$48 sps:$4 sm:$0xff]  }
 0x27c   : > { %2400 = vmatprep.subr.bf16.mxu1 %v9120_v39  ;;  %2453 = vmatprep.subr.bf16.mxu0 %v9123_v18  ;;  %v9204_v39 = vld [vmem:[%s13828_s6 + $0x504] ss:$48 sps:$4 sm:$0xff]   ;;  %v9207_v18 = vld [vmem:[%s13828_s6 + $0x50c] ss:$48 sps:$4 sm:$0xff]  }
 0x27f   : > { %2401 = vmatpush1.bf16.msra.mxu1 %v9118_v19  ;;  %2454 = vmatpush1.bf16.msra.mxu0 %v9121_v20  ;;  %v9202_v19 = vld [vmem:[%s13828_s6 + $0x500] ss:$48 sps:$4 sm:$0xff]   ;;  %v9205_v20 = vld [vmem:[%s13828_s6 + $0x508] ss:$48 sps:$4 sm:$0xff]  }
 0x280   : > { %2476 = vmatprep.subr.bf16.mxu1 %v9126_v21  ;;  %2529 = vmatprep.subr.bf16.mxu0 %v9129_v22  ;;  %v9210_v21 = vld [vmem:[%s13828_s6 + $0x564] ss:$48 sps:$4 sm:$0xff]   ;;  %v9213_v22 = vld [vmem:[%s13828_s6 + $0x56c] ss:$48 sps:$4 sm:$0xff]  }
 0x282   : > { %2403 = vmatmul.mubr.bf16.vlgmr.msra.gmra.mrb[12].mxu1 %v10677_v7  ;;  %2456 = vmatmul.mubr.bf16.vlgmr.msra.gmra.mrb[12].mxu0 %v10677_v7 }
 0x283   : > { %2412 = vmatprep.mubr.bf16.mxu1 %v10700_v17  ;;  %2465 = vmatprep.mubr.bf16.mxu0 %v10700_v17 }
 0x284   : > { %2477 = vmatpush1.bf16.msra.mxu1 %v9124_v23  ;;  %2530 = vmatpush1.bf16.msra.mxu0 %v9127_v24  ;;  %v9208_v23 = vld [vmem:[%s13828_s6 + $0x560] ss:$48 sps:$4 sm:$0xff]   ;;  %v9211_v24 = vld [vmem:[%s13828_s6 + $0x568] ss:$48 sps:$4 sm:$0xff]  }
 0x285   : > { %2478 = vmatprep.subr.bf16.mxu1 %v9132_v25  ;;  %2531 = vmatprep.subr.bf16.mxu0 %v9135_v29  ;;  %v9216_v25 = vld [vmem:[%s13828_s6 + $0x5c4] ss:$48 sps:$4 sm:$0xff]   ;;  %v9219_v29 = vld [vmem:[%s13828_s6 + $0x5cc] ss:$48 sps:$4 sm:$0xff]  }
 0x288   : > { %2479 = vmatpush1.bf16.msra.mxu1 %v9130_v33  ;;  %2532 = vmatpush1.bf16.msra.mxu0 %v9133_v34  ;;  %v9214_v33 = vld [vmem:[%s13828_s6 + $0x5c0] ss:$48 sps:$4 sm:$0xff]   ;;  %v9217_v34 = vld [vmem:[%s13828_s6 + $0x5c8] ss:$48 sps:$4 sm:$0xff]  }
 0x289   : > { %2480 = vmatprep.subr.bf16.mxu1 %v9138_v35  ;;  %2533 = vmatprep.subr.bf16.mxu0 %v9141_v44 }
 0x28a   : > { %2413 = vmatmul.mubr.bf16.gmra.mrb[16].mxu1 %v10698_v16  ;;  %2466 = vmatmul.mubr.bf16.gmra.mrb[16].mxu0 %v10698_v16 }
 0x28b   : > { %2508 = vmatprep.mubr.bf16.mxu1 %v10679_v9  ;;  %2561 = vmatprep.mubr.bf16.mxu0 %v10679_v9  ;;  %v9153_v9 = vld [vmem:[%s13828_s6 + $0x1ac] ss:$48 sps:$4 sm:$0xff]  }
 0x28c   : > { %2481 = vmatpush1.bf16.msra.mxu1 %v9136_v45  ;;  %2534 = vmatpush1.bf16.msra.mxu0 %v9139_v48 }
 0x28d   : > { %2482 = vmatprep.subr.bf16.mxu1 %v9144_v46  ;;  %2535 = vmatprep.subr.bf16.mxu0 %v9147_v49 }
 0x290   : > { %2483 = vmatpush1.bf16.msra.mxu1 %v9142_v50  ;;  %2536 = vmatpush1.bf16.msra.mxu0 %v9145_v51 }
 0x291   : > { %2484 = vmatprep.subr.bf16.mxu1 %v9150_v52  ;;  %2537 = vmatprep.subr.bf16.mxu0 %v9153_v9 }
 0x294   : > { %2485 = vmatpush1.bf16.msra.mxu1 %v9148_v53  ;;  %2538 = vmatpush1.bf16.msra.mxu0 %v9151_v54 }
 0x295   : > { %2486 = vmatprep.subr.bf16.mxu1 %v9156_v55  ;;  %2539 = vmatprep.subr.bf16.mxu0 %v9159_v36 }
 0x298   : > { %2487 = vmatpush1.bf16.msra.mxu1 %v9154_v56  ;;  %2540 = vmatpush1.bf16.msra.mxu0 %v9157_v40 }
 0x299   : > { %2488 = vmatprep.subr.bf16.mxu1 %v9162_v57  ;;  %2541 = vmatprep.subr.bf16.mxu0 %v9165_v58  ;;  %v3233_v58 = vld [vmem:[%s13831_s9 + $0x80] sm:$0xff] }
 0x29c   : > { %2489 = vmatpush1.bf16.msra.mxu1 %v9160_v59  ;;  %2542 = vmatpush1.bf16.msra.mxu0 %v9163_v60  ;;  %v3234_v59 = vld [vmem:[%s13831_s9 + $0x88] sm:$0xff] }
 0x29d   : > { %2490 = vmatprep.subr.bf16.mxu1 %v9168_v61  ;;  %2543 = vmatprep.subr.bf16.mxu0 %v9171_v62 }
 0x2a0   : > { %2491 = vmatpush1.bf16.msra.mxu1 %v9166_v63  ;;  %2544 = vmatpush1.bf16.msra.mxu0 %v9169_v0 }
 0x2a1   : > { %2492 = vmatprep.subr.bf16.mxu1 %v9174_v1  ;;  %2545 = vmatprep.subr.bf16.mxu0 %v9177_v27 }
 0x2a4   : > { %2493 = vmatpush1.bf16.msra.mxu1 %v9172_v28  ;;  %2546 = vmatpush1.bf16.msra.mxu0 %v9175_v2 }
 0x2a5   : > { %2494 = vmatprep.subr.bf16.mxu1 %v9180_v3  ;;  %2547 = vmatprep.subr.bf16.mxu0 %v9183_v4  ;;  %v8697_v4 = vpack.c.bf16 %v3234_v59, %v3233_v58  ;;  %v3237_v59 = vld [vmem:[%s13831_s9 + $0xa0] sm:$0xff] }
 0x2a8   : > { %2495 = vmatpush1.bf16.msra.mxu1 %v9178_v5  ;;  %2548 = vmatpush1.bf16.msra.mxu0 %v9181_v30 }
 0x2a9   : > { %2496 = vmatprep.subr.bf16.mxu1 %v9186_v31  ;;  %2549 = vmatprep.subr.bf16.mxu0 %v9189_v42 }
 0x2ac   : > { %2497 = vmatpush1.bf16.msra.mxu1 %v9184_v6  ;;  %2550 = vmatpush1.bf16.msra.mxu0 %v9187_v8 }
 0x2ad   : > { %2498 = vmatprep.subr.bf16.mxu1 %v9192_v10  ;;  %2551 = vmatprep.subr.bf16.mxu0 %v9195_v11  ;;  %v3265_v10 = vld [vmem:[%s13831_s9 + $0x180] sm:$0xff] }
 0x2b0   : > { %2499 = vmatpush1.bf16.msra.mxu1 %v9190_v12  ;;  %2552 = vmatpush1.bf16.msra.mxu0 %v9193_v13  ;;  %v3266_v13 = vld [vmem:[%s13831_s9 + $0x188] sm:$0xff] }
 0x2b1   : > { %2500 = vmatprep.subr.bf16.mxu1 %v9198_v32  ;;  %2553 = vmatprep.subr.bf16.mxu0 %v9201_v37  ;;  %v3217_v32 = vld [vmem:[%s13831_s9] sm:$0xff]  ;;  %v3218_v37 = vld [vmem:[%s13831_s9 + $0x8] sm:$0xff] }
 0x2b4   : > { %2501 = vmatpush1.bf16.msra.mxu1 %v9196_v43  ;;  %2554 = vmatpush1.bf16.msra.mxu0 %v9199_v14 }
 0x2b5   : > { %2502 = vmatprep.subr.bf16.mxu1 %v9204_v39  ;;  %2555 = vmatprep.subr.bf16.mxu0 %v9207_v18 }
 0x2b8   : > { %2503 = vmatpush1.bf16.msra.mxu1 %v9202_v19  ;;  %2556 = vmatpush1.bf16.msra.mxu0 %v9205_v20  ;;  %v3249_v19 = vld [vmem:[%s13831_s9 + $0x100] sm:$0xff]  ;;  %v3250_v20 = vld [vmem:[%s13831_s9 + $0x108] sm:$0xff] }
 0x2b9   : > { %2504 = vmatprep.subr.bf16.mxu1 %v9210_v21  ;;  %2557 = vmatprep.subr.bf16.mxu0 %v9213_v22 }
 0x2bc   : > { %2505 = vmatpush1.bf16.msra.mxu1 %v9208_v23  ;;  %2558 = vmatpush1.bf16.msra.mxu0 %v9211_v24  ;;  %v8729_v23 = vpack.c.bf16 %v3266_v13, %v3265_v10  ;;  %v8699_v24 = vpack.c.bf16 %v3218_v37, %v3217_v32  ;;  %v3223_v10 = vld [vmem:[%s13831_s9 + $0x30] sm:$0xff] }
 0x2bd   : > { %2506 = vmatprep.subr.bf16.mxu1 %v9216_v25  ;;  %2559 = vmatprep.subr.bf16.mxu0 %v9219_v29  ;;  %v8731_v25 = vpack.c.bf16 %v3250_v20, %v3249_v19  ;;  %v3235_v29 = vld [vmem:[%s13831_s9 + $0x90] sm:$0xff]  ;;  %v3256_v19 = vld [vmem:[%s13831_s9 + $0x138] sm:$0xff] }
 0x2be   : > { %v3255_v37 = vld [vmem:[%s13831_s9 + $0x130] sm:$0xff] }
 0x2bf   : > { %v8743_v20 = vpack.c.bf16 %v3256_v19, %v3255_v37  ;;  %v3279_v37 = vld [vmem:[%s13831_s9 + $0x1f0] sm:$0xff]  ;;  %v3280_v19 = vld [vmem:[%s13831_s9 + $0x1f8] sm:$0xff] }
 0x2c0   : > { %2507 = vmatpush1.bf16.msra.mxu1 %v9214_v33  ;;  %2560 = vmatpush1.bf16.msra.mxu0 %v9217_v34  ;;  %v3236_v33 = vld [vmem:[%s13831_s9 + $0x98] sm:$0xff]  ;;  %v3267_v34 = vld [vmem:[%s13831_s9 + $0x190] sm:$0xff] }
 0x2c1   : > { %8698 = vmatprep.subr.bf16.mxu1 %v8697_v4  ;;  %8730 = vmatprep.subr.bf16.mxu0 %v8729_v23  ;;  %v3241_v23 = vld [vmem:[%s13831_s9 + $0xc0] sm:$0xff] }
 0x2c3   : > { %2509 = vmatmul.mubr.bf16.vlgmr.msra.gmra.mrb[20].mxu1 %v10677_v7  ;;  %2562 = vmatmul.mubr.bf16.vlgmr.msra.gmra.mrb[20].mxu0 %v10677_v7 }
 0x2c4   : > { %2518 = vmatprep.mubr.bf16.mxu1 %v10700_v17  ;;  %2571 = vmatprep.mubr.bf16.mxu0 %v10700_v17 }
 0x2c5   : > { %8700 = vmatpush3.bf16.msra.mxu1 %v8699_v24  ;;  %8732 = vmatpush3.bf16.msra.mxu0 %v8731_v25  ;;  %v3242_v24 = vld [vmem:[%s13831_s9 + $0xc8] sm:$0xff]  ;;  %v3273_v25 = vld [vmem:[%s13831_s9 + $0x1c0] sm:$0xff] }
 0x2cb   : > { %2519 = vmatmul.mubr.bf16.gmra.mrb[24].mxu1 %v10698_v16  ;;  %2572 = vmatmul.mubr.bf16.gmra.mrb[24].mxu0 %v10698_v16 }
 0x315   : > { %v11088_v35 = vpop.f32.mrb[4].mxu1  ;;  %v11090_v44 = vpop.f32.mrb[4].mxu0 }
 0x316   : > { %v11092_v45 = vpop.f32.mrb[5].mxu1  ;;  %v11094_v48 = vpop.f32.mrb[5].mxu0  ;;  %v2599_v7 = vrot.slane %v11088_v35, 7  ;;  %v2601_v50 = vrot.slane %v11090_v44, 7 }
 0x317   : > { %v2302_v46 = vpop.f32.mrb[6].mxu1  ;;  %v2355_v49 = vpop.f32.mrb[6].mxu0  ;;  %v2600_v54 = vrot.slane %v11092_v45, 7  ;;  %v2602_v55 = vrot.slane %v11094_v48, 7 }
 0x318   : > { %v2603_v51 = vrot.slane %v2302_v46, 7  ;;  %v2607_v17 = vrot.slane %v2355_v49, 7  ;;  %v2304_v52 = vpop.f32.mrb[7].mxu1  ;;  %v2357_v9 = vpop.f32.mrb[7].mxu0  ;;  %v8701_v46 = vpack.c.bf16 %v3236_v33, %v3235_v29  ;;  %v3268_v49 = vld [vmem:[%s13831_s9 + $0x198] sm:$0xff]  ;;  %v8713_v29 = vpack.c.bf16 %v3242_v24, %v3241_v23  ;;  %v3274_v33 = vld [vmem:[%s13831_s9 + $0x1c8] sm:$0xff] }
 0x319   : > { %v2605_v53 = vrot.slane %v2304_v52, 7  ;;  %v2609_v16 = vrot.slane %v2357_v9, 7  ;;  %v3220_v52 = vld [vmem:[%s13831_s9 + $0x18] sm:$0xff]  ;;  %v3251_v9 = vld [vmem:[%s13831_s9 + $0x110] sm:$0xff]  ;;  %v2646_v35 = vsel %vm13846_vm8, 0.0, %v2602_v55 }
 0x31a   : > { %v11103_v36 = vsel %vm13846_vm8, %v2599_v7, %v2603_v51  ;;  %v11108_v56 = vsel %vm13846_vm8, %v2601_v50, %v2607_v17  ;;  %8702 = vmatprep.subr.bf16.mxu1 %v8701_v46  ;;  %v3226_v46 = vld [vmem:[%s13831_s9 + $0x48] sm:$0xff]  ;;  %v3231_v24 = vld [vmem:[%s13831_s9 + $0x70] sm:$0xff] }
 0x31b   : > { %v11113_v40 = vsel %vm13846_vm8, %v2600_v54, %v2605_v53  ;;  %v11118_v57 = vsel %vm13846_vm8, %v2602_v55, %v2609_v16 }
 0x31d   : > { %v2308_v60 = vpop.f32.mrb[8].mxu1  ;;  %v2361_v61 = vpop.f32.mrb[8].mxu0 }
 0x31e   : > { %v2611_v62 = vrot.slane %v2308_v60, 7  ;;  %v2615_v63 = vrot.slane %v2361_v61, 7  ;;  %v2310_v0 = vpop.f32.mrb[9].mxu1  ;;  %v2363_v1 = vpop.f32.mrb[9].mxu0  ;;  %v3238_v60 = vld [vmem:[%s13831_s9 + $0xa8] sm:$0xff]  ;;  %v3269_v61 = vld [vmem:[%s13831_s9 + $0x1a0] sm:$0xff] }
 0x31f   : > { %v2613_v27 = vrot.slane %v2310_v0, 7  ;;  %v2617_v28 = vrot.slane %v2363_v1, 7  ;;  %v2312_v2 = vpop.f32.mrb[10].mxu1  ;;  %v2365_v3 = vpop.f32.mrb[10].mxu0  ;;  %v3221_v0 = vld [vmem:[%s13831_s9 + $0x20] sm:$0xff]  ;;  %v3222_v1 = vld [vmem:[%s13831_s9 + $0x28] sm:$0xff] }
 0x320   : > { %v2619_v5 = vrot.slane %v2312_v2, 7  ;;  %v2623_v30 = vrot.slane %v2365_v3, 7  ;;  %v2314_v31 = vpop.f32.mrb[11].mxu1  ;;  %v2367_v42 = vpop.f32.mrb[11].mxu0  ;;  %v11127_v6 = vsel %vm13846_vm8, %v2603_v51, %v2611_v62  ;;  %v11130_v8 = vsel %vm13846_vm8, %v2607_v17, %v2615_v63  ;;  %v3219_v17 = vld [vmem:[%s13831_s9 + $0x10] sm:$0xff]  ;;  %v3253_v2 = vld [vmem:[%s13831_s9 + $0x120] sm:$0xff] }
 0x321   : > { %v2621_v11 = vrot.slane %v2314_v31, 7  ;;  %v2625_v12 = vrot.slane %v2367_v42, 7  ;;  %v11145_v43 = vsel %vm13846_vm8, %v2605_v53, %v2613_v27  ;;  %v11148_v14 = vsel %vm13846_vm8, %v2609_v16, %v2617_v28  ;;  %v3252_v16 = vld [vmem:[%s13831_s9 + $0x118] sm:$0xff]  ;;  %v3254_v3 = vld [vmem:[%s13831_s9 + $0x128] sm:$0xff]  ;;  %v3271_v31 = vld [vmem:[%s13831_s9 + $0x1b0] sm:$0xff] }
 0x322   : > { %v11151_v39 = vsel %vm13846_vm8, %v2611_v62, %v2619_v5  ;;  %v11154_v18 = vsel %vm13846_vm8, %v2615_v63, %v2623_v30  ;;  %v8733_v51 = vpack.c.bf16 %v3268_v49, %v3267_v34  ;;  %v8703_v53 = vpack.c.bf16 %v3220_v52, %v3219_v17  ;;  %v3270_v63 = vld [vmem:[%s13831_s9 + $0x1a8] sm:$0xff]  ;;  %v3239_v5 = vld [vmem:[%s13831_s9 + $0xb0] sm:$0xff]  ;;  %v3240_v30 = vld [vmem:[%s13831_s9 + $0xb8] sm:$0xff] }
 0x323   : > { %v11163_v21 = vsel %vm13846_vm8, %v2613_v27, %v2621_v11  ;;  %v11166_v22 = vsel %vm13846_vm8, %v2617_v28, %v2625_v12  ;;  %v8735_v58 = vpack.c.bf16 %v3252_v16, %v3251_v9  ;;  %v8705_v62 = vpack.c.bf16 %v3238_v60, %v3237_v59  ;;  %v3272_v42 = vld [vmem:[%s13831_s9 + $0x1b8] sm:$0xff]  ;;  %v3225_v34 = vld [vmem:[%s13831_s9 + $0x40] sm:$0xff]  ;;  %v3258_v52 = vld [vmem:[%s13831_s9 + $0x148] sm:$0xff] }
 0x324   : > { %8734 = vmatprep.subr.bf16.mxu0 %v8733_v51  ;;  %8704 = vmatpush3.bf16.msra.mxu1 %v8703_v53  ;;  %v8737_v27 = vpack.c.bf16 %v3270_v63, %v3269_v61  ;;  %v8707_v28 = vpack.c.bf16 %v3222_v1, %v3221_v0  ;;  %v8739_v4 = vpack.c.bf16 %v3254_v3, %v3253_v2  ;;  %v3224_v11 = vld [vmem:[%s13831_s9 + $0x38] sm:$0xff]  ;;  %v3257_v17 = vld [vmem:[%s13831_s9 + $0x140] sm:$0xff]  ;;  %v3243_v9 = vld [vmem:[%s13831_s9 + $0xd0] sm:$0xff] }
 0x325   : > { %8736 = vmatpush3.bf16.msra.mxu0 %v8735_v58  ;;  %8706 = vmatprep.subr.bf16.mxu1 %v8705_v62  ;;  %v8709_v12 = vpack.c.bf16 %v3240_v30, %v3239_v5  ;;  %v8741_v13 = vpack.c.bf16 %v3272_v42, %v3271_v31  ;;  %v8711_v32 = vpack.c.bf16 %v3224_v11, %v3223_v10  ;;  %v3244_v16 = vld [vmem:[%s13831_s9 + $0xd8] sm:$0xff]  ;;  %v3275_v58 = vld [vmem:[%s13831_s9 + $0x1d0] sm:$0xff]  ;;  %v3278_v5 = vld [vmem:[%s13831_s9 + $0x1e8] sm:$0xff] }
 0x326   : > { %8738 = vmatprep.subr.bf16.mxu0 %v8737_v27  ;;  %v8745_v49 = vpack.c.bf16 %v3274_v33, %v3273_v25  ;;  %v8715_v51 = vpack.c.bf16 %v3226_v46, %v3225_v34  ;;  %v8747_v53 = vpack.c.bf16 %v3258_v52, %v3257_v17  ;;  %v3276_v59 = vld [vmem:[%s13831_s9 + $0x1d8] sm:$0xff]  ;;  %v8717_v60 = vpack.c.bf16 %v3244_v16, %v3243_v9  ;;  %v3227_v62 = vld [vmem:[%s13831_s9 + $0x50] sm:$0xff]  ;;  %v3245_v27 = vld [vmem:[%s13831_s9 + $0xe0] sm:$0xff] }
 0x327   : > { %v8749_v61 = vpack.c.bf16 %v3276_v59, %v3275_v58  ;;  %v3228_v63 = vld [vmem:[%s13831_s9 + $0x58] sm:$0xff]  ;;  %v3259_v0 = vld [vmem:[%s13831_s9 + $0x150] sm:$0xff]  ;;  %v3229_v30 = vld [vmem:[%s13831_s9 + $0x60] sm:$0xff]  ;;  %v11337_v17 = vadd.s32 8, %v10623_v15  ;;  %v2721_v52 = vand.u32 7, %v10623_v15  ;;  %v11345_v16 = vadd.s32 24, %v10623_v15 }
 0x328   : > { %8708 = vmatpush3.bf16.msra.mxu1 %v8707_v28  ;;  %v3260_v1 = vld [vmem:[%s13831_s9 + $0x158] sm:$0xff]  ;;  %v3246_v28 = vld [vmem:[%s13831_s9 + $0xe8] sm:$0xff]  ;;  %v8719_v2 = vpack.c.bf16 %v3228_v63, %v3227_v62  ;;  %v3261_v11 = vld [vmem:[%s13831_s9 + $0x160] sm:$0xff]  ;;  %v2643_v58 = vsel %vm13846_vm8, 0.0, %v2599_v7  ;;  %v13882_v59 = vmov 0  ;;  %v13885_v7 = vmov 0 }
 0x329   : > { %8740 = vmatpush3.bf16.msra.mxu0 %v8739_v4  ;;  %8710 = vmatprep.subr.bf16.mxu1 %v8709_v12  ;;  %v8751_v3 = vpack.c.bf16 %v3260_v1, %v3259_v0  ;;  %v3277_v4 = vld [vmem:[%s13831_s9 + $0x1e0] sm:$0xff]  ;;  %v8721_v31 = vpack.c.bf16 %v3246_v28, %v3245_v27  ;;  %v3230_v10 = vld [vmem:[%s13831_s9 + $0x68] sm:$0xff]  ;;  %v3232_v33 = vld [vmem:[%s13831_s9 + $0x78] sm:$0xff]  ;;  %v2728_v9 = vand.u32 7, %v11337_v17  ;;  %vm11352_vm9 = vcmp.eq.s32.totalorder %v2721_v52, 0 }
 0x32a   : > { %8742 = vmatprep.subr.bf16.mxu0 %v8741_v13  ;;  %v8753_v42 = vpack.c.bf16 %v3278_v5, %v3277_v4  ;;  %v3262_v12 = vld [vmem:[%s13831_s9 + $0x168] sm:$0xff]  ;;  %v3247_v13 = vld [vmem:[%s13831_s9 + $0xf0] sm:$0xff]  ;;  %v3264_v46 = vld [vmem:[%s13831_s9 + $0x178] sm:$0xff]  ;;  %v13883_v59 = vsel %vm11352_vm9, 4294967295, %v13882_v59  ;;  %v2769_v44 = vsel %vm11352_vm9, 0.0, %v2643_v58  ;;  %v2742_v48 = vand.u32 7, %v11345_v16 }
 0x32b   : > { %v8755_v23 = vpack.c.bf16 %v3262_v12, %v3261_v11  ;;  %v3263_v34 = vld [vmem:[%s13831_s9 + $0x170] sm:$0xff]  ;;  %13884 = vst [vmem:[#allocation11_spill] sm:$0xff] %v13883_v59  ;;  %vm11367_vm10 = vcmp.eq.s32.totalorder %v2728_v9, 0  ;;  %v2772_v28 = vsel %vm11352_vm9, 0.0, %v2646_v35  ;;  %vm11475_vm13 = vcmp.eq.s32.totalorder %v2721_v52, 7 }
 0x32c   : > { %8712 = vmatpush3.bf16.msra.mxu1 %v8711_v32  ;;  %v3248_v32 = vld [vmem:[%s13831_s9 + $0xf8] sm:$0xff]  ;;  %v13886_v7 = vsel %vm11367_vm10, 4294967295, %v13885_v7  ;;  %v2773_v5 = vsel %vm11367_vm10, 0.0, %v11103_v36  ;;  %v2774_v12 = vsel %vm11367_vm10, 0.0, %v11113_v40  ;;  %vm11417_vm12 = vcmp.eq.s32.totalorder %v2742_v48, 0 }
 0x32d   : > { %8744 = vmatpush3.bf16.msra.mxu0 %v8743_v20  ;;  %8714 = vmatprep.subr.bf16.mxu1 %v8713_v29  ;;  %v8723_v20 = vpack.c.bf16 %v3230_v10, %v3229_v30  ;;  %v8725_v25 = vpack.c.bf16 %v3248_v32, %v3247_v13  ;;  %v8757_v29 = vpack.c.bf16 %v3280_v19, %v3279_v37  ;;  %v2776_v32 = vsel %vm11367_vm10, 0.0, %v11118_v57 }
 0x32e   : > { %8746 = vmatprep.subr.bf16.mxu0 %v8745_v49  ;;  %v8727_v49 = vpack.c.bf16 %v3232_v33, %v3231_v24  ;;  %13887 = vst [vmem:[#allocation12_spill] sm:$0xff] %v13886_v7  ;;  %v13891_v19 = vmov 0  ;;  %vm11503_vm15 = vcmp.eq.s32.totalorder %v2728_v9, 7  ;;  %vm11579_vm7 = vcmp.eq.s32.totalorder %v2742_v48, 7 }
 0x32f   : > { %v13892_v19 = vsel %vm11417_vm12, 4294967295, %v13891_v19 }
 0x330   : > { %8716 = vmatpush3.bf16.msra.mxu1 %v8715_v51  ;;  %v8759_v51 = vpack.c.bf16 %v3264_v46, %v3263_v34  ;;  %13893 = vst [vmem:[#allocation14_spill] sm:$0xff] %v13892_v19 }
 0x331   : > { %8748 = vmatpush3.bf16.msra.mxu0 %v8747_v53  ;;  %8718 = vmatprep.subr.bf16.mxu1 %v8717_v60  ;;  %v11342_v53 = vadd.s32 16, %v10623_v15  ;;  %v2645_v60 = vsel %vm13846_vm8, 0.0, %v2601_v50 }
 0x332   : > { %8750 = vmatprep.subr.bf16.mxu0 %v8749_v61  ;;  %v2644_v61 = vsel %vm13846_vm8, 0.0, %v2600_v54  ;;  %v2771_v45 = vsel %vm11352_vm9, 0.0, %v2645_v60 }
 0x333   : > { %v2735_v50 = vand.u32 7, %v11342_v53  ;;  %v2770_v1 = vsel %vm11352_vm9, 0.0, %v2644_v61 }
 0x334   : > { %8720 = vmatpush3.bf16.msra.mxu1 %v8719_v2 }
 0x335   : > { %8752 = vmatpush3.bf16.msra.mxu0 %v8751_v3  ;;  %8722 = vmatprep.subr.bf16.mxu1 %v8721_v31  ;;  %v2775_v31 = vsel %vm11367_vm10, 0.0, %v11108_v56  ;;  %vm11411_vm11 = vcmp.eq.s32.totalorder %v2735_v50, 0  ;;  %v13888_v56 = vmov 0  ;;  %vm11565_vm8 = vcmp.eq.s32.totalorder %v2735_v50, 7 }
 0x336   : > { %8754 = vmatprep.subr.bf16.mxu0 %v8753_v42  ;;  %v13889_v56 = vsel %vm11411_vm11, 4294967295, %v13888_v56  ;;  %v2777_v57 = vsel %vm11411_vm11, 0.0, %v11127_v6  ;;  %v2778_v33 = vsel %vm11411_vm11, 0.0, %v11145_v43  ;;  %v2780_v6 = vsel %vm11411_vm11, 0.0, %v11148_v14 }
 0x337   : > { %13890 = vst [vmem:[#allocation13_spill] sm:$0xff] %v13889_v56  ;;  %v2783_v43 = vsel %vm11417_vm12, 0.0, %v11154_v18  ;;  %v2782_v14 = vsel %vm11417_vm12, 0.0, %v11163_v21  ;;  %v11466_v18 = vsub.s32 2, %v10623_v15  ;;  %v2837_v21 = vld [vmem:[%s518_s18] sm:$0xf] }
 0x338   : > { %8724 = vmatpush3.bf16.msra.mxu1 %v8723_v20 }
 0x339   : > { %8756 = vmatpush3.bf16.msra.mxu0 %v8755_v23  ;;  %8726 = vmatprep.subr.bf16.mxu1 %v8725_v25  ;;  %v2779_v23 = vsel %vm11411_vm11, 0.0, %v11130_v8 }
 0x33a   : > { %8758 = vmatprep.subr.bf16.mxu0 %v8757_v29 }
 0x33c   : > { %8728 = vmatpush3.bf16.msra.mxu1 %v8727_v49 }
 0x33d   : > { %8760 = vmatpush3.bf16.msra.mxu0 %v8759_v51  ;;  %v2781_v51 = vsel %vm11417_vm12, 0.0, %v11151_v39 }
 0x355   : > { %v2404_v62 = vpop.f32.mrb[12].mxu1  ;;  %v2457_v63 = vpop.f32.mrb[12].mxu0 }
 0x356   : > { %v11377_v54 = vadd.f32 %v2769_v44, %v2404_v62  ;;  %v11379_v55 = vadd.f32 %v2771_v45, %v2457_v63  ;;  %v2406_v0 = vpop.f32.mrb[13].mxu1  ;;  %v2459_v27 = vpop.f32.mrb[13].mxu0  ;;  %v2784_v44 = vsel %vm11417_vm12, 0.0, %v11166_v22  ;;  %v11469_v45 = vsub.s32 3, %v10623_v15 }
 0x357   : > { %v11385_v2 = vadd.f32 %v2770_v1, %v2406_v0  ;;  %v11387_v3 = vadd.f32 %v2772_v28, %v2459_v27  ;;  %v2408_v4 = vpop.f32.mrb[14].mxu1  ;;  %v2461_v30 = vpop.f32.mrb[14].mxu0  ;;  %v11471_v0 = vld [vmem:[%s518_s18 + $0x4] sm:$0xf]  ;;  %v13894_v22 = vmov 0 }
 0x358   : > { %v11395_v42 = vadd.f32 %v2773_v5, %v2408_v4  ;;  %v11397_v10 = vadd.f32 %v2775_v31, %v2461_v30  ;;  %v2410_v11 = vpop.f32.mrb[15].mxu1  ;;  %v2463_v13 = vpop.f32.mrb[15].mxu0  ;;  %v13895_v22 = vsel %vm11475_vm13, 4294967295, %v13894_v22  ;;  %v2848_v5 = vrot.slane %v2837_v21, %v10626_v38 }
 0x359   : > { %v11405_v36 = vadd.f32 %v2774_v12, %v2410_v11  ;;  %v11407_v37 = vadd.f32 %v2776_v32, %v2463_v13  ;;  %13896 = vst [vmem:[#allocation15_spill] sm:$0xff] %v13895_v22  ;;  %v2856_v30 = vrot.slane %v2837_v21, %v11466_v18  ;;  %v2852_v31 = vrot.slane %v2837_v21, %v10632_v47 }
 0x35a   : > { %v2860_v11 = vrot.slane %v2837_v21, %v11469_v45  ;;  %v2864_v52 = vrot.slane %v11471_v0, %v10626_v38  ;;  %v2872_v13 = vrot.slane %v11471_v0, %v11466_v18 }
 0x35d   : > { %v2414_v40 = vpop.f32.mrb[16].mxu1  ;;  %v2467_v20 = vpop.f32.mrb[16].mxu0 }
 0x35e   : > { %v11427_v24 = vadd.f32 %v2777_v57, %v2414_v40  ;;  %v11429_v25 = vadd.f32 %v2779_v23, %v2467_v20  ;;  %v2416_v29 = vpop.f32.mrb[17].mxu1  ;;  %v2469_v34 = vpop.f32.mrb[17].mxu0  ;;  %v11495_v57 = vld [vmem:[%s518_s18 + $0x8] sm:$0xf]  ;;  %v11497_v20 = vld [vmem:[%s518_s18 + $0xc] sm:$0xf] }
 0x35f   : > { %v11437_v46 = vadd.f32 %v2778_v33, %v2416_v29  ;;  %v11439_v49 = vadd.f32 %v2780_v6, %v2469_v34  ;;  %v2418_v8 = vpop.f32.mrb[18].mxu1  ;;  %v2471_v58 = vpop.f32.mrb[18].mxu0 }
 0x360   : > { %v11447_v60 = vadd.f32 %v2781_v51, %v2418_v8  ;;  %v11449_v61 = vadd.f32 %v2783_v43, %v2471_v58  ;;  %v2420_v35 = vpop.f32.mrb[19].mxu1  ;;  %v2473_v62 = vpop.f32.mrb[19].mxu0 }
 0x361   : > { %v11457_v39 = vadd.f32 %v2782_v14, %v2420_v35  ;;  %v11459_v63 = vadd.f32 %v2784_v44, %v2473_v62  ;;  %v13897_v14 = vmov 0 }
 0x362   : > { %v13898_v14 = vsel %vm11503_vm15, 4294967295, %v13897_v14 }
 0x363   : > { %13899 = vst [vmem:[#allocation16_spill] sm:$0xff] %v13898_v14 }
 0x396   : > { %v2510_v1 = vpop.f32.mrb[20].mxu1  ;;  %v2563_v27 = vpop.f32.mrb[20].mxu0 }
 0x397   : > { %v2512_v28 = vpop.f32.mrb[21].mxu1  ;;  %v2565_v4 = vpop.f32.mrb[21].mxu0  ;;  %v2664_v23 = vrot.slane %v2510_v1, 1  ;;  %v2670_v29 = vrot.slane %v2563_v27, 1 }
 0x398   : > { %v11483_v12 = vpop.f32.mrb[22].mxu1  ;;  %v11485_v15 = vpop.f32.mrb[22].mxu0  ;;  %v2667_v51 = vrot.slane %v2512_v28, 1  ;;  %v2673_v58 = vrot.slane %v2565_v4, 1 }
 0x399   : > { %v2665_v33 = vrot.slane %v11483_v12, 1  ;;  %v2671_v34 = vrot.slane %v11485_v15, 1  ;;  %v2516_v6 = vpop.f32.mrb[23].mxu1  ;;  %v2569_v8 = vpop.f32.mrb[23].mxu0 }
 0x39a   : > { %v2668_v43 = vrot.slane %v2516_v6, 1  ;;  %v2674_v35 = vrot.slane %v2569_v8, 1 }
 0x39b   : > { %v2666_v62 = vsel %vm2663_vm14, %v2664_v23, %v2665_v33  ;;  %v2672_v44 = vsel %vm2663_vm14, %v2670_v29, %v2671_v34 }
 0x39c   : > { %v2789_v27 = vsel %vm11475_vm13, 0.0, %v2666_v62  ;;  %v2791_v17 = vsel %vm11475_vm13, 0.0, %v2672_v44  ;;  %v2669_v9 = vsel %vm2663_vm14, %v2667_v51, %v2668_v43  ;;  %v2675_v28 = vsel %vm2663_vm14, %v2673_v58, %v2674_v35 }
 0x39d   : > { %v2821_v4 = vadd.f32 %v11377_v54, %v2789_v27  ;;  %v2823_v12 = vadd.f32 %v11379_v55, %v2791_v17  ;;  %v2790_v15 = vsel %vm11475_vm13, 0.0, %v2669_v9  ;;  %v2792_v23 = vsel %vm11475_vm13, 0.0, %v2675_v28 }
 0x39e   : > { %v2822_v29 = vadd.f32 %v11385_v2, %v2790_v15  ;;  %v2824_v6 = vadd.f32 %v11387_v3, %v2792_v23  ;;  %v2520_v8 = vpop.f32.mrb[24].mxu1  ;;  %v2573_v62 = vpop.f32.mrb[24].mxu0  ;;  %v13901_v54 = vmov 0 }
 0x39f   : > { %v11531_v58 = vadd.f32 %v2848_v5, %v2821_v4  ;;  %v11533_v55 = vadd.f32 %v2856_v30, %v2823_v12  ;;  %v2676_v44 = vrot.slane %v2520_v8, 1  ;;  %v2680_v27 = vrot.slane %v2573_v62, 1  ;;  %v11535_v17 = vpop.f32.mrb[25].mxu1  ;;  %v11537_v9 = vpop.f32.mrb[25].mxu0 }
 0x3a0   : > { %v11539_v2 = vadd.f32 %v2852_v31, %v2822_v29  ;;  %v11541_v3 = vadd.f32 %v2860_v11, %v2824_v6  ;;  %v13849_v28 = vrot.slane %v11535_v17, 1  ;;  %v13848_v15 = vrot.slane %v11537_v9, 1  ;;  %v2524_v23 = vpop.f32.mrb[26].mxu1  ;;  %v2577_v41 = vpop.f32.mrb[26].mxu0 }
 0x3a1   : > { %13900 = vst [vmem:[#allocation17_spill] sm:$0xff] %v11533_v55  ;;  %v2941_v5 = vrot.slane %v11531_v58, 4  ;;  %v3037_v30 = vmul.f32 %v11531_v58, %v11531_v58  ;;  %v2953_v4 = vrot.slane %v11533_v55, 4  ;;  %v3039_v12 = vmul.f32 %v11533_v55, %v11533_v55  ;;  %v11551_v31 = vpop.f32.mrb[27].mxu1  ;;  %v11553_v11 = vpop.f32.mrb[27].mxu0 }
 0x3a2   : > { %v13902_v54 = vsel %vm11565_vm8, 4294967295, %v13901_v54  ;;  %v11575_v6 = vmul.f32 %v11539_v2, %v11539_v2  ;;  %v13904_v62 = vmov 0  ;;  %v2677_v53 = vsel %vm2663_vm14, %v2665_v33, %v2676_v44 }
 0x3a3   : > { %13903 = vst [vmem:[#allocation18_spill] sm:$0xff] %v13902_v54  ;;  %v11570_v51 = vadd.f32 %v2941_v5, %v11531_v58  ;;  %v3053_v1 = vrot.slane %v3037_v30, 4  ;;  %v13905_v62 = vsel %vm11579_vm7, 4294967295, %v13904_v62  ;;  %v2681_v50 = vsel %vm2663_vm14, %v2671_v34, %v2680_v27 }
 0x3a4   : > { %13906 = vst [vmem:[#allocation19_spill] sm:$0xff] %v13905_v62  ;;  %v2679_v5 = vsel %vm2663_vm14, %v2668_v43, %v13849_v28  ;;  %v2683_v8 = vsel %vm2663_vm14, %v2674_v35, %v13848_v15  ;;  %v11592_v29 = vadd.f32 %v2953_v4, %v11533_v55  ;;  %v3065_v16 = vrot.slane %v3039_v12, 4 }
 0x3a5   : > { %v11597_v21 = vmul.f32 %v11541_v3, %v11541_v3  ;;  %v2793_v33 = vsel %vm11503_vm15, 0.0, %v2677_v53  ;;  %v2795_v34 = vsel %vm11503_vm15, 0.0, %v2681_v50  ;;  %v2794_v43 = vsel %vm11503_vm15, 0.0, %v2679_v5 }
 0x3a6   : > { %v2796_v35 = vsel %vm11503_vm15, 0.0, %v2683_v8  ;;  %v2825_v4 = vadd.f32 %v11395_v42, %v2793_v33  ;;  %v2827_v48 = vadd.f32 %v11397_v10, %v2795_v34  ;;  %v2826_v15 = vadd.f32 %v11405_v36, %v2794_v43 }
 0x3a7   : > { %v2828_v28 = vadd.f32 %v11407_v37, %v2796_v35  ;;  %v11612_v53 = vadd.f32 %v3053_v1, %v3037_v30  ;;  %v2684_v32 = vrot.slane %v2524_v23, 1  ;;  %v2688_v50 = vrot.slane %v2577_v41, 1 }
 0x3a8   : > { %v11617_v5 = vadd.f32 %v2864_v52, %v2825_v4  ;;  %v11622_v42 = vadd.f32 %v2872_v13, %v2827_v48  ;;  %v13908_v10 = vrot.slane %v11471_v0, %v10632_v47  ;;  %v13909_v37 = vrot.slane %v11471_v0, %v11469_v45 }
 0x3a9   : > { %v2685_v41 = vsel %vm2663_vm14, %v2676_v44, %v2684_v32  ;;  %v2708_v52 = vsel %vm2663_vm14, %v2684_v32, 0.0  ;;  %v2689_v23 = vsel %vm2663_vm14, %v2680_v27, %v2688_v50  ;;  %v2710_v30 = vsel %vm2663_vm14, %v2688_v50, 0.0 }
 0x3aa   : > { %13907 = vst [vmem:[#allocation20_spill] sm:$0xff] %v11622_v42  ;;  %v11627_v36 = vadd.f32 %v13908_v10, %v2826_v15  ;;  %v11632_v1 = vadd.f32 %v13909_v37, %v2828_v28  ;;  %v2965_v13 = vrot.slane %v11617_v5, 4  ;;  %v3041_v8 = vmul.f32 %v11617_v5, %v11617_v5 }
 0x3ab   : > { %v2977_v15 = vrot.slane %v11622_v42, 4  ;;  %v3043_v0 = vmul.f32 %v11622_v42, %v11622_v42  ;;  %v11645_v48 = vadd.f32 %v3065_v16, %v3039_v12  ;;  %v2686_v32 = vrot.slane %v11551_v31, 1 }
 0x3ac   : > { %v2690_v44 = vrot.slane %v11553_v11, 1  ;;  %v2971_v27 = vrot.slane %v11627_v36, 4  ;;  %v3042_v33 = vmul.f32 %v11627_v36, %v11627_v36  ;;  %v11655_v43 = vmul.f32 %v11632_v1, %v11632_v1 }
 0x3ad   : > { %v2797_v35 = vsel %vm11565_vm8, 0.0, %v2685_v41  ;;  %v2801_v12 = vsel %vm11579_vm7, 0.0, %v2708_v52  ;;  %v2799_v31 = vsel %vm11565_vm8, 0.0, %v2689_v23  ;;  %v2803_v11 = vsel %vm11579_vm7, 0.0, %v2710_v30 }
 0x3ae   : > { %v11666_v16 = vadd.f32 %v2965_v13, %v11617_v5  ;;  %v3077_v4 = vrot.slane %v3041_v8, 4  ;;  %v11669_v50 = vadd.f32 %v2977_v15, %v11622_v42  ;;  %v3089_v10 = vrot.slane %v3043_v0, 4 }
 0x3af   : > { %v2829_v37 = vadd.f32 %v11427_v24, %v2797_v35  ;;  %v2833_v41 = vadd.f32 %v11447_v60, %v2801_v12  ;;  %v2831_v52 = vadd.f32 %v11429_v25, %v2799_v31  ;;  %v2835_v28 = vadd.f32 %v11449_v61, %v2803_v11 }
 0x3b0   : > { %v13910_v23 = vrot.slane %v11535_v17, 1  ;;  %v2709_v13 = vsel %vm2663_vm14, %v2686_v32, 0.0  ;;  %v13911_v40 = vrot.slane %v11537_v9, 1  ;;  %v2711_v34 = vsel %vm2663_vm14, %v2690_v44, 0.0 }
 0x3b1   : > { %v13912_v24 = vrot.slane %v11495_v57, %v10626_v38  ;;  %v13914_v25 = vrot.slane %v11497_v20, %v10626_v38  ;;  %v13916_v17 = vrot.slane %v11495_v57, %v11466_v18  ;;  %v11704_v35 = vadd.f32 %v3077_v4, %v3041_v8 }
 0x3b2   : > { %v2687_v30 = vsel %vm2663_vm14, %v13910_v23, %v2686_v32  ;;  %v2691_v15 = vsel %vm2663_vm14, %v13911_v40, %v2690_v44  ;;  %v13917_v40 = vrot.slane %v11497_v20, %v11466_v18  ;;  %v11707_v31 = vadd.f32 %v3089_v10, %v3043_v0 }
 0x3b3   : > { %v11686_v60 = vadd.f32 %v13912_v24, %v2829_v37  ;;  %v11691_v61 = vadd.f32 %v13914_v25, %v2833_v41  ;;  %v11696_v32 = vadd.f32 %v13916_v17, %v2831_v52  ;;  %v2798_v8 = vsel %vm11565_vm8, 0.0, %v2687_v30 }
 0x3b4   : > { %v11701_v9 = vadd.f32 %v13917_v40, %v2835_v28  ;;  %v2802_v4 = vsel %vm11579_vm7, 0.0, %v2709_v13  ;;  %v2800_v0 = vsel %vm11565_vm8, 0.0, %v2691_v15  ;;  %v2804_v10 = vsel %vm11579_vm7, 0.0, %v2711_v34 }
 0x3b5   : > { %13913 = vst [vmem:[#allocation21_spill] sm:$0xff] %v11686_v60  ;;  %13915 = vst [vmem:[#allocation22_spill] sm:$0xff] %v11691_v61  ;;  %v2989_v11 = vrot.slane %v11686_v60, 4  ;;  %v3013_v37 = vrot.slane %v11691_v61, 4  ;;  %v11713_v41 = vmul.f32 %v11686_v60, %v11686_v60  ;;  %v11717_v28 = vmul.f32 %v11691_v61, %v11691_v61 }
 0x3b6   : > { %v11731_v24 = vmul.f32 %v11696_v32, %v11696_v32  ;;  %v11735_v30 = vmul.f32 %v11701_v9, %v11701_v9  ;;  %v2830_v17 = vadd.f32 %v11437_v46, %v2798_v8  ;;  %v2834_v40 = vadd.f32 %v11457_v39, %v2802_v4 }
 0x3b7   : > { %v11738_v13 = vadd.f32 %v2989_v11, %v11686_v60  ;;  %v11741_v15 = vadd.f32 %v3013_v37, %v11691_v61  ;;  %v2832_v12 = vadd.f32 %v11439_v49, %v2800_v0  ;;  %v2836_v23 = vadd.f32 %v11459_v63, %v2804_v10 }
 0x3b8   : > { %v13918_v44 = vrot.slane %v11539_v2, 4  ;;  %v2972_v52 = vadd.f32 %v2971_v27, %v11627_v36  ;;  %v3059_v37 = vrot.slane %v11575_v6, 4  ;;  %v3083_v19 = vrot.slane %v3042_v33, 4 }
 0x3b9   : > { %v13919_v25 = vrot.slane %v11495_v57, %v10632_v47  ;;  %v13920_v46 = vrot.slane %v11497_v20, %v10632_v47  ;;  %v13921_v39 = vrot.slane %v11495_v57, %v11469_v45  ;;  %v13922_v27 = vrot.slane %v11497_v20, %v11469_v45 }
 0x3ba   : > { %v2948_v11 = vadd.f32 %v13918_v44, %v11539_v2  ;;  %v2973_v4 = vrot.slane %v2972_v52, 2  ;;  %v3060_v0 = vadd.f32 %v3059_v37, %v11575_v6  ;;  %v3084_v10 = vadd.f32 %v3083_v19, %v3042_v33 }
 0x3bb   : > { %v11757_v34 = vadd.f32 %v13919_v25, %v2830_v17  ;;  %v11762_v49 = vadd.f32 %v13920_v46, %v2834_v40  ;;  %v11767_v63 = vadd.f32 %v13921_v39, %v2832_v12  ;;  %v11772_v44 = vadd.f32 %v13922_v27, %v2836_v23 }
 0x3bc   : > { %v2949_v8 = vrot.slane %v2948_v11, 2  ;;  %v2974_v46 = vadd.f32 %v2973_v4, %v2972_v52  ;;  %v3061_v20 = vrot.slane %v3060_v0, 2  ;;  %v3085_v23 = vrot.slane %v3084_v10, 2 }
 0x3bd   : > { %v2995_v25 = vrot.slane %v11757_v34, 4  ;;  %v3019_v17 = vrot.slane %v11762_v49, 4  ;;  %v3046_v40 = vmul.f32 %v11757_v34, %v11757_v34  ;;  %v3050_v57 = vmul.f32 %v11762_v49, %v11762_v49 }
 0x3be   : > { %v2950_v12 = vadd.f32 %v2949_v8, %v2948_v11  ;;  %v2975_v37 = vrot.slane %v2974_v46, 1  ;;  %v3062_v54 = vadd.f32 %v3061_v20, %v3060_v0  ;;  %v3086_v14 = vadd.f32 %v3085_v23, %v3084_v10 }
 0x3bf   : > { %v2996_v39 = vadd.f32 %v2995_v25, %v11757_v34  ;;  %v3020_v27 = vadd.f32 %v3019_v17, %v11762_v49  ;;  %v3107_v6 = vrot.slane %v3046_v40, 4  ;;  %v3131_v19 = vrot.slane %v3050_v57, 4 }
 0x3c0   : > { %v2951_v33 = vrot.slane %v2950_v12, 1  ;;  %v2976_v42 = vadd.f32 %v2975_v37, %v2974_v46  ;;  %v3063_v11 = vrot.slane %v3062_v54, 1  ;;  %v3087_v52 = vrot.slane %v3086_v14, 1 }
 0x3c1   : > { %v2997_v62 = vrot.slane %v2996_v39, 2  ;;  %v3021_v56 = vrot.slane %v3020_v27, 2  ;;  %v3108_v7 = vadd.f32 %v3107_v6, %v3046_v40  ;;  %v3132_v22 = vadd.f32 %v3131_v19, %v3050_v57 }
 0x3c2   : > { %v2952_v59 = vadd.f32 %v2951_v33, %v2950_v12  ;;  %v3064_v61 = vadd.f32 %v3063_v11, %v3062_v54  ;;  %v3088_v17 = vadd.f32 %v3087_v52, %v3086_v14  ;;  %v13923_v0 = vrot.slane %v11541_v3, 4 }
 0x3c3   : > { %v2998_v8 = vadd.f32 %v2997_v62, %v2996_v39  ;;  %v3022_v4 = vadd.f32 %v3021_v56, %v3020_v27  ;;  %v3109_v55 = vrot.slane %v3108_v7, 2  ;;  %v3133_v25 = vrot.slane %v3132_v22, 2 }
 0x3c4   : > { %v3168_v60 = vsel %vm641_vm0, %v2976_v42, %v2952_v59  ;;  %v2960_v10 = vadd.f32 %v13923_v0, %v11541_v3  ;;  %v3200_v12 = vsel %vm660_vm3, %v3088_v17, %v3064_v61  ;;  %v13924_v56 = vrot.slane %v11632_v1, 4 }
 0x3c5   : > { %v2999_v20 = vrot.slane %v2998_v8, 1  ;;  %v3023_v23 = vrot.slane %v3022_v4, 1  ;;  %v3110_v40 = vadd.f32 %v3109_v55, %v3108_v7  ;;  %v3134_v57 = vadd.f32 %v3133_v25, %v3132_v22 }
 0x3c6   : > { %v2961_v46 = vrot.slane %v2960_v10, 2  ;;  %v2984_v62 = vadd.f32 %v13924_v56, %v11632_v1  ;;  %v3007_v54 = vrot.slane %v11767_v63, 4  ;;  %v3031_v7 = vrot.slane %v11772_v44, 4 }
 0x3c7   : > { %v3000_v14 = vadd.f32 %v2999_v20, %v2998_v8  ;;  %v3024_v39 = vadd.f32 %v3023_v23, %v3022_v4  ;;  %v3111_v59 = vrot.slane %v3110_v40, 1  ;;  %v3135_v42 = vrot.slane %v3134_v57, 1 }
 0x3c8   : > { %v2962_v27 = vadd.f32 %v2961_v46, %v2960_v10  ;;  %v2985_v6 = vrot.slane %v2984_v62, 2  ;;  %v3008_v19 = vadd.f32 %v3007_v54, %v11767_v63  ;;  %v3048_v33 = vmul.f32 %v11767_v63, %v11767_v63 }
 0x3c9   : > { %v3112_v22 = vadd.f32 %v3111_v59, %v3110_v40  ;;  %v3136_v55 = vadd.f32 %v3135_v42, %v3134_v57  ;;  %v3169_v61 = vsel %vm643_vm1, %v3000_v14, %v3168_v60  ;;  %v3032_v25 = vadd.f32 %v3031_v7, %v11772_v44 }
 0x3ca   : > { %v3170_v37 = vsel %vm645_vm2, %v3024_v39, %v3169_v61  ;;  %v2963_v11 = vrot.slane %v2962_v27, 1  ;;  %v2986_v52 = vadd.f32 %v2985_v6, %v2984_v62  ;;  %v3009_v8 = vrot.slane %v3008_v19, 2 }
 0x3cb   : > { %v3201_v4 = vsel %vm662_vm4, %v3112_v22, %v3200_v12  ;;  %v3052_v17 = vmul.f32 %v11772_v44, %v11772_v44  ;;  %v3071_v0 = vrot.slane %v11597_v21, 4  ;;  %v3033_v57 = vrot.slane %v3032_v25, 2 }
 0x3cc   : > { %v3202_v10 = vsel %vm664_vm5, %v3136_v55, %v3201_v4  ;;  %v2964_v60 = vadd.f32 %v2963_v11, %v2962_v27  ;;  %v2987_v20 = vrot.slane %v2986_v52, 1  ;;  %v3010_v23 = vadd.f32 %v3009_v8, %v3008_v19 }
 0x3cd   : > { %v3214_v40 = vsel %vm671_vm6, %v3170_v37, %v3202_v10  ;;  %v3072_v46 = vadd.f32 %v3071_v0, %v11597_v21  ;;  %v3095_v56 = vrot.slane %v11655_v43, 4  ;;  %v3119_v54 = vrot.slane %v3048_v33, 4 }
 0x3ce   : > { %3345 = vmatprep.mubr.f32.mxu1 %v3214_v40  ;;  %v2988_v12 = vadd.f32 %v2987_v20, %v2986_v52  ;;  %v3011_v62 = vrot.slane %v3010_v23, 1  ;;  %v3143_v14 = vrot.slane %v3052_v17, 4  ;;  %v3034_v39 = vadd.f32 %v3033_v57, %v3032_v25 }
 0x3cf   : > { %v3073_v59 = vrot.slane %v3072_v46, 2  ;;  %v3096_v42 = vadd.f32 %v3095_v56, %v11655_v43  ;;  %v13925_v27 = vrot.slane %v11570_v51, 2  ;;  %v3120_v7 = vadd.f32 %v3119_v54, %v3048_v33 }
 0x3d0   : > { %v3012_v19 = vadd.f32 %v3011_v62, %v3010_v23  ;;  %v3144_v22 = vadd.f32 %v3143_v14, %v3052_v17  ;;  %v3174_v21 = vsel %vm641_vm0, %v2988_v12, %v2964_v60  ;;  %v3035_v55 = vrot.slane %v3034_v39, 1 }
 0x3d1   : > { %v2944_v6 = vadd.f32 %v13925_v27, %v11570_v51  ;;  %v3074_v61 = vadd.f32 %v3073_v59, %v3072_v46  ;;  %v3097_v37 = vrot.slane %v3096_v42, 2  ;;  %v13926_v52 = vrot.slane %v11696_v32, 4 }
 0x3d2   : > { %v3121_v4 = vrot.slane %v3120_v7, 2  ;;  %v3145_v43 = vrot.slane %v3144_v22, 2  ;;  %v13927_v25 = vrot.slane %v11666_v16, 2  ;;  %v13928_v33 = vrot.slane %v11701_v9, 4 }
 0x3d3   : > { %v2945_v11 = vrot.slane %v2944_v6, 1  ;;  %v11815_v8 = vadd.f32 %v13926_v52, %v11696_v32  ;;  %v3113_v0 = vrot.slane %v11731_v24, 4  ;;  %v3075_v10 = vrot.slane %v3074_v61, 1 }
 0x3d4   : > { %v2968_v51 = vadd.f32 %v13927_v25, %v11666_v16  ;;  %v11823_v17 = vadd.f32 %v13928_v33, %v11701_v9  ;;  %v3098_v60 = vadd.f32 %v3097_v37, %v3096_v42  ;;  %v3122_v20 = vadd.f32 %v3121_v4, %v3120_v7 }
 0x3d5   : > { %v3146_v23 = vadd.f32 %v3145_v43, %v3144_v22  ;;  %v3175_v40 = vsel %vm643_vm1, %v3012_v19, %v3174_v21  ;;  %v2991_v57 = vrot.slane %v11738_v13, 2  ;;  %v3036_v46 = vadd.f32 %v3035_v55, %v3034_v39 }
 0x3d6   : > { %v3099_v56 = vrot.slane %v3098_v60, 1  ;;  %v2946_v12 = vadd.f32 %v2945_v11, %v2944_v6  ;;  %v3015_v16 = vrot.slane %v11741_v15, 2  ;;  %v3123_v62 = vrot.slane %v3122_v20, 1 }
 0x3d7   : > { %v3147_v54 = vrot.slane %v3146_v23, 1  ;;  %v2969_v14 = vrot.slane %v2968_v51, 1  ;;  %v2992_v59 = vadd.f32 %v2991_v57, %v11738_v13  ;;  %v3076_v27 = vadd.f32 %v3075_v10, %v3074_v61 }
 0x3d8   : > { %v3100_v52 = vadd.f32 %v3099_v56, %v3098_v60  ;;  %v3055_v42 = vrot.slane %v11612_v53, 2  ;;  %v3079_v7 = vrot.slane %v11704_v35, 2  ;;  %v3124_v22 = vadd.f32 %v3123_v62, %v3122_v20 }
 0x3d9   : > { %v3148_v19 = vadd.f32 %v3147_v54, %v3146_v23  ;;  %v3016_v21 = vadd.f32 %v3015_v16, %v11741_v15  ;;  %v13929_v39 = vrot.slane %v11713_v41, 4  ;;  %v2993_v37 = vrot.slane %v2992_v59, 1 }
 0x3da   : > { %v3206_v55 = vsel %vm660_vm3, %v3100_v52, %v3076_v27  ;;  %v3056_v11 = vadd.f32 %v3055_v42, %v11612_v53  ;;  %v3080_v13 = vadd.f32 %v3079_v7, %v11704_v35  ;;  %v2970_v4 = vadd.f32 %v2969_v14, %v2968_v51 }
 0x3db   : > { %v3102_v6 = vadd.f32 %v13929_v39, %v11713_v41  ;;  %v3207_v61 = vsel %vm662_vm4, %v3124_v22, %v3206_v55  ;;  %v13930_v25 = vrot.slane %v11717_v28, 4  ;;  %v3176_v15 = vsel %vm645_vm2, %v3036_v46, %v3175_v40 }
 0x3dc   : > { %v3208_v10 = vsel %vm664_vm5, %v3148_v19, %v3207_v61  ;;  %v3057_v41 = vrot.slane %v3056_v11, 1  ;;  %v3081_v60 = vrot.slane %v3080_v13, 1  ;;  %v3017_v23 = vrot.slane %v3016_v21, 1 }
 0x3dd   : > { %v3103_v43 = vrot.slane %v3102_v6, 2  ;;  %v3126_v33 = vadd.f32 %v13930_v25, %v11717_v28  ;;  %v3216_v20 = vsel %vm671_vm6, %v3176_v15, %v3208_v10  ;;  %v3137_v35 = vrot.slane %v11735_v30, 4 }
 0x3de   : > { %3415 = vmatprep.mubr.f32.mxu0 %v3216_v20  ;;  %v2994_v51 = vadd.f32 %v2993_v37, %v2992_v59  ;;  %v3058_v56 = vadd.f32 %v3057_v41, %v3056_v11  ;;  %v3082_v16 = vadd.f32 %v3081_v60, %v3080_v13  ;;  %v3165_v28 = vsel %vm641_vm0, %v2970_v4, %v2946_v12 }
 0x3df   : > { %v3104_v53 = vadd.f32 %v3103_v43, %v3102_v6  ;;  %v3127_v57 = vrot.slane %v3126_v33, 2  ;;  %v13931_v40 = vrot.slane %v11669_v50, 2  ;;  %v13932_v27 = vrot.slane %v11592_v29, 2 }
 0x3e0   : > { %v3197_v14 = vsel %vm660_vm3, %v3082_v16, %v3058_v56  ;;  %v3003_v42 = vrot.slane %v11815_v8, 2  ;;  %v3027_v59 = vrot.slane %v11823_v17, 2  ;;  %v3018_v7 = vadd.f32 %v3017_v23, %v3016_v21 }
 0x3e1   : > { %v3105_v62 = vrot.slane %v3104_v53, 1  ;;  %v3128_v54 = vadd.f32 %v3127_v57, %v3126_v33  ;;  %v2980_v46 = vadd.f32 %v13931_v40, %v11669_v50  ;;  %v2956_v52 = vadd.f32 %v13932_v27, %v11592_v29 }
 0x3e2   : > { %v3067_v39 = vrot.slane %v11645_v48, 2  ;;  %v3166_v12 = vsel %vm643_vm1, %v2994_v51, %v3165_v28  ;;  %v3004_v50 = vadd.f32 %v3003_v42, %v11815_v8  ;;  %v3091_v55 = vrot.slane %v11707_v31, 2  ;;  %v3431_v42 = vld [vmem:[%s13832_s10 + $0x8] sm:$0xff] }
 0x3e3   : > { %v3106_v22 = vadd.f32 %v3105_v62, %v3104_v53  ;;  %v3129_v19 = vrot.slane %v3128_v54, 1  ;;  %v2981_v6 = vrot.slane %v2980_v46, 1  ;;  %v2957_v13 = vrot.slane %v2956_v52, 1 }
 0x3e4   : > { %v3068_v29 = vadd.f32 %v3067_v39, %v11645_v48  ;;  %v3028_v61 = vadd.f32 %v3027_v59, %v11823_v17  ;;  %v3092_v21 = vadd.f32 %v3091_v55, %v11707_v31  ;;  %v3114_v4 = vadd.f32 %v3113_v0, %v11731_v24  ;;  %v3435_v59 = vld [vmem:[%s13832_s10 + $0x28] sm:$0xff]  ;;  %v3438_v55 = vld [vmem:[%s13832_s10 + $0x40] sm:$0xff] }
 0x3e5   : > { %v3130_v37 = vadd.f32 %v3129_v19, %v3128_v54  ;;  %v3198_v11 = vsel %vm662_vm4, %v3106_v22, %v3197_v14  ;;  %v3167_v43 = vsel %vm645_vm2, %v3018_v7, %v3166_v12  ;;  %v3005_v25 = vrot.slane %v3004_v50, 1  ;;  %v3430_v7 = vld [vmem:[%s13832_s10] sm:$0xff]  ;;  %v3439_v39 = vld [vmem:[%s13832_s10 + $0x48] sm:$0xff] }
 0x3e6   : > { %v3138_v33 = vadd.f32 %v3137_v35, %v11735_v30  ;;  %v2982_v10 = vadd.f32 %v2981_v6, %v2980_v46  ;;  %v3069_v48 = vrot.slane %v3068_v29, 1  ;;  %v3093_v41 = vrot.slane %v3092_v21, 1  ;;  %v3434_v19 = vld [vmem:[%s13832_s10 + $0x20] sm:$0xff]  ;;  %v3443_v12 = vld [vmem:[%s13832_s10 + $0x68] sm:$0xff] }
 0x3e7   : > { %v3199_v8 = vsel %vm664_vm5, %v3130_v37, %v3198_v11  ;;  %v3115_v17 = vrot.slane %v3114_v4, 2  ;;  %v2958_v31 = vadd.f32 %v2957_v13, %v2956_v52  ;;  %v3029_v20 = vrot.slane %v3028_v61, 1  ;;  %v3442_v37 = vld [vmem:[%s13832_s10 + $0x60] sm:$0xff]  ;;  %v3433_v11 = vld [vmem:[%s13832_s10 + $0x18] sm:$0xff] }
 0x3e8   : > { %v3213_v15 = vsel %vm671_vm6, %v3167_v43, %v3199_v8  ;;  %v3139_v60 = vrot.slane %v3138_v33, 2  ;;  %v3094_v23 = vadd.f32 %v3093_v41, %v3092_v21  ;;  %v13933_v53 = vmov 0.0   ;;  %v9223_v21 = vld [vmem:[%s13833_s11 + $0x8] ss:$48 sps:$4 sm:$0xff]   ;;  %v9231_v43 = vld [vmem:[%s13833_s11 + $0x6c] ss:$48 sps:$4 sm:$0xff]  }
 0x3e9   : > { %3346 = vmatmul.mubr.f32.vlgmr.msra.gmra.mrb[2].mxu1 %v3213_v15  ;;  %v3006_v24 = vadd.f32 %v3005_v25, %v3004_v50  ;;  %v3116_v0 = vadd.f32 %v3115_v17, %v3114_v4  ;;  %v3070_v51 = vadd.f32 %v3069_v48, %v3068_v29  ;;  %v3171_v56 = vsel %vm641_vm0, %v2982_v10, %v2958_v31  ;;  %v3437_v29 = vld [vmem:[%s13832_s10 + $0x38] sm:$0xff] }
 0x3ea   : > { %3513 = vmatprep.mubr.f32.mxu1 %v13933_v53  ;;  %v3140_v57 = vadd.f32 %v3139_v60, %v3138_v33  ;;  %v3030_v16 = vadd.f32 %v3029_v20, %v3028_v61  ;;  %v8761_v22 = vpack.c.bf16 %v3435_v59, %v3431_v42  ;;  %v8763_v6 = vpack.c.bf16 %v3434_v19, %v3430_v7  ;;  %v9225_v4 = vld [vmem:[%s13833_s11 + $0xc] ss:$48 sps:$4 sm:$0xff]   ;;  %v9229_v8 = vld [vmem:[%s13833_s11 + $0x68] ss:$48 sps:$4 sm:$0xff]   ;;  %v9232_v59 = vld [vmem:[%s13833_s11 + $0xc0] ss:$48 sps:$4 sm:$0xff]  }
 0x3eb   : > { %v3117_v30 = vrot.slane %v3116_v0, 1  ;;  %v3203_v62 = vsel %vm660_vm3, %v3094_v23, %v3070_v51  ;;  %v3172_v40 = vsel %vm643_vm1, %v3006_v24, %v3171_v56  ;;  %v8765_v50 = vpack.c.bf16 %v3443_v12, %v3439_v39  ;;  %6453 = vmatprep.subr.bf16.mxu0 %v9225_v4  ;;  %v3441_v51 = vld [vmem:[%s13832_s10 + $0x58] sm:$0xff]  ;;  %v9238_v39 = vld [vmem:[%s13833_s11 + $0x120] ss:$48 sps:$4 sm:$0xff]  }
 0x3ec   : > { %v3141_v35 = vrot.slane %v3140_v57, 1  ;;  %v3173_v14 = vsel %vm645_vm2, %v3030_v16, %v3172_v40  ;;  %8762 = vmatprep.subr.bf16.mxu1 %v8761_v22  ;;  %v8767_v13 = vpack.c.bf16 %v3442_v37, %v3438_v55  ;;  %v8769_v61 = vpack.c.bf16 %v3437_v29, %v3433_v11  ;;  %v3445_v56 = vld [vmem:[%s13832_s10 + $0x78] sm:$0xff]  ;;  %v9240_v22 = vld [vmem:[%s13833_s11 + $0x124] ss:$48 sps:$4 sm:$0xff]   ;;  %v9244_v55 = vld [vmem:[%s13833_s11 + $0x180] ss:$48 sps:$4 sm:$0xff]  }
 0x3ed   : > { %v3118_v54 = vadd.f32 %v3117_v30, %v3116_v0  ;;  %8764 = vmatpush1.bf16.msra.mxu1 %v8763_v6  ;;  %v3432_v0 = vld [vmem:[%s13832_s10 + $0x10] sm:$0xff]  ;;  %v8773_v16 = vpack.c.bf16 %v3445_v56, %v3441_v51  ;;  %vm13934_vm0 = vcmask 261120   ;;  %v9237_v42 = vld [vmem:[%s13833_s11 + $0xcc] ss:$48 sps:$4 sm:$0xff]   ;;  %v9235_v7 = vld [vmem:[%s13833_s11 + $0xc8] ss:$48 sps:$4 sm:$0xff]  }
 0x3ee   : > { %v3142_v28 = vadd.f32 %v3141_v35, %v3140_v57  ;;  %8766 = vmatprep.subr.bf16.mxu1 %v8765_v50  ;;  %v3436_v57 = vld [vmem:[%s13832_s10 + $0x30] sm:$0xff]  ;;  %vm13935_vm1 = vmmov %vm13934_vm0  ;;  %v9243_v19 = vld [vmem:[%s13833_s11 + $0x12c] ss:$48 sps:$4 sm:$0xff]   ;;  %vm13940_vm2 = vcmask 1040384  }
 0x3ef   : > { %v3204_v46 = vsel %vm662_vm4, %v3118_v54, %v3203_v62  ;;  %v8771_v30 = vpack.c.bf16 %v3436_v57, %v3432_v0  ;;  %v3440_v62 = vld [vmem:[%s13832_s10 + $0x50] sm:$0xff]  ;;  %v9241_v12 = vld [vmem:[%s13833_s11 + $0x128] ss:$48 sps:$4 sm:$0xff]   ;;  %v9249_v50 = vld [vmem:[%s13833_s11 + $0x18c] ss:$48 sps:$4 sm:$0xff]  }
 0x3f0   : > { %v3205_v27 = vsel %vm664_vm5, %v3142_v28, %v3204_v46  ;;  %v3444_v54 = vld [vmem:[%s13832_s10 + $0x70] sm:$0xff]  ;;  %v9247_v37 = vld [vmem:[%s13833_s11 + $0x188] ss:$48 sps:$4 sm:$0xff]   ;;  %v9255_v29 = vld [vmem:[%s13833_s11 + $0x1ec] ss:$48 sps:$4 sm:$0xff]  }
 0x3f1   : > { %v3215_v52 = vsel %vm671_vm6, %v3173_v14, %v3205_v27  ;;  %8768 = vmatpush1.bf16.msra.mxu1 %v8767_v13  ;;  %v8775_v40 = vpack.c.bf16 %v3444_v54, %v3440_v62  ;;  %v9222_v46 = vld [vmem:[%s13833_s11 + $0x4] ss:$48 sps:$4 sm:$0xff]   ;;  %v9220_v14 = vld [vmem:[%s13833_s11] ss:$48 sps:$4 sm:$0xff]   ;;  %v9261_v4 = vld [vmem:[%s13833_s11 + $0x24c] ss:$48 sps:$4 sm:$0xff]  }
 0x3f2   : > { %3416 = vmatmul.mubr.f32.vlgmr.msra.gmra.mrb[2].mxu0 %v3215_v52  ;;  %8770 = vmatprep.subr.bf16.mxu1 %v8769_v61  ;;  %v9228_v27 = vld [vmem:[%s13833_s11 + $0x64] ss:$48 sps:$4 sm:$0xff]   ;;  %v9250_v13 = vld [vmem:[%s13833_s11 + $0x1e0] ss:$48 sps:$4 sm:$0xff]   ;;  %v9253_v61 = vld [vmem:[%s13833_s11 + $0x1e8] ss:$48 sps:$4 sm:$0xff]  }
 0x3f3   : > { %6454 = vmatpush1.bf16.msra.mxu0 %v9223_v21  ;;  %v9234_v52 = vld [vmem:[%s13833_s11 + $0xc4] ss:$48 sps:$4 sm:$0xff]   ;;  %v9285_v57 = vld [vmem:[%s13833_s11 + $0x3cc] ss:$48 sps:$4 sm:$0xff]   ;;  %v9280_v51 = vld [vmem:[%s13833_s11 + $0x3c0] ss:$48 sps:$4 sm:$0xff]  }
 0x3f4   : > { %6455 = vmatprep.subr.bf16.mxu0 %v9231_v43  ;;  %v9246_v6 = vld [vmem:[%s13833_s11 + $0x184] ss:$48 sps:$4 sm:$0xff]   ;;  %v9256_v43 = vld [vmem:[%s13833_s11 + $0x240] ss:$48 sps:$4 sm:$0xff]   ;;  %v9283_v56 = vld [vmem:[%s13833_s11 + $0x3c8] ss:$48 sps:$4 sm:$0xff]  }
 0x3f5   : > { %v9252_v11 = vld [vmem:[%s13833_s11 + $0x1e4] ss:$48 sps:$4 sm:$0xff]   ;;  %v9289_v62 = vld [vmem:[%s13833_s11 + $0x428] ss:$48 sps:$4 sm:$0xff]   ;;  %vm13941_vm3 = vmmov %vm13940_vm2 }
 0x3f6   : > { %v9258_v21 = vld [vmem:[%s13833_s11 + $0x244] ss:$48 sps:$4 sm:$0xff]   ;;  %vm13942_vm4 = vmmov %vm13940_vm2 }
 0x3f7   : > { %6456 = vmatpush1.bf16.msra.mxu0 %v9229_v8  ;;  %v9259_v8 = vld [vmem:[%s13833_s11 + $0x248] ss:$48 sps:$4 sm:$0xff]   ;;  %v9282_v0 = vld [vmem:[%s13833_s11 + $0x3c4] ss:$48 sps:$4 sm:$0xff]   ;;  %vm13943_vm5 = vmmov %vm13940_vm2 }
 0x3f8   : > { %6457 = vmatprep.subr.bf16.mxu0 %v9237_v42  ;;  %v9294_v54 = vld [vmem:[%s13833_s11 + $0x484] ss:$48 sps:$4 sm:$0xff]  }
 0x3f9   : > { %v9306_v42 = vld [vmem:[%s13833_s11 + $0x544] ss:$48 sps:$4 sm:$0xff]  }
 0x3fb   : > { %6458 = vmatpush1.bf16.msra.mxu0 %v9235_v7  ;;  %v9304_v7 = vld [vmem:[%s13833_s11 + $0x540] ss:$48 sps:$4 sm:$0xff]  }
 0x3fc   : > { %6459 = vmatprep.subr.bf16.mxu0 %v9243_v19  ;;  %v9312_v19 = vld [vmem:[%s13833_s11 + $0x5a4] ss:$48 sps:$4 sm:$0xff]  }
 0x3ff   : > { %6460 = vmatpush1.bf16.msra.mxu0 %v9241_v12  ;;  %v9310_v12 = vld [vmem:[%s13833_s11 + $0x5a0] ss:$48 sps:$4 sm:$0xff]  }
 0x400   : > { %6461 = vmatprep.subr.bf16.mxu0 %v9249_v50  ;;  %v9318_v50 = vld [vmem:[%s13833_s11 + $0x604] ss:$48 sps:$4 sm:$0xff]  }
 0x403   : > { %6462 = vmatpush1.bf16.msra.mxu0 %v9247_v37  ;;  %v3591_v37 = vld [vmem:[%s13829_s7] sm:$0xf] }
 0x404   : > { %6463 = vmatprep.subr.bf16.mxu0 %v9255_v29  ;;  %v3600_v29 = vrot.slane %v3591_v37, %v10632_v47 }
 0x407   : > { %6464 = vmatpush1.bf16.msra.mxu0 %v9253_v61  ;;  %v3617_v61 = vld [vmem:[%s13830_s8] sm:$0xf] }
 0x408   : > { %6465 = vmatprep.subr.bf16.mxu0 %v9261_v4 }
 0x40b   : > { %6466 = vmatpush1.bf16.msra.mxu0 %v9259_v8 }
 0x4bc   : > { %v8619_v25 = vpop.f32.mrb[2].mxu1 }
 0x4bd   : > { %v8620_v33 = vpop.f32.mrb[3].mxu1 }
 0x4be   : > { %v8621_v15 = vadd.f32 %v8620_v33, %v8619_v25  ;;  %v9264_v25 = vld [vmem:[%s13833_s11 + $0x2a4] ss:$48 sps:$4 sm:$0xff]   ;;  %v9267_v33 = vld [vmem:[%s13833_s11 + $0x2ac] ss:$48 sps:$4 sm:$0xff]  }
 0x4bf   : > { %6467 = vmatprep.subr.bf16.mxu0 %v9267_v33 }
 0x4c5   : > { %v8654_v10 = vpop.f32.mrb[2].mxu0 }
 0x4c6   : > { %v8655_v48 = vpop.f32.mrb[3].mxu0 }
 0x4c7   : > { %v8656_v41 = vadd.f32 %v8655_v48, %v8654_v10  ;;  %v9265_v10 = vld [vmem:[%s13833_s11 + $0x2a8] ss:$48 sps:$4 sm:$0xff]   ;;  %v9268_v48 = vld [vmem:[%s13833_s11 + $0x300] ss:$48 sps:$4 sm:$0xff]  }
 0x4c8   : > { %6468 = vmatpush1.bf16.msra.mxu0 %v9265_v10 }
 0x4c9   : > { %v3418_v17 = vadd.f32 %v8656_v41, %v8621_v15  ;;  %v9262_v15 = vld [vmem:[%s13833_s11 + $0x2a0] ss:$48 sps:$4 sm:$0xff]   ;;  %v9270_v41 = vld [vmem:[%s13833_s11 + $0x304] ss:$48 sps:$4 sm:$0xff]  }
 0x4cb   : > { %v3421_v60 = vmul.f32 0.0078125, %v3418_v17  ;;  %v9271_v17 = vld [vmem:[%s13833_s11 + $0x308] ss:$48 sps:$4 sm:$0xff]  }
 0x4cd   : > { %v3422_v31 = vmul.f32 %v3421_v60, %v3421_v60 }
 0x4cf   : > { %v3424_v20 = vrot.slane %v3422_v31, 4  ;;  %v9276_v31 = vld [vmem:[%s13833_s11 + $0x364] ss:$48 sps:$4 sm:$0xff]  }
 0x4d1   : > { %v3426_v23 = vsub.f32 %v3421_v60, %v3424_v20  ;;  %v9279_v20 = vld [vmem:[%s13833_s11 + $0x36c] ss:$48 sps:$4 sm:$0xff]  }
 0x4d3   : > { %v3427_v24 = vadd.f32 1e-05, %v3426_v23  ;;  %v9274_v23 = vld [vmem:[%s13833_s11 + $0x360] ss:$48 sps:$4 sm:$0xff]  }
 0x4d5   : > { %9926 = vrsqrt.f32 %v3427_v24  ;;  %v9277_v24 = vld [vmem:[%s13833_s11 + $0x368] ss:$48 sps:$4 sm:$0xff]  }
 0x4df   : > { %v9927_v35 = vpop.eup %9926 }
 0x4e0   : > { %v3429_v28 = vsel %vm671_vm6, %v3421_v60, %v9927_v35  ;;  %v9273_v60 = vld [vmem:[%s13833_s11 + $0x30c] ss:$48 sps:$4 sm:$0xff]   ;;  %vm13944_vm6 = vmmov %vm13940_vm2 }
 0x4e1   : > { %8077 = vmatmul.mubr.msk.f32.vlgmr.msra.gmra.mrb[28].mxu1 %vm13934_vm0, %v3429_v28  ;;  %6469 = vmatprep.subr.bf16.mxu0 %v9273_v60  ;;  %v9291_v35 = vld [vmem:[%s13833_s11 + $0x42c] ss:$48 sps:$4 sm:$0xff]   ;;  %v3608_v60 = vrot.slane %v3591_v37, %v11469_v45  ;;  %vm13945_vm0 = vmmov %vm13940_vm2 }
 0x4e2   : > { %8772 = vmatpush1.bf16.msra.mxu1 %v8771_v30  ;;  %3584 = vmatprep.mubr.f32.mxu1 %v13933_v53  ;;  %v9226_v53 = vld [vmem:[%s13833_s11 + $0x60] ss:$48 sps:$4 sm:$0xff]   ;;  %v9288_v30 = vld [vmem:[%s13833_s11 + $0x424] ss:$48 sps:$4 sm:$0xff]  }
 0x4e3   : > { %8774 = vmatprep.subr.bf16.mxu1 %v8773_v16  ;;  %6470 = vmatpush1.bf16.msra.mxu0 %v9271_v17  ;;  %v9286_v16 = vld [vmem:[%s13833_s11 + $0x420] ss:$48 sps:$4 sm:$0xff]  }
 0x4e4   : > { %6471 = vmatprep.subr.bf16.mxu0 %v9279_v20 }
 0x4e6   : > { %8776 = vmatpush1.bf16.msra.mxu1 %v8775_v40  ;;  %v9292_v40 = vld [vmem:[%s13833_s11 + $0x480] ss:$48 sps:$4 sm:$0xff]  }
 0x4e7   : > { %6347 = vmatprep.subr.bf16.mxu1 %v9222_v46  ;;  %6472 = vmatpush1.bf16.msra.mxu0 %v9277_v24  ;;  %v9295_v46 = vld [vmem:[%s13833_s11 + $0x488] ss:$48 sps:$4 sm:$0xff]  }
 0x4e8   : > { %6473 = vmatprep.subr.bf16.mxu0 %v9285_v57 }
 0x4e9   : > { %8078 = vmatmul.mubr.msk.f32.vlgmr.msra.gmra.mrb[30].mxu1 %vm13935_vm1, %v3429_v28  ;;  %v9297_v28 = vld [vmem:[%s13833_s11 + $0x48c] ss:$48 sps:$4 sm:$0xff]   ;;  %vm13946_vm1 = vmmov %vm13945_vm0 }
 0x4ea   : > { %6348 = vmatpush1.bf16.msra.mxu1 %v9220_v14  ;;  %v9300_v14 = vld [vmem:[%s13833_s11 + $0x4e4] ss:$48 sps:$4 sm:$0xff]  }
 0x4eb   : > { %6349 = vmatprep.subr.bf16.mxu1 %v9228_v27  ;;  %6474 = vmatpush1.bf16.msra.mxu0 %v9283_v56  ;;  %v9303_v27 = vld [vmem:[%s13833_s11 + $0x4ec] ss:$48 sps:$4 sm:$0xff]  }
 0x4ec   : > { %6475 = vmatprep.subr.bf16.mxu0 %v9291_v35 }
 0x4ee   : > { %6350 = vmatpush1.bf16.msra.mxu1 %v9226_v53  ;;  %v9298_v53 = vld [vmem:[%s13833_s11 + $0x4e0] ss:$48 sps:$4 sm:$0xff]  }
 0x4ef   : > { %6351 = vmatprep.subr.bf16.mxu1 %v9234_v52  ;;  %6476 = vmatpush1.bf16.msra.mxu0 %v9289_v62  ;;  %v9301_v52 = vld [vmem:[%s13833_s11 + $0x4e8] ss:$48 sps:$4 sm:$0xff]  }
 0x4f0   : > { %6477 = vmatprep.subr.bf16.mxu0 %v9297_v28 }
 0x4f2   : > { %6352 = vmatpush1.bf16.msra.mxu1 %v9232_v59  ;;  %v9309_v59 = vld [vmem:[%s13833_s11 + $0x54c] ss:$48 sps:$4 sm:$0xff]  }
 0x4f3   : > { %6353 = vmatprep.subr.bf16.mxu1 %v9240_v22  ;;  %6478 = vmatpush1.bf16.msra.mxu0 %v9295_v46  ;;  %v9307_v22 = vld [vmem:[%s13833_s11 + $0x548] ss:$48 sps:$4 sm:$0xff]  }
 0x4f4   : > { %6479 = vmatprep.subr.bf16.mxu0 %v9303_v27 }
 0x4f6   : > { %6354 = vmatpush1.bf16.msra.mxu1 %v9238_v39  ;;  %v9315_v39 = vld [vmem:[%s13833_s11 + $0x5ac] ss:$48 sps:$4 sm:$0xff]  }
 0x4f7   : > { %6355 = vmatprep.subr.bf16.mxu1 %v9246_v6  ;;  %6480 = vmatpush1.bf16.msra.mxu0 %v9301_v52  ;;  %v9313_v6 = vld [vmem:[%s13833_s11 + $0x5a8] ss:$48 sps:$4 sm:$0xff]  }
 0x4f8   : > { %6481 = vmatprep.subr.bf16.mxu0 %v9309_v59 }
 0x4fa   : > { %6356 = vmatpush1.bf16.msra.mxu1 %v9244_v55  ;;  %v9321_v55 = vld [vmem:[%s13833_s11 + $0x60c] ss:$48 sps:$4 sm:$0xff]  }
 0x4fb   : > { %6357 = vmatprep.subr.bf16.mxu1 %v9252_v11  ;;  %6482 = vmatpush1.bf16.msra.mxu0 %v9307_v22  ;;  %v3596_v11 = vrot.slane %v3591_v37, %v10626_v38 }
 0x4fc   : > { %6483 = vmatprep.subr.bf16.mxu0 %v9315_v39 }
 0x4fe   : > { %6358 = vmatpush1.bf16.msra.mxu1 %v9250_v13 }
 0x4ff   : > { %6359 = vmatprep.subr.bf16.mxu1 %v9258_v21  ;;  %6484 = vmatpush1.bf16.msra.mxu0 %v9313_v6 }
 0x500   : > { %6506 = vmatprep.subr.bf16.mxu0 %v9321_v55 }
 0x502   : > { %6360 = vmatpush1.bf16.msra.mxu1 %v9256_v43 }
 0x503   : > { %6361 = vmatprep.subr.bf16.mxu1 %v9264_v25  ;;  %v3638_v25 = vrot.slane %v3617_v61, %v10626_v38 }
 0x506   : > { %6362 = vmatpush1.bf16.msra.mxu1 %v9262_v15  ;;  %v3642_v15 = vrot.slane %v3617_v61, %v10632_v47 }
 0x507   : > { %6363 = vmatprep.subr.bf16.mxu1 %v9270_v41  ;;  %v3604_v41 = vrot.slane %v3591_v37, %v11466_v18 }
 0x50a   : > { %6364 = vmatpush1.bf16.msra.mxu1 %v9268_v48 }
 0x50b   : > { %6365 = vmatprep.subr.bf16.mxu1 %v9276_v31 }
 0x50e   : > { %6366 = vmatpush1.bf16.msra.mxu1 %v9274_v23 }
 0x50f   : > { %6367 = vmatprep.subr.bf16.mxu1 %v9282_v0 }
 0x512   : > { %6368 = vmatpush1.bf16.msra.mxu1 %v9280_v51 }
 0x513   : > { %6369 = vmatprep.subr.bf16.mxu1 %v9288_v30  ;;  %v3646_v30 = vrot.slane %v3617_v61, %v11466_v18 }
 0x516   : > { %6370 = vmatpush1.bf16.msra.mxu1 %v9286_v16  ;;  %v3650_v16 = vrot.slane %v3617_v61, %v11469_v45 }
 0x517   : > { %6371 = vmatprep.subr.bf16.mxu1 %v9294_v54 }
 0x51a   : > { %6372 = vmatpush1.bf16.msra.mxu1 %v9292_v40 }
 0x51b   : > { %6373 = vmatprep.subr.bf16.mxu1 %v9300_v14 }
 0x51e   : > { %6374 = vmatpush1.bf16.msra.mxu1 %v9298_v53 }
 0x51f   : > { %6375 = vmatprep.subr.bf16.mxu1 %v9306_v42 }
 0x522   : > { %6376 = vmatpush1.bf16.msra.mxu1 %v9304_v7 }
 0x523   : > { %6377 = vmatprep.subr.bf16.mxu1 %v9312_v19 }
 0x526   : > { %6378 = vmatpush1.bf16.msra.mxu1 %v9310_v12 }
 0x527   : > { %6400 = vmatprep.subr.bf16.mxu1 %v9318_v50 }
 0x5b4   : > { %v3515_v13 = vpop.f32.mrb[28].mxu1 }
 0x5b5   : > { %v3613_v21 = vmul.f32 %v3596_v11, %v3515_v13  ;;  %v3517_v4 = vpop.f32.mrb[29].mxu1 }
 0x5b6   : > { %v3614_v43 = vmul.f32 %v3600_v29, %v3517_v4 }
 0x5b7   : > { %v3622_v8 = vrot.slane %v3613_v21, 4 }
 0x5b8   : > { %v3623_v33 = vrot.slane %v3614_v43, 4  ;;  %v3659_v10 = vcombine.high %v3613_v21, %v3614_v43 }
 0x5b9   : > { %v3630_v48 = vmul.f32 %v3622_v8, %v3515_v13 }
 0x5ba   : > { %v3631_v17 = vmul.f32 %v3623_v33, %v3517_v4  ;;  %v3667_v28 = vrot.slane %v3659_v10, %v10640_v26 }
 0x5bb   : > { %v3655_v31 = vsub.f32 %v3638_v25, %v3630_v48 }
 0x5bc   : > { %v3656_v20 = vsub.f32 %v3642_v15, %v3631_v17  ;;  %v3586_v23 = vpop.f32.mrb[30].mxu1 }
 0x5bd   : > { %v3615_v24 = vmul.f32 %v3604_v41, %v3586_v23  ;;  %v3588_v0 = vpop.f32.mrb[31].mxu1 }
 0x5be   : > { %v3793_v57 = vcombine.low %v3655_v31, %v3656_v20  ;;  %v3616_v51 = vmul.f32 %v3608_v60, %v3588_v0  ;;  %v13936_v31 = vld [vmem:[#allocation21_spill] sm:$0xff] }
 0x5bf   : > { %v3624_v56 = vrot.slane %v3615_v24, 4 }
 0x5c0   : > { %v3625_v35 = vrot.slane %v3616_v51, 4  ;;  %v3660_v62 = vcombine.high %v3615_v24, %v3616_v51  ;;  %v3801_v22 = vrot.slane %v3793_v57, %v10640_v26 }
 0x5c1   : > { %v3632_v54 = vmul.f32 %v3624_v56, %v3586_v23  ;;  %v13937_v23 = vld [vmem:[#allocation22_spill] sm:$0xff] }
 0x5c2   : > { %v3633_v40 = vmul.f32 %v3625_v35, %v3588_v0  ;;  %v3674_v46 = vrot.slane %v3660_v62, %v10640_v26  ;;  %v13938_v0 = vld [vmem:[#allocation17_spill] sm:$0xff] }
 0x5c3   : > { %v3657_v14 = vsub.f32 %v3646_v30, %v3632_v54 }
 0x5c4   : > { %v3658_v27 = vsub.f32 %v3650_v16, %v3633_v40  ;;  %v3675_v53 = vcombine.low %v3667_v28, %v3674_v46  ;;  %v3676_v52 = vcombine.high %v3667_v28, %v3674_v46 }
 0x5c6   : > { %v3683_v42 = vrot.slane %v3675_v53, %v10640_v26  ;;  %v3690_v59 = vrot.slane %v3676_v52, %v10640_v26  ;;  %v3794_v7 = vcombine.low %v3657_v14, %v3658_v27 }
 0x5c8   : > { %v12149_v19 = vcombine.high %v3683_v42, %v3683_v42  ;;  %v12151_v39 = vcombine.high %v3690_v59, %v3690_v59  ;;  %v3696_v12 = vrot.slane %v3683_v42, %v10626_v38  ;;  %v3700_v6 = vrot.slane %v3683_v42, %v10632_v47 }
 0x5c9   : > { %v3704_v50 = vrot.slane %v3683_v42, %v11466_v18  ;;  %v3708_v55 = vrot.slane %v3683_v42, %v11469_v45  ;;  %v3712_v37 = vrot.slane %v3690_v59, %v10626_v38  ;;  %v3716_v11 = vrot.slane %v3690_v59, %v10632_v47 }
 0x5ca   : > { %v3720_v29 = vrot.slane %v3690_v59, %v11466_v18  ;;  %v3724_v13 = vrot.slane %v3690_v59, %v11469_v45  ;;  %v3808_v61 = vrot.slane %v3794_v7, %v10640_v26  ;;  %v3774_v21 = vmul.f32 %v3700_v6, %v11539_v2 }
 0x5cb   : > { %v3778_v4 = vmul.f32 %v3716_v11, %v11627_v36  ;;  %v3773_v43 = vmul.f32 %v3696_v12, %v11531_v58  ;;  %v3777_v8 = vmul.f32 %v3712_v37, %v11617_v5  ;;  %v3732_v25 = vrot.slane %v12149_v19, %v10632_v47 }
 0x5cc   : > { %v3809_v33 = vcombine.low %v3801_v22, %v3808_v61  ;;  %v3810_v15 = vcombine.high %v3801_v22, %v3808_v61  ;;  %v3748_v10 = vrot.slane %v12151_v39, %v10632_v47  ;;  %v3728_v48 = vrot.slane %v12149_v19, %v10626_v38 }
 0x5cd   : > { %v3782_v41 = vmul.f32 %v3732_v25, %v11757_v34  ;;  %v3744_v2 = vrot.slane %v12151_v39, %v10626_v38  ;;  %v3776_v58 = vmul.f32 %v3708_v55, %v11541_v3  ;;  %v3780_v5 = vmul.f32 %v3724_v13, %v11632_v1  ;;  %v13939_v34 = vld [vmem:[#allocation20_spill] sm:$0xff] }
 0x5ce   : > { %v3817_v36 = vrot.slane %v3809_v33, %v10640_v26  ;;  %v3824_v17 = vrot.slane %v3810_v15, %v10640_v26  ;;  %v3786_v60 = vmul.f32 %v3748_v10, %v11762_v49  ;;  %v3781_v20 = vmul.f32 %v3728_v48, %v13936_v31 }
 0x5cf   : > { %v3785_v24 = vmul.f32 %v3744_v2, %v13937_v23  ;;  %v3775_v57 = vmul.f32 %v3704_v50, %v13938_v0  ;;  %v3779_v51 = vmul.f32 %v3720_v29, %v13939_v34  ;;  %v3740_v56 = vrot.slane %v12149_v19, %v11469_v45 }
 0x5d0   : > { %v12186_v3 = vcombine.high %v3817_v36, %v3817_v36  ;;  %v12188_v1 = vcombine.high %v3824_v17, %v3824_v17  ;;  %v3834_v30 = vrot.slane %v3817_v36, %v10632_v47  ;;  %v3850_v26 = vrot.slane %v3824_v17, %v10632_v47 }
 0x5d1   : > { %v3830_v49 = vrot.slane %v3817_v36, %v10626_v38  ;;  %v3846_v35 = vrot.slane %v3824_v17, %v10626_v38  ;;  %v3842_v16 = vrot.slane %v3817_v36, %v11469_v45  ;;  %v3858_v62 = vrot.slane %v3824_v17, %v11469_v45 }
 0x5d2   : > { %v12196_v54 = vadd.f32 %v3834_v30, %v3774_v21  ;;  %v12198_v28 = vadd.f32 %v3850_v26, %v3778_v4  ;;  %v3866_v40 = vrot.slane %v12186_v3, %v10632_v47  ;;  %v3882_v46 = vrot.slane %v12188_v1, %v10632_v47 }
 0x5d3   : > { %v12204_v14 = vadd.f32 %v3830_v49, %v3773_v43  ;;  %v12206_v27 = vadd.f32 %v3846_v35, %v3777_v8  ;;  %v3862_v53 = vrot.slane %v12186_v3, %v10626_v38  ;;  %v3878_v52 = vrot.slane %v12188_v1, %v10626_v38 }
 0x5d4   : > { %v8080_v42 = vmul.f32 -1.442695, %v12196_v54  ;;  %v8084_v59 = vmul.f32 -1.442695, %v12198_v28  ;;  %v12214_v7 = vadd.f32 %v3866_v40, %v3782_v41  ;;  %v12216_v22 = vadd.f32 %v3882_v46, %v3786_v60 }
 0x5d5   : > { %v8079_v12 = vmul.f32 -1.442695, %v12204_v14  ;;  %v8083_v6 = vmul.f32 -1.442695, %v12206_v27  ;;  %v12220_v50 = vadd.f32 %v3862_v53, %v3781_v20  ;;  %v12222_v55 = vadd.f32 %v3878_v52, %v3785_v24 }
 0x5d6   : > { %9928 = vpow2.f32 %v8080_v42  ;;  %v8088_v37 = vmul.f32 -1.442695, %v12214_v7  ;;  %v8092_v11 = vmul.f32 -1.442695, %v12216_v22  ;;  %v12226_v29 = vadd.f32 %v3842_v16, %v3776_v58 }
 0x5d7   : > { %9930 = vpow2.f32 %v8084_v59  ;;  %v8087_v13 = vmul.f32 -1.442695, %v12220_v50  ;;  %v8091_v61 = vmul.f32 -1.442695, %v12222_v55  ;;  %v12230_v21 = vadd.f32 %v3858_v62, %v3780_v5 }
 0x5d8   : > { %9932 = vpow2.f32 %v8079_v12  ;;  %v8082_v4 = vmul.f32 -1.442695, %v12226_v29  ;;  %v3838_v43 = vrot.slane %v3817_v36, %v11466_v18  ;;  %v3854_v8 = vrot.slane %v3824_v17, %v11466_v18 }
 0x5d9   : > { %9934 = vpow2.f32 %v8083_v6  ;;  %v8086_v25 = vmul.f32 -1.442695, %v12230_v21  ;;  %v3756_v33 = vrot.slane %v12151_v39, %v11469_v45  ;;  %v3784_v15 = vmul.f32 %v3740_v56, %v11767_v63 }
 0x5da   : > { %9936 = vpow2.f32 %v8088_v37  ;;  %v12239_v10 = vadd.f32 %v3838_v43, %v3775_v57  ;;  %v12241_v48 = vadd.f32 %v3854_v8, %v3779_v51  ;;  %v3874_v41 = vrot.slane %v12186_v3, %v11469_v45 }
 0x5db   : > { %9938 = vpow2.f32 %v8092_v11  ;;  %v3788_v2 = vmul.f32 %v3756_v33, %v11772_v44  ;;  %v3890_v58 = vrot.slane %v12188_v1, %v11469_v45  ;;  %v3736_v5 = vrot.slane %v12149_v19, %v11466_v18 }
 0x5dc   : > { %9940 = vpow2.f32 %v8087_v13  ;;  %v8081_v63 = vmul.f32 -1.442695, %v12239_v10  ;;  %v8085_v36 = vmul.f32 -1.442695, %v12241_v48  ;;  %v12252_v17 = vadd.f32 %v3874_v41, %v3784_v15 }
 0x5dd   : > { %9942 = vpow2.f32 %v8091_v61  ;;  %v12254_v60 = vadd.f32 %v3890_v58, %v3788_v2  ;;  %v3752_v31 = vrot.slane %v12151_v39, %v11466_v18  ;;  %v3783_v44 = vmul.f32 %v3736_v5, %v11696_v32 }
 0x5de   : > { %9944 = vpow2.f32 %v8082_v4  ;;  %v8090_v20 = vmul.f32 -1.442695, %v12252_v17  ;;  %v3870_v19 = vrot.slane %v12186_v3, %v11466_v18  ;;  %v3886_v23 = vrot.slane %v12188_v1, %v11466_v18 }
 0x5df   : > { %9946 = vpow2.f32 %v8086_v25  ;;  %v3787_v24 = vmul.f32 %v3752_v31, %v11701_v9  ;;  %v8094_v11 = vmul.f32 -1.442695, %v12254_v60 }
 0x5e0   : > { %v9929_v0 = vpop.eup %9928  ;;  %9948 = vpow2.f32 %v8081_v63  ;;  %v12265_v57 = vadd.f32 %v3870_v19, %v3783_v44  ;;  %v9319_v44 = vld [vmem:[%s13833_s11 + $0x608] ss:$48 sps:$4 sm:$0xff]  }
 0x5e1   : > { %v9931_v34 = vpop.eup %9930  ;;  %v3972_v39 = vadd.f32 1.0, %v9929_v0  ;;  %9950 = vpow2.f32 %v8085_v36  ;;  %v12267_v32 = vadd.f32 %v3886_v23, %v3787_v24  ;;  %v9324_v23 = vld [vmem:[%s13833_s11 + $0x664] ss:$48 sps:$4 sm:$0xff]   ;;  %v9327_v24 = vld [vmem:[%s13833_s11 + $0x66c] ss:$48 sps:$4 sm:$0xff]  }
 0x5e2   : > { %v9933_v51 = vpop.eup %9932  ;;  %v3976_v56 = vadd.f32 1.0, %v9931_v34  ;;  %9952 = vpow2.f32 %v8090_v20  ;;  %v8089_v43 = vmul.f32 -1.442695, %v12265_v57 }
 0x5e3   : > { %v9935_v30 = vpop.eup %9934  ;;  %9954 = vrcp.f32 %v3972_v39  ;;  %v3971_v3 = vadd.f32 1.0, %v9933_v51  ;;  %v8093_v33 = vmul.f32 -1.442695, %v12267_v32 }
 0x5e4   : > { %v9937_v26 = vpop.eup %9936  ;;  %9956 = vrcp.f32 %v3976_v56  ;;  %v3975_v1 = vadd.f32 1.0, %v9935_v30  ;;  %v9322_v56 = vld [vmem:[%s13833_s11 + $0x660] ss:$48 sps:$4 sm:$0xff]  }
 0x5e5   : > { %v9939_v49 = vpop.eup %9938  ;;  %9958 = vrcp.f32 %v3971_v3  ;;  %v3980_v9 = vadd.f32 1.0, %v9937_v26  ;;  %v9333_v26 = vld [vmem:[%s13833_s11 + $0x6cc] ss:$48 sps:$4 sm:$0xff]  }
 0x5e6   : > { %v9941_v35 = vpop.eup %9940  ;;  %9960 = vrcp.f32 %v3975_v1  ;;  %v3984_v16 = vadd.f32 1.0, %v9939_v49 }
 0x5e7   : > { %v9943_v62 = vpop.eup %9942  ;;  %9962 = vrcp.f32 %v3980_v9  ;;  %v3979_v40 = vadd.f32 1.0, %v9941_v35 }
 0x5e8   : > { %v9945_v46 = vpop.eup %9944  ;;  %9964 = vrcp.f32 %v3984_v16  ;;  %v3983_v53 = vadd.f32 1.0, %v9943_v62 }
 0x5e9   : > { %v9947_v52 = vpop.eup %9946  ;;  %9966 = vrcp.f32 %v3979_v40  ;;  %v3974_v42 = vadd.f32 1.0, %v9945_v46  ;;  %v9328_v40 = vld [vmem:[%s13833_s11 + $0x6c0] ss:$48 sps:$4 sm:$0xff]  }
 0x5ea   : > { %v9949_v59 = vpop.eup %9948  ;;  %9968 = vrcp.f32 %v3983_v53  ;;  %v3978_v12 = vadd.f32 1.0, %v9947_v52 }
 0x5eb   : > { %v9951_v6 = vpop.eup %9950  ;;  %9970 = vrcp.f32 %v3974_v42  ;;  %v3973_v37 = vadd.f32 1.0, %v9949_v59  ;;  %v9339_v42 = vld [vmem:[%s13833_s11 + $0x72c] ss:$48 sps:$4 sm:$0xff]  }
 0x5ec   : > { %v9953_v13 = vpop.eup %9952  ;;  %9972 = vrcp.f32 %v3978_v12  ;;  %v3977_v61 = vadd.f32 1.0, %v9951_v6  ;;  %v9334_v6 = vld [vmem:[%s13833_s11 + $0x720] ss:$48 sps:$4 sm:$0xff]  }
 0x5ed   : > { %v9955_v4 = vpop.eup %9954  ;;  %9974 = vrcp.f32 %v3973_v37  ;;  %v3982_v0 = vadd.f32 1.0, %v9953_v13  ;;  %v9337_v37 = vld [vmem:[%s13833_s11 + $0x728] ss:$48 sps:$4 sm:$0xff]   ;;  %v9345_v13 = vld [vmem:[%s13833_s11 + $0x78c] ss:$48 sps:$4 sm:$0xff]  }
 0x5ee   : > { %v9957_v8 = vpop.eup %9956  ;;  %v4020_v25 = vmul.f32 %v9955_v4, %v12196_v54  ;;  %9976 = vrcp.f32 %v3977_v61  ;;  %v9316_v54 = vld [vmem:[%s13833_s11 + $0x600] ss:$48 sps:$4 sm:$0xff]  }
 0x5ef   : > { %v9959_v15 = vpop.eup %9958  ;;  %v4024_v41 = vmul.f32 %v9957_v8, %v12198_v28  ;;  %9978 = vpow2.f32 %v8094_v11  ;;  %v9342_v11 = vld [vmem:[%s13833_s11 + $0x784] ss:$48 sps:$4 sm:$0xff]   ;;  %v9340_v4 = vld [vmem:[%s13833_s11 + $0x780] ss:$48 sps:$4 sm:$0xff]  }
 0x5f0   : > { %v9961_v2 = vpop.eup %9960  ;;  %v4019_v58 = vmul.f32 %v9959_v15, %v12204_v14  ;;  %9980 = vpow2.f32 %v8089_v43  ;;  %v9343_v43 = vld [vmem:[%s13833_s11 + $0x788] ss:$48 sps:$4 sm:$0xff]   ;;  %v9348_v8 = vld [vmem:[%s13833_s11 + $0x7e4] ss:$48 sps:$4 sm:$0xff]  }
 0x5f1   : > { %v9963_v5 = vpop.eup %9962  ;;  %v12275_v63 = vpack.c.bf16 %v4024_v41, %v4020_v25  ;;  %v4023_v36 = vmul.f32 %v9961_v2, %v12206_v27  ;;  %9982 = vpow2.f32 %v8093_v33  ;;  %v9351_v25 = vld [vmem:[%s13833_s11 + $0x7ec] ss:$48 sps:$4 sm:$0xff]   ;;  %v9346_v41 = vld [vmem:[%s13833_s11 + $0x7e0] ss:$48 sps:$4 sm:$0xff]   ;;  %v9349_v2 = vld [vmem:[%s13833_s11 + $0x7e8] ss:$48 sps:$4 sm:$0xff]  }
 0x5f2   : > { %v9965_v31 = vpop.eup %9964  ;;  %v4028_v28 = vmul.f32 %v9963_v5, %v12214_v7  ;;  %9984 = vrcp.f32 %v3982_v0  ;;  %v9364_v0 = vld [vmem:[%s13833_s11 + $0x900] ss:$48 sps:$4 sm:$0xff]  }
 0x5f3   : > { %v9967_v20 = vpop.eup %9966  ;;  %6379 = vmatprep.mubr.bf16.mxu1 %v12275_v63  ;;  %6485 = vmatprep.mubr.bf16.mxu0 %v12275_v63  ;;  %v12287_v14 = vpack.c.bf16 %v4023_v36, %v4019_v58  ;;  %v4032_v27 = vmul.f32 %v9965_v31, %v12216_v22  ;;  %v9354_v58 = vld [vmem:[%s13833_s11 + $0x844] ss:$48 sps:$4 sm:$0xff]  }
 0x5f4   : > { %v9969_v19 = vpop.eup %9968  ;;  %v4027_v7 = vmul.f32 %v9967_v20, %v12220_v50  ;;  %v9325_v50 = vld [vmem:[%s13833_s11 + $0x668] ss:$48 sps:$4 sm:$0xff]  }
 0x5f5   : > { %v9971_v34 = vpop.eup %9970  ;;  %6380 = vmatmul.mubr.bf16.vlgmr.msra.gmra.mrb[32].mxu1 %v12287_v14  ;;  %6486 = vmatmul.mubr.bf16.vlgmr.msra.gmra.mrb[28].mxu0 %v12287_v14  ;;  %v12299_v39 = vpack.c.bf16 %v4032_v27, %v4028_v28  ;;  %v4031_v22 = vmul.f32 %v9969_v19, %v12222_v55  ;;  %v9330_v55 = vld [vmem:[%s13833_s11 + $0x6c4] ss:$48 sps:$4 sm:$0xff]   ;;  %v9352_v28 = vld [vmem:[%s13833_s11 + $0x840] ss:$48 sps:$4 sm:$0xff]   ;;  %v9355_v20 = vld [vmem:[%s13833_s11 + $0x848] ss:$48 sps:$4 sm:$0xff]  }
 0x5f6   : > { %v9973_v51 = vpop.eup %9972  ;;  %6401 = vmatpush1.bf16.msra.mxu1 %v9316_v54  ;;  %6507 = vmatpush1.bf16.msra.mxu0 %v9319_v44  ;;  %v4022_v30 = vmul.f32 %v9971_v34, %v12226_v29  ;;  %v9367_v34 = vld [vmem:[%s13833_s11 + $0x908] ss:$48 sps:$4 sm:$0xff]  }
 0x5f7   : > { %v9975_v3 = vpop.eup %9974  ;;  %6389 = vmatprep.mubr.bf16.mxu1 %v12299_v39  ;;  %6495 = vmatprep.mubr.bf16.mxu0 %v12299_v39  ;;  %v12317_v1 = vpack.c.bf16 %v4031_v22, %v4027_v7  ;;  %v4026_v49 = vmul.f32 %v9973_v51, %v12230_v21  ;;  %v9331_v21 = vld [vmem:[%s13833_s11 + $0x6c8] ss:$48 sps:$4 sm:$0xff]   ;;  %v9369_v7 = vld [vmem:[%s13833_s11 + $0x90c] ss:$48 sps:$4 sm:$0xff]   ;;  %v9372_v22 = vld [vmem:[%s13833_s11 + $0x964] ss:$48 sps:$4 sm:$0xff]  }
 0x5f8   : > { %v9977_v9 = vpop.eup %9976  ;;  %6402 = vmatprep.subr.bf16.mxu1 %v9324_v23  ;;  %6508 = vmatprep.subr.bf16.mxu0 %v9327_v24  ;;  %v4021_v29 = vmul.f32 %v9975_v3, %v12239_v10  ;;  %v9358_v23 = vld [vmem:[%s13833_s11 + $0x8a0] ss:$48 sps:$4 sm:$0xff]   ;;  %v9366_v24 = vld [vmem:[%s13833_s11 + $0x904] ss:$48 sps:$4 sm:$0xff]   ;;  %v9375_v51 = vld [vmem:[%s13833_s11 + $0x96c] ss:$48 sps:$4 sm:$0xff]  }
 0x5f9   : > { %v9979_v35 = vpop.eup %9978  ;;  %v12321_v16 = vpack.c.bf16 %v4026_v49, %v4022_v30  ;;  %v4025_v62 = vmul.f32 %v9977_v9, %v12241_v48  ;;  %v9336_v48 = vld [vmem:[%s13833_s11 + $0x724] ss:$48 sps:$4 sm:$0xff]   ;;  %v9381_v3 = vld [vmem:[%s13833_s11 + $0x9cc] ss:$48 sps:$4 sm:$0xff]  }
 0x5fa   : > { %6403 = vmatpush1.bf16.msra.mxu1 %v9322_v56  ;;  %6509 = vmatpush1.bf16.msra.mxu0 %v9325_v50  ;;  %v3986_v46 = vadd.f32 1.0, %v9979_v35  ;;  %v9981_v53 = vpop.eup %9980  ;;  %v9370_v56 = vld [vmem:[%s13833_s11 + $0x960] ss:$48 sps:$4 sm:$0xff]   ;;  %v9373_v50 = vld [vmem:[%s13833_s11 + $0x968] ss:$48 sps:$4 sm:$0xff]  }
 0x5fb   : > { %6404 = vmatprep.subr.bf16.mxu1 %v9330_v55  ;;  %6510 = vmatprep.subr.bf16.mxu0 %v9333_v26  ;;  %v12330_v10 = vpack.c.bf16 %v4025_v62, %v4021_v29  ;;  %v9983_v52 = vpop.eup %9982  ;;  %v3981_v59 = vadd.f32 1.0, %v9981_v53  ;;  %v9378_v30 = vld [vmem:[%s13833_s11 + $0x9c4] ss:$48 sps:$4 sm:$0xff]   ;;  %v9376_v55 = vld [vmem:[%s13833_s11 + $0x9c0] ss:$48 sps:$4 sm:$0xff]  }
 0x5fc   : > { %9986 = vrcp.f32 %v3986_v46  ;;  %v3985_v12 = vadd.f32 1.0, %v9983_v52  ;;  %v9985_v61 = vpop.eup %9984  ;;  %v9379_v26 = vld [vmem:[%s13833_s11 + $0x9c8] ss:$48 sps:$4 sm:$0xff]   ;;  %v9384_v49 = vld [vmem:[%s13833_s11 + $0xa24] ss:$48 sps:$4 sm:$0xff]  }
 0x5fd   : > { %6390 = vmatmul.mubr.bf16.gmra.mrb[36].mxu1 %v12317_v1  ;;  %6496 = vmatmul.mubr.bf16.gmra.mrb[32].mxu0 %v12317_v1  ;;  %9988 = vrcp.f32 %v3981_v59  ;;  %v4030_v33 = vmul.f32 %v9985_v61, %v12252_v17  ;;  %v9357_v17 = vld [vmem:[%s13833_s11 + $0x84c] ss:$48 sps:$4 sm:$0xff]   ;;  %v9382_v29 = vld [vmem:[%s13833_s11 + $0xa20] ss:$48 sps:$4 sm:$0xff]   ;;  %v9385_v35 = vld [vmem:[%s13833_s11 + $0xa28] ss:$48 sps:$4 sm:$0xff]  }
 0x5fe   : > { %6405 = vmatpush1.bf16.msra.mxu1 %v9328_v40  ;;  %6511 = vmatpush1.bf16.msra.mxu0 %v9331_v21  ;;  %9990 = vrcp.f32 %v3985_v12  ;;  %v9387_v9 = vld [vmem:[%s13833_s11 + $0xa2c] ss:$48 sps:$4 sm:$0xff]   ;;  %v9390_v62 = vld [vmem:[%s13833_s11 + $0xa84] ss:$48 sps:$4 sm:$0xff]   ;;  %v9388_v21 = vld [vmem:[%s13833_s11 + $0xa80] ss:$48 sps:$4 sm:$0xff]  }
 0x5ff   : > { %6432 = vmatprep.mubr.bf16.mxu1 %v12321_v16  ;;  %6538 = vmatprep.mubr.bf16.mxu0 %v12321_v16  ;;  %v9393_v40 = vld [vmem:[%s13833_s11 + $0xa8c] ss:$48 sps:$4 sm:$0xff]   ;;  %v9391_v46 = vld [vmem:[%s13833_s11 + $0xa88] ss:$48 sps:$4 sm:$0xff]   ;;  %v9396_v53 = vld [vmem:[%s13833_s11 + $0xae4] ss:$48 sps:$4 sm:$0xff]  }
 0x600   : > { %6406 = vmatprep.subr.bf16.mxu1 %v9336_v48  ;;  %6512 = vmatprep.subr.bf16.mxu0 %v9339_v42  ;;  %v9399_v52 = vld [vmem:[%s13833_s11 + $0xaec] ss:$48 sps:$4 sm:$0xff]   ;;  %v9394_v48 = vld [vmem:[%s13833_s11 + $0xae0] ss:$48 sps:$4 sm:$0xff]   ;;  %v9397_v42 = vld [vmem:[%s13833_s11 + $0xae8] ss:$48 sps:$4 sm:$0xff]  }
 0x601   : > { %v9402_v59 = vld [vmem:[%s13833_s11 + $0xb44] ss:$48 sps:$4 sm:$0xff]   ;;  %v9405_v12 = vld [vmem:[%s13833_s11 + $0xb4c] ss:$48 sps:$4 sm:$0xff]   ;;  %v9406_v61 = vld [vmem:[%s13833_s11 + $0xba0] ss:$48 sps:$4 sm:$0xff]  }
 0x602   : > { %6407 = vmatpush1.bf16.msra.mxu1 %v9334_v6  ;;  %6513 = vmatpush1.bf16.msra.mxu0 %v9337_v37  ;;  %v9400_v6 = vld [vmem:[%s13833_s11 + $0xb40] ss:$48 sps:$4 sm:$0xff]   ;;  %v9403_v37 = vld [vmem:[%s13833_s11 + $0xb48] ss:$48 sps:$4 sm:$0xff]  }
 0x603   : > { %6408 = vmatprep.subr.bf16.mxu1 %v9342_v11  ;;  %6514 = vmatprep.subr.bf16.mxu0 %v9345_v13  ;;  %v9408_v11 = vld [vmem:[%s13833_s11 + $0xba4] ss:$48 sps:$4 sm:$0xff]   ;;  %v9411_v13 = vld [vmem:[%s13833_s11 + $0xbac] ss:$48 sps:$4 sm:$0xff]  }
 0x606   : > { %v9987_v15 = vpop.eup %9986  ;;  %6409 = vmatpush1.bf16.msra.mxu1 %v9340_v4  ;;  %6515 = vmatpush1.bf16.msra.mxu0 %v9343_v43  ;;  %v9409_v4 = vld [vmem:[%s13833_s11 + $0xba8] ss:$48 sps:$4 sm:$0xff]   ;;  %v9414_v43 = vld [vmem:[%s13833_s11 + $0x14] ss:$48 sps:$4 sm:$0xff]  }
 0x607   : > { %6410 = vmatprep.subr.bf16.mxu1 %v9348_v8  ;;  %6516 = vmatprep.subr.bf16.mxu0 %v9351_v25  ;;  %v4034_v5 = vmul.f32 %v9987_v15, %v12254_v60  ;;  %v9989_v36 = vpop.eup %9988  ;;  %v9360_v60 = vld [vmem:[%s13833_s11 + $0x8a4] ss:$48 sps:$4 sm:$0xff]   ;;  %v9417_v8 = vld [vmem:[%s13833_s11 + $0x1c] ss:$48 sps:$4 sm:$0xff]   ;;  %v9412_v25 = vld [vmem:[%s13833_s11 + $0x10] ss:$48 sps:$4 sm:$0xff]  }
 0x608   : > { %v9991_v31 = vpop.eup %9990  ;;  %v4029_v44 = vmul.f32 %v9989_v36, %v12265_v57  ;;  %v9363_v57 = vld [vmem:[%s13833_s11 + $0x8ac] ss:$48 sps:$4 sm:$0xff]   ;;  %v9420_v15 = vld [vmem:[%s13833_s11 + $0x74] ss:$48 sps:$4 sm:$0xff]   ;;  %v9424_v36 = vld [vmem:[%s13833_s11 + $0xd0] ss:$48 sps:$4 sm:$0xff]  }
 0x609   : > { %v12380_v54 = vpack.c.bf16 %v4034_v5, %v4030_v33  ;;  %v4033_v27 = vmul.f32 %v9991_v31, %v12267_v32  ;;  %v9361_v32 = vld [vmem:[%s13833_s11 + $0x8a8] ss:$48 sps:$4 sm:$0xff]   ;;  %v9429_v5 = vld [vmem:[%s13833_s11 + $0xdc] ss:$48 sps:$4 sm:$0xff]  }
 0x60a   : > { %6411 = vmatpush1.bf16.msra.mxu1 %v9346_v41  ;;  %6517 = vmatpush1.bf16.msra.mxu0 %v9349_v2  ;;  %v9415_v33 = vld [vmem:[%s13833_s11 + $0x18] ss:$48 sps:$4 sm:$0xff]   ;;  %v9423_v41 = vld [vmem:[%s13833_s11 + $0x7c] ss:$48 sps:$4 sm:$0xff]   ;;  %v9418_v2 = vld [vmem:[%s13833_s11 + $0x70] ss:$48 sps:$4 sm:$0xff]  }
 0x60b   : > { %6412 = vmatprep.subr.bf16.mxu1 %v9354_v58  ;;  %6518 = vmatprep.subr.bf16.mxu0 %v9357_v17  ;;  %v12396_v19 = vpack.c.bf16 %v4033_v27, %v4029_v44  ;;  %v9421_v58 = vld [vmem:[%s13833_s11 + $0x78] ss:$48 sps:$4 sm:$0xff]   ;;  %v9426_v17 = vld [vmem:[%s13833_s11 + $0xd4] ss:$48 sps:$4 sm:$0xff]  }
 0x60c   : > { %v9427_v31 = vld [vmem:[%s13833_s11 + $0xd8] ss:$48 sps:$4 sm:$0xff]   ;;  %v9432_v44 = vld [vmem:[%s13833_s11 + $0x134] ss:$48 sps:$4 sm:$0xff]  }
 0x60d   : > { %v9433_v27 = vld [vmem:[%s13833_s11 + $0x138] ss:$48 sps:$4 sm:$0xff]  }
 0x60e   : > { %6413 = vmatpush1.bf16.msra.mxu1 %v9352_v28  ;;  %6519 = vmatpush1.bf16.msra.mxu0 %v9355_v20  ;;  %v9435_v28 = vld [vmem:[%s13833_s11 + $0x13c] ss:$48 sps:$4 sm:$0xff]   ;;  %v9430_v20 = vld [vmem:[%s13833_s11 + $0x130] ss:$48 sps:$4 sm:$0xff]  }
 0x60f   : > { %6414 = vmatprep.subr.bf16.mxu1 %v9360_v60  ;;  %6520 = vmatprep.subr.bf16.mxu0 %v9363_v57  ;;  %v9438_v60 = vld [vmem:[%s13833_s11 + $0x194] ss:$48 sps:$4 sm:$0xff]   ;;  %v9441_v57 = vld [vmem:[%s13833_s11 + $0x19c] ss:$48 sps:$4 sm:$0xff]  }
 0x612   : > { %6415 = vmatpush1.bf16.msra.mxu1 %v9358_v23  ;;  %6521 = vmatpush1.bf16.msra.mxu0 %v9361_v32  ;;  %v9436_v23 = vld [vmem:[%s13833_s11 + $0x190] ss:$48 sps:$4 sm:$0xff]   ;;  %v9439_v32 = vld [vmem:[%s13833_s11 + $0x198] ss:$48 sps:$4 sm:$0xff]  }
 0x613   : > { %6416 = vmatprep.subr.bf16.mxu1 %v9366_v24  ;;  %6522 = vmatprep.subr.bf16.mxu0 %v9369_v7  ;;  %v9444_v24 = vld [vmem:[%s13833_s11 + $0x1f4] ss:$48 sps:$4 sm:$0xff]   ;;  %v9447_v7 = vld [vmem:[%s13833_s11 + $0x1fc] ss:$48 sps:$4 sm:$0xff]  }
 0x616   : > { %6417 = vmatpush1.bf16.msra.mxu1 %v9364_v0  ;;  %6523 = vmatpush1.bf16.msra.mxu0 %v9367_v34  ;;  %v9442_v0 = vld [vmem:[%s13833_s11 + $0x1f0] ss:$48 sps:$4 sm:$0xff]   ;;  %v9445_v34 = vld [vmem:[%s13833_s11 + $0x1f8] ss:$48 sps:$4 sm:$0xff]  }
 0x617   : > { %6418 = vmatprep.subr.bf16.mxu1 %v9372_v22  ;;  %6524 = vmatprep.subr.bf16.mxu0 %v9375_v51  ;;  %v9450_v22 = vld [vmem:[%s13833_s11 + $0x254] ss:$48 sps:$4 sm:$0xff]   ;;  %v9453_v51 = vld [vmem:[%s13833_s11 + $0x25c] ss:$48 sps:$4 sm:$0xff]  }
 0x61a   : > { %6419 = vmatpush1.bf16.msra.mxu1 %v9370_v56  ;;  %6525 = vmatpush1.bf16.msra.mxu0 %v9373_v50  ;;  %v9448_v56 = vld [vmem:[%s13833_s11 + $0x250] ss:$48 sps:$4 sm:$0xff]   ;;  %v9451_v50 = vld [vmem:[%s13833_s11 + $0x258] ss:$48 sps:$4 sm:$0xff]  }
 0x61b   : > { %6420 = vmatprep.subr.bf16.mxu1 %v9378_v30  ;;  %6526 = vmatprep.subr.bf16.mxu0 %v9381_v3  ;;  %v9456_v30 = vld [vmem:[%s13833_s11 + $0x2b4] ss:$48 sps:$4 sm:$0xff]   ;;  %v9459_v3 = vld [vmem:[%s13833_s11 + $0x2bc] ss:$48 sps:$4 sm:$0xff]  }
 0x61e   : > { %6421 = vmatpush1.bf16.msra.mxu1 %v9376_v55  ;;  %6527 = vmatpush1.bf16.msra.mxu0 %v9379_v26  ;;  %v9454_v55 = vld [vmem:[%s13833_s11 + $0x2b0] ss:$48 sps:$4 sm:$0xff]   ;;  %v9457_v26 = vld [vmem:[%s13833_s11 + $0x2b8] ss:$48 sps:$4 sm:$0xff]  }
 0x61f   : > { %6422 = vmatprep.subr.bf16.mxu1 %v9384_v49  ;;  %6528 = vmatprep.subr.bf16.mxu0 %v9387_v9  ;;  %v9462_v49 = vld [vmem:[%s13833_s11 + $0x314] ss:$48 sps:$4 sm:$0xff]   ;;  %v9465_v9 = vld [vmem:[%s13833_s11 + $0x31c] ss:$48 sps:$4 sm:$0xff]  }
 0x622   : > { %6423 = vmatpush1.bf16.msra.mxu1 %v9382_v29  ;;  %6529 = vmatpush1.bf16.msra.mxu0 %v9385_v35  ;;  %v9460_v29 = vld [vmem:[%s13833_s11 + $0x310] ss:$48 sps:$4 sm:$0xff]   ;;  %v9463_v35 = vld [vmem:[%s13833_s11 + $0x318] ss:$48 sps:$4 sm:$0xff]  }
 0x623   : > { %6424 = vmatprep.subr.bf16.mxu1 %v9390_v62  ;;  %6530 = vmatprep.subr.bf16.mxu0 %v9393_v40  ;;  %v9468_v62 = vld [vmem:[%s13833_s11 + $0x374] ss:$48 sps:$4 sm:$0xff]   ;;  %v9471_v40 = vld [vmem:[%s13833_s11 + $0x37c] ss:$48 sps:$4 sm:$0xff]  }
 0x626   : > { %6425 = vmatpush1.bf16.msra.mxu1 %v9388_v21  ;;  %6531 = vmatpush1.bf16.msra.mxu0 %v9391_v46  ;;  %v9466_v21 = vld [vmem:[%s13833_s11 + $0x370] ss:$48 sps:$4 sm:$0xff]   ;;  %v9469_v46 = vld [vmem:[%s13833_s11 + $0x378] ss:$48 sps:$4 sm:$0xff]  }
 0x627   : > { %6426 = vmatprep.subr.bf16.mxu1 %v9396_v53  ;;  %6532 = vmatprep.subr.bf16.mxu0 %v9399_v52  ;;  %v9474_v53 = vld [vmem:[%s13833_s11 + $0x3d4] ss:$48 sps:$4 sm:$0xff]   ;;  %v9477_v52 = vld [vmem:[%s13833_s11 + $0x3dc] ss:$48 sps:$4 sm:$0xff]  }
 0x62a   : > { %6427 = vmatpush1.bf16.msra.mxu1 %v9394_v48  ;;  %6533 = vmatpush1.bf16.msra.mxu0 %v9397_v42  ;;  %v9472_v48 = vld [vmem:[%s13833_s11 + $0x3d0] ss:$48 sps:$4 sm:$0xff]   ;;  %v9475_v42 = vld [vmem:[%s13833_s11 + $0x3d8] ss:$48 sps:$4 sm:$0xff]  }
 0x62b   : > { %6428 = vmatprep.subr.bf16.mxu1 %v9402_v59  ;;  %6534 = vmatprep.subr.bf16.mxu0 %v9405_v12  ;;  %v9480_v59 = vld [vmem:[%s13833_s11 + $0x434] ss:$48 sps:$4 sm:$0xff]   ;;  %v9483_v12 = vld [vmem:[%s13833_s11 + $0x43c] ss:$48 sps:$4 sm:$0xff]  }
 0x62e   : > { %6429 = vmatpush1.bf16.msra.mxu1 %v9400_v6  ;;  %6535 = vmatpush1.bf16.msra.mxu0 %v9403_v37  ;;  %v9478_v6 = vld [vmem:[%s13833_s11 + $0x430] ss:$48 sps:$4 sm:$0xff]   ;;  %v9481_v37 = vld [vmem:[%s13833_s11 + $0x438] ss:$48 sps:$4 sm:$0xff]  }
 0x62f   : > { %6430 = vmatprep.subr.bf16.mxu1 %v9408_v11  ;;  %6536 = vmatprep.subr.bf16.mxu0 %v9411_v13  ;;  %v9486_v11 = vld [vmem:[%s13833_s11 + $0x494] ss:$48 sps:$4 sm:$0xff]   ;;  %v9489_v13 = vld [vmem:[%s13833_s11 + $0x49c] ss:$48 sps:$4 sm:$0xff]  }
 0x632   : > { %6431 = vmatpush1.bf16.msra.mxu1 %v9406_v61  ;;  %6537 = vmatpush1.bf16.msra.mxu0 %v9409_v4  ;;  %v9484_v61 = vld [vmem:[%s13833_s11 + $0x490] ss:$48 sps:$4 sm:$0xff]   ;;  %v9487_v4 = vld [vmem:[%s13833_s11 + $0x498] ss:$48 sps:$4 sm:$0xff]  }
 0x633   : > { %6559 = vmatprep.subr.bf16.mxu1 %v9414_v43  ;;  %6665 = vmatprep.subr.bf16.mxu0 %v9417_v8  ;;  %v9492_v43 = vld [vmem:[%s13833_s11 + $0x4f4] ss:$48 sps:$4 sm:$0xff]   ;;  %v9495_v8 = vld [vmem:[%s13833_s11 + $0x4fc] ss:$48 sps:$4 sm:$0xff]  }
 0x635   : > { %6433 = vmatmul.mubr.bf16.vlgmr.msra.gmra.mrb[32].mxu1 %v12330_v10  ;;  %6539 = vmatmul.mubr.bf16.vlgmr.msra.gmra.mrb[28].mxu0 %v12330_v10 }
 0x636   : > { %6442 = vmatprep.mubr.bf16.mxu1 %v12380_v54  ;;  %6548 = vmatprep.mubr.bf16.mxu0 %v12380_v54 }
 0x637   : > { %6560 = vmatpush1.bf16.msra.mxu1 %v9412_v25  ;;  %6666 = vmatpush1.bf16.msra.mxu0 %v9415_v33  ;;  %v9490_v25 = vld [vmem:[%s13833_s11 + $0x4f0] ss:$48 sps:$4 sm:$0xff]   ;;  %v9493_v33 = vld [vmem:[%s13833_s11 + $0x4f8] ss:$48 sps:$4 sm:$0xff]  }
 0x638   : > { %6561 = vmatprep.subr.bf16.mxu1 %v9420_v15  ;;  %6667 = vmatprep.subr.bf16.mxu0 %v9423_v41  ;;  %v9498_v15 = vld [vmem:[%s13833_s11 + $0x554] ss:$48 sps:$4 sm:$0xff]   ;;  %v9501_v41 = vld [vmem:[%s13833_s11 + $0x55c] ss:$48 sps:$4 sm:$0xff]  }
 0x63b   : > { %6562 = vmatpush1.bf16.msra.mxu1 %v9418_v2  ;;  %6668 = vmatpush1.bf16.msra.mxu0 %v9421_v58  ;;  %v9496_v2 = vld [vmem:[%s13833_s11 + $0x550] ss:$48 sps:$4 sm:$0xff]   ;;  %v9499_v58 = vld [vmem:[%s13833_s11 + $0x558] ss:$48 sps:$4 sm:$0xff]  }
 0x63c   : > { %6563 = vmatprep.subr.bf16.mxu1 %v9426_v17  ;;  %6669 = vmatprep.subr.bf16.mxu0 %v9429_v5  ;;  %v9504_v17 = vld [vmem:[%s13833_s11 + $0x5b4] ss:$48 sps:$4 sm:$0xff]   ;;  %v9507_v5 = vld [vmem:[%s13833_s11 + $0x5bc] ss:$48 sps:$4 sm:$0xff]  }
 0x63d   : > { %6443 = vmatmul.mubr.bf16.gmra.mrb[36].mxu1 %v12396_v19  ;;  %6549 = vmatmul.mubr.bf16.gmra.mrb[32].mxu0 %v12396_v19 }
 0x63e   : > { %6591 = vmatprep.mubr.bf16.mxu1 %v12275_v63  ;;  %6697 = vmatprep.mubr.bf16.mxu0 %v12275_v63 }
 0x63f   : > { %6564 = vmatpush1.bf16.msra.mxu1 %v9424_v36  ;;  %6670 = vmatpush1.bf16.msra.mxu0 %v9427_v31  ;;  %v9502_v36 = vld [vmem:[%s13833_s11 + $0x5b0] ss:$48 sps:$4 sm:$0xff]   ;;  %v9505_v31 = vld [vmem:[%s13833_s11 + $0x5b8] ss:$48 sps:$4 sm:$0xff]  }
 0x640   : > { %6565 = vmatprep.subr.bf16.mxu1 %v9432_v44  ;;  %6671 = vmatprep.subr.bf16.mxu0 %v9435_v28  ;;  %v9510_v44 = vld [vmem:[%s13833_s11 + $0x614] ss:$48 sps:$4 sm:$0xff]   ;;  %v9513_v28 = vld [vmem:[%s13833_s11 + $0x61c] ss:$48 sps:$4 sm:$0xff]  }
 0x643   : > { %6566 = vmatpush1.bf16.msra.mxu1 %v9430_v20  ;;  %6672 = vmatpush1.bf16.msra.mxu0 %v9433_v27  ;;  %v9508_v20 = vld [vmem:[%s13833_s11 + $0x610] ss:$48 sps:$4 sm:$0xff]   ;;  %v9511_v27 = vld [vmem:[%s13833_s11 + $0x618] ss:$48 sps:$4 sm:$0xff]  }
 0x644   : > { %6567 = vmatprep.subr.bf16.mxu1 %v9438_v60  ;;  %6673 = vmatprep.subr.bf16.mxu0 %v9441_v57  ;;  %v9516_v60 = vld [vmem:[%s13833_s11 + $0x674] ss:$48 sps:$4 sm:$0xff]   ;;  %v9519_v57 = vld [vmem:[%s13833_s11 + $0x67c] ss:$48 sps:$4 sm:$0xff]  }
 0x647   : > { %6568 = vmatpush1.bf16.msra.mxu1 %v9436_v23  ;;  %6674 = vmatpush1.bf16.msra.mxu0 %v9439_v32  ;;  %v9514_v23 = vld [vmem:[%s13833_s11 + $0x670] ss:$48 sps:$4 sm:$0xff]   ;;  %v9517_v32 = vld [vmem:[%s13833_s11 + $0x678] ss:$48 sps:$4 sm:$0xff]  }
 0x648   : > { %6569 = vmatprep.subr.bf16.mxu1 %v9444_v24  ;;  %6675 = vmatprep.subr.bf16.mxu0 %v9447_v7  ;;  %v9522_v24 = vld [vmem:[%s13833_s11 + $0x6d4] ss:$48 sps:$4 sm:$0xff]   ;;  %v9525_v7 = vld [vmem:[%s13833_s11 + $0x6dc] ss:$48 sps:$4 sm:$0xff]  }
 0x64b   : > { %6570 = vmatpush1.bf16.msra.mxu1 %v9442_v0  ;;  %6676 = vmatpush1.bf16.msra.mxu0 %v9445_v34  ;;  %v9520_v0 = vld [vmem:[%s13833_s11 + $0x6d0] ss:$48 sps:$4 sm:$0xff]   ;;  %v9523_v34 = vld [vmem:[%s13833_s11 + $0x6d8] ss:$48 sps:$4 sm:$0xff]  }
 0x64c   : > { %6571 = vmatprep.subr.bf16.mxu1 %v9450_v22  ;;  %6677 = vmatprep.subr.bf16.mxu0 %v9453_v51  ;;  %v9528_v22 = vld [vmem:[%s13833_s11 + $0x734] ss:$48 sps:$4 sm:$0xff]   ;;  %v9531_v51 = vld [vmem:[%s13833_s11 + $0x73c] ss:$48 sps:$4 sm:$0xff]  }
 0x64f   : > { %6572 = vmatpush1.bf16.msra.mxu1 %v9448_v56  ;;  %6678 = vmatpush1.bf16.msra.mxu0 %v9451_v50  ;;  %v9526_v56 = vld [vmem:[%s13833_s11 + $0x730] ss:$48 sps:$4 sm:$0xff]   ;;  %v9529_v50 = vld [vmem:[%s13833_s11 + $0x738] ss:$48 sps:$4 sm:$0xff]  }
 0x650   : > { %6573 = vmatprep.subr.bf16.mxu1 %v9456_v30  ;;  %6679 = vmatprep.subr.bf16.mxu0 %v9459_v3  ;;  %v9534_v30 = vld [vmem:[%s13833_s11 + $0x794] ss:$48 sps:$4 sm:$0xff]   ;;  %v9537_v3 = vld [vmem:[%s13833_s11 + $0x79c] ss:$48 sps:$4 sm:$0xff]  }
 0x653   : > { %6574 = vmatpush1.bf16.msra.mxu1 %v9454_v55  ;;  %6680 = vmatpush1.bf16.msra.mxu0 %v9457_v26  ;;  %v9532_v55 = vld [vmem:[%s13833_s11 + $0x790] ss:$48 sps:$4 sm:$0xff]   ;;  %v9535_v26 = vld [vmem:[%s13833_s11 + $0x798] ss:$48 sps:$4 sm:$0xff]  }
 0x654   : > { %6575 = vmatprep.subr.bf16.mxu1 %v9462_v49  ;;  %6681 = vmatprep.subr.bf16.mxu0 %v9465_v9  ;;  %v9540_v49 = vld [vmem:[%s13833_s11 + $0x7f4] ss:$48 sps:$4 sm:$0xff]   ;;  %v9543_v9 = vld [vmem:[%s13833_s11 + $0x7fc] ss:$48 sps:$4 sm:$0xff]  }
 0x657   : > { %6576 = vmatpush1.bf16.msra.mxu1 %v9460_v29  ;;  %6682 = vmatpush1.bf16.msra.mxu0 %v9463_v35  ;;  %v9538_v29 = vld [vmem:[%s13833_s11 + $0x7f0] ss:$48 sps:$4 sm:$0xff]   ;;  %v9541_v35 = vld [vmem:[%s13833_s11 + $0x7f8] ss:$48 sps:$4 sm:$0xff]  }
 0x658   : > { %6577 = vmatprep.subr.bf16.mxu1 %v9468_v62  ;;  %6683 = vmatprep.subr.bf16.mxu0 %v9471_v40  ;;  %v9546_v62 = vld [vmem:[%s13833_s11 + $0x854] ss:$48 sps:$4 sm:$0xff]   ;;  %v9549_v40 = vld [vmem:[%s13833_s11 + $0x85c] ss:$48 sps:$4 sm:$0xff]  }
 0x65b   : > { %6578 = vmatpush1.bf16.msra.mxu1 %v9466_v21  ;;  %6684 = vmatpush1.bf16.msra.mxu0 %v9469_v46  ;;  %v9544_v21 = vld [vmem:[%s13833_s11 + $0x850] ss:$48 sps:$4 sm:$0xff]   ;;  %v9547_v46 = vld [vmem:[%s13833_s11 + $0x858] ss:$48 sps:$4 sm:$0xff]  }
 0x65c   : > { %6579 = vmatprep.subr.bf16.mxu1 %v9474_v53  ;;  %6685 = vmatprep.subr.bf16.mxu0 %v9477_v52  ;;  %v9552_v53 = vld [vmem:[%s13833_s11 + $0x8b4] ss:$48 sps:$4 sm:$0xff]   ;;  %v9555_v52 = vld [vmem:[%s13833_s11 + $0x8bc] ss:$48 sps:$4 sm:$0xff]  }
 0x65f   : > { %6580 = vmatpush1.bf16.msra.mxu1 %v9472_v48  ;;  %6686 = vmatpush1.bf16.msra.mxu0 %v9475_v42  ;;  %v9550_v48 = vld [vmem:[%s13833_s11 + $0x8b0] ss:$48 sps:$4 sm:$0xff]   ;;  %v9553_v42 = vld [vmem:[%s13833_s11 + $0x8b8] ss:$48 sps:$4 sm:$0xff]  }
 0x660   : > { %6581 = vmatprep.subr.bf16.mxu1 %v9480_v59  ;;  %6687 = vmatprep.subr.bf16.mxu0 %v9483_v12  ;;  %v9558_v59 = vld [vmem:[%s13833_s11 + $0x914] ss:$48 sps:$4 sm:$0xff]   ;;  %v9561_v12 = vld [vmem:[%s13833_s11 + $0x91c] ss:$48 sps:$4 sm:$0xff]  }
 0x663   : > { %6582 = vmatpush1.bf16.msra.mxu1 %v9478_v6  ;;  %6688 = vmatpush1.bf16.msra.mxu0 %v9481_v37  ;;  %v9556_v6 = vld [vmem:[%s13833_s11 + $0x910] ss:$48 sps:$4 sm:$0xff]   ;;  %v9559_v37 = vld [vmem:[%s13833_s11 + $0x918] ss:$48 sps:$4 sm:$0xff]  }
 0x664   : > { %6583 = vmatprep.subr.bf16.mxu1 %v9486_v11  ;;  %6689 = vmatprep.subr.bf16.mxu0 %v9489_v13  ;;  %v9564_v11 = vld [vmem:[%s13833_s11 + $0x974] ss:$48 sps:$4 sm:$0xff]   ;;  %v9567_v13 = vld [vmem:[%s13833_s11 + $0x97c] ss:$48 sps:$4 sm:$0xff]  }
 0x667   : > { %6584 = vmatpush1.bf16.msra.mxu1 %v9484_v61  ;;  %6690 = vmatpush1.bf16.msra.mxu0 %v9487_v4  ;;  %v9562_v61 = vld [vmem:[%s13833_s11 + $0x970] ss:$48 sps:$4 sm:$0xff]   ;;  %v9565_v4 = vld [vmem:[%s13833_s11 + $0x978] ss:$48 sps:$4 sm:$0xff]  }
 0x668   : > { %6585 = vmatprep.subr.bf16.mxu1 %v9492_v43  ;;  %6691 = vmatprep.subr.bf16.mxu0 %v9495_v8  ;;  %v9570_v43 = vld [vmem:[%s13833_s11 + $0x9d4] ss:$48 sps:$4 sm:$0xff]   ;;  %v9573_v8 = vld [vmem:[%s13833_s11 + $0x9dc] ss:$48 sps:$4 sm:$0xff]  }
 0x66b   : > { %6586 = vmatpush1.bf16.msra.mxu1 %v9490_v25  ;;  %6692 = vmatpush1.bf16.msra.mxu0 %v9493_v33  ;;  %v9568_v25 = vld [vmem:[%s13833_s11 + $0x9d0] ss:$48 sps:$4 sm:$0xff]   ;;  %v9571_v33 = vld [vmem:[%s13833_s11 + $0x9d8] ss:$48 sps:$4 sm:$0xff]  }
 0x66c   : > { %6587 = vmatprep.subr.bf16.mxu1 %v9498_v15  ;;  %6693 = vmatprep.subr.bf16.mxu0 %v9501_v41  ;;  %v9576_v15 = vld [vmem:[%s13833_s11 + $0xa34] ss:$48 sps:$4 sm:$0xff]   ;;  %v9579_v41 = vld [vmem:[%s13833_s11 + $0xa3c] ss:$48 sps:$4 sm:$0xff]  }
 0x66f   : > { %6588 = vmatpush1.bf16.msra.mxu1 %v9496_v2  ;;  %6694 = vmatpush1.bf16.msra.mxu0 %v9499_v58  ;;  %v9574_v2 = vld [vmem:[%s13833_s11 + $0xa30] ss:$48 sps:$4 sm:$0xff]   ;;  %v9577_v58 = vld [vmem:[%s13833_s11 + $0xa38] ss:$48 sps:$4 sm:$0xff]  }
 0x670   : > { %6589 = vmatprep.subr.bf16.mxu1 %v9504_v17  ;;  %6695 = vmatprep.subr.bf16.mxu0 %v9507_v5  ;;  %v9582_v17 = vld [vmem:[%s13833_s11 + $0xa94] ss:$48 sps:$4 sm:$0xff]   ;;  %v9585_v5 = vld [vmem:[%s13833_s11 + $0xa9c] ss:$48 sps:$4 sm:$0xff]  }
 0x673   : > { %6590 = vmatpush1.bf16.msra.mxu1 %v9502_v36  ;;  %6696 = vmatpush1.bf16.msra.mxu0 %v9505_v31  ;;  %v9580_v36 = vld [vmem:[%s13833_s11 + $0xa90] ss:$48 sps:$4 sm:$0xff]   ;;  %v9583_v31 = vld [vmem:[%s13833_s11 + $0xa98] ss:$48 sps:$4 sm:$0xff]  }
 0x674   : > { %6612 = vmatprep.subr.bf16.mxu1 %v9510_v44  ;;  %6718 = vmatprep.subr.bf16.mxu0 %v9513_v28  ;;  %v9588_v44 = vld [vmem:[%s13833_s11 + $0xaf4] ss:$48 sps:$4 sm:$0xff]   ;;  %v9591_v28 = vld [vmem:[%s13833_s11 + $0xafc] ss:$48 sps:$4 sm:$0xff]  }
 0x676   : > { %6592 = vmatmul.mubr.bf16.vlgmr.msra.gmra.mrb[40].mxu1 %v12287_v14  ;;  %6698 = vmatmul.mubr.bf16.vlgmr.msra.gmra.mrb[36].mxu0 %v12287_v14 }
 0x677   : > { %6601 = vmatprep.mubr.bf16.mxu1 %v12299_v39  ;;  %6613 = vmatpush1.bf16.msra.mxu1 %v9508_v20  ;;  %v9586_v20 = vld [vmem:[%s13833_s11 + $0xaf0] ss:$48 sps:$4 sm:$0xff]  }
 0x678   : > { %6707 = vmatprep.mubr.bf16.mxu0 %v12299_v39  ;;  %6719 = vmatpush1.bf16.msra.mxu0 %v9511_v27  ;;  %v9589_v27 = vld [vmem:[%s13833_s11 + $0xaf8] ss:$48 sps:$4 sm:$0xff]  }
 0x679   : > { %6614 = vmatprep.subr.bf16.mxu1 %v9516_v60  ;;  %6720 = vmatprep.subr.bf16.mxu0 %v9519_v57  ;;  %v9594_v60 = vld [vmem:[%s13833_s11 + $0xb54] ss:$48 sps:$4 sm:$0xff]   ;;  %v9597_v57 = vld [vmem:[%s13833_s11 + $0xb5c] ss:$48 sps:$4 sm:$0xff]  }
 0x67b   : > { %6615 = vmatpush1.bf16.msra.mxu1 %v9514_v23  ;;  %v9592_v23 = vld [vmem:[%s13833_s11 + $0xb50] ss:$48 sps:$4 sm:$0xff]  }
 0x67c   : > { %6721 = vmatpush1.bf16.msra.mxu0 %v9517_v32  ;;  %6616 = vmatprep.subr.bf16.mxu1 %v9522_v24  ;;  %v9595_v32 = vld [vmem:[%s13833_s11 + $0xb58] ss:$48 sps:$4 sm:$0xff]   ;;  %v9600_v24 = vld [vmem:[%s13833_s11 + $0xbb4] ss:$48 sps:$4 sm:$0xff]  }
 0x67d   : > { %6722 = vmatprep.subr.bf16.mxu0 %v9525_v7  ;;  %v9603_v7 = vld [vmem:[%s13833_s11 + $0xbbc] ss:$48 sps:$4 sm:$0xff]  }
 0x67e   : > { %6602 = vmatmul.mubr.bf16.gmra.mrb[44].mxu1 %v12317_v1  ;;  %6708 = vmatmul.mubr.bf16.gmra.mrb[40].mxu0 %v12317_v1 }
 0x67f   : > { %6617 = vmatpush1.bf16.msra.mxu1 %v9520_v0  ;;  %6644 = vmatprep.mubr.bf16.mxu1 %v12321_v16  ;;  %v9598_v0 = vld [vmem:[%s13833_s11 + $0xbb0] ss:$48 sps:$4 sm:$0xff]  }
 0x680   : > { %6723 = vmatpush1.bf16.msra.mxu0 %v9523_v34  ;;  %6750 = vmatprep.mubr.bf16.mxu0 %v12321_v16  ;;  %v9601_v34 = vld [vmem:[%s13833_s11 + $0xbb8] ss:$48 sps:$4 sm:$0xff]  }
 0x681   : > { %6618 = vmatprep.subr.bf16.mxu1 %v9528_v22  ;;  %6724 = vmatprep.subr.bf16.mxu0 %v9531_v51  ;;  %v9606_v22 = vld [vmem:[%s13833_s11 + $0x24] ss:$48 sps:$4 sm:$0xff]   ;;  %v9609_v51 = vld [vmem:[%s13833_s11 + $0x2c] ss:$48 sps:$4 sm:$0xff]  }
 0x683   : > { %6619 = vmatpush1.bf16.msra.mxu1 %v9526_v56  ;;  %v9604_v56 = vld [vmem:[%s13833_s11 + $0x20] ss:$48 sps:$4 sm:$0xff]  }
 0x684   : > { %6725 = vmatpush1.bf16.msra.mxu0 %v9529_v50  ;;  %6620 = vmatprep.subr.bf16.mxu1 %v9534_v30  ;;  %v9607_v50 = vld [vmem:[%s13833_s11 + $0x28] ss:$48 sps:$4 sm:$0xff]   ;;  %v9612_v30 = vld [vmem:[%s13833_s11 + $0x84] ss:$48 sps:$4 sm:$0xff]  }
 0x685   : > { %6726 = vmatprep.subr.bf16.mxu0 %v9537_v3  ;;  %v9615_v3 = vld [vmem:[%s13833_s11 + $0x8c] ss:$48 sps:$4 sm:$0xff]  }
 0x687   : > { %6621 = vmatpush1.bf16.msra.mxu1 %v9532_v55  ;;  %v9610_v55 = vld [vmem:[%s13833_s11 + $0x80] ss:$48 sps:$4 sm:$0xff]  }
 0x688   : > { %6727 = vmatpush1.bf16.msra.mxu0 %v9535_v26  ;;  %6622 = vmatprep.subr.bf16.mxu1 %v9540_v49  ;;  %v9613_v26 = vld [vmem:[%s13833_s11 + $0x88] ss:$48 sps:$4 sm:$0xff]   ;;  %v9618_v49 = vld [vmem:[%s13833_s11 + $0xe4] ss:$48 sps:$4 sm:$0xff]  }
 0x689   : > { %6728 = vmatprep.subr.bf16.mxu0 %v9543_v9  ;;  %v9621_v9 = vld [vmem:[%s13833_s11 + $0xec] ss:$48 sps:$4 sm:$0xff]  }
 0x68b   : > { %6623 = vmatpush1.bf16.msra.mxu1 %v9538_v29  ;;  %v9616_v29 = vld [vmem:[%s13833_s11 + $0xe0] ss:$48 sps:$4 sm:$0xff]  }
 0x68c   : > { %6729 = vmatpush1.bf16.msra.mxu0 %v9541_v35  ;;  %6624 = vmatprep.subr.bf16.mxu1 %v9546_v62  ;;  %v9619_v35 = vld [vmem:[%s13833_s11 + $0xe8] ss:$48 sps:$4 sm:$0xff]   ;;  %v9624_v62 = vld [vmem:[%s13833_s11 + $0x144] ss:$48 sps:$4 sm:$0xff]  }
 0x68d   : > { %6730 = vmatprep.subr.bf16.mxu0 %v9549_v40  ;;  %v9627_v40 = vld [vmem:[%s13833_s11 + $0x14c] ss:$48 sps:$4 sm:$0xff]  }
 0x68f   : > { %6625 = vmatpush1.bf16.msra.mxu1 %v9544_v21  ;;  %v9622_v21 = vld [vmem:[%s13833_s11 + $0x140] ss:$48 sps:$4 sm:$0xff]  }
 0x690   : > { %6731 = vmatpush1.bf16.msra.mxu0 %v9547_v46  ;;  %6626 = vmatprep.subr.bf16.mxu1 %v9552_v53  ;;  %v9625_v46 = vld [vmem:[%s13833_s11 + $0x148] ss:$48 sps:$4 sm:$0xff]   ;;  %v9630_v53 = vld [vmem:[%s13833_s11 + $0x1a4] ss:$48 sps:$4 sm:$0xff]  }
 0x691   : > { %6732 = vmatprep.subr.bf16.mxu0 %v9555_v52  ;;  %v9633_v52 = vld [vmem:[%s13833_s11 + $0x1ac] ss:$48 sps:$4 sm:$0xff]  }
 0x693   : > { %6627 = vmatpush1.bf16.msra.mxu1 %v9550_v48  ;;  %v9631_v48 = vld [vmem:[%s13833_s11 + $0x1a8] ss:$48 sps:$4 sm:$0xff]  }
 0x694   : > { %6733 = vmatpush1.bf16.msra.mxu0 %v9553_v42  ;;  %6628 = vmatprep.subr.bf16.mxu1 %v9558_v59  ;;  %v9636_v42 = vld [vmem:[%s13833_s11 + $0x204] ss:$48 sps:$4 sm:$0xff]   ;;  %v9639_v59 = vld [vmem:[%s13833_s11 + $0x20c] ss:$48 sps:$4 sm:$0xff]  }
 0x695   : > { %6734 = vmatprep.subr.bf16.mxu0 %v9561_v12  ;;  %v9634_v12 = vld [vmem:[%s13833_s11 + $0x200] ss:$48 sps:$4 sm:$0xff]  }
 0x697   : > { %6629 = vmatpush1.bf16.msra.mxu1 %v9556_v6  ;;  %v9637_v6 = vld [vmem:[%s13833_s11 + $0x208] ss:$48 sps:$4 sm:$0xff]  }
 0x698   : > { %6735 = vmatpush1.bf16.msra.mxu0 %v9559_v37  ;;  %6630 = vmatprep.subr.bf16.mxu1 %v9564_v11  ;;  %v9642_v37 = vld [vmem:[%s13833_s11 + $0x264] ss:$48 sps:$4 sm:$0xff]   ;;  %v9645_v11 = vld [vmem:[%s13833_s11 + $0x26c] ss:$48 sps:$4 sm:$0xff]  }
 0x699   : > { %6736 = vmatprep.subr.bf16.mxu0 %v9567_v13  ;;  %v9640_v13 = vld [vmem:[%s13833_s11 + $0x260] ss:$48 sps:$4 sm:$0xff]  }
 0x69b   : > { %6631 = vmatpush1.bf16.msra.mxu1 %v9562_v61  ;;  %v9643_v61 = vld [vmem:[%s13833_s11 + $0x268] ss:$48 sps:$4 sm:$0xff]  }
 0x69c   : > { %6737 = vmatpush1.bf16.msra.mxu0 %v9565_v4  ;;  %6632 = vmatprep.subr.bf16.mxu1 %v9570_v43  ;;  %v9648_v4 = vld [vmem:[%s13833_s11 + $0x2c4] ss:$48 sps:$4 sm:$0xff]   ;;  %v9651_v43 = vld [vmem:[%s13833_s11 + $0x2cc] ss:$48 sps:$4 sm:$0xff]  }
 0x69d   : > { %6738 = vmatprep.subr.bf16.mxu0 %v9573_v8  ;;  %v9646_v8 = vld [vmem:[%s13833_s11 + $0x2c0] ss:$48 sps:$4 sm:$0xff]  }
 0x69f   : > { %6633 = vmatpush1.bf16.msra.mxu1 %v9568_v25  ;;  %v9649_v25 = vld [vmem:[%s13833_s11 + $0x2c8] ss:$48 sps:$4 sm:$0xff]  }
 0x6a0   : > { %6739 = vmatpush1.bf16.msra.mxu0 %v9571_v33  ;;  %6634 = vmatprep.subr.bf16.mxu1 %v9576_v15  ;;  %v9654_v33 = vld [vmem:[%s13833_s11 + $0x324] ss:$48 sps:$4 sm:$0xff]   ;;  %v9657_v15 = vld [vmem:[%s13833_s11 + $0x32c] ss:$48 sps:$4 sm:$0xff]  }
 0x6a1   : > { %6740 = vmatprep.subr.bf16.mxu0 %v9579_v41  ;;  %v9652_v41 = vld [vmem:[%s13833_s11 + $0x320] ss:$48 sps:$4 sm:$0xff]  }
 0x6a3   : > { %6635 = vmatpush1.bf16.msra.mxu1 %v9574_v2  ;;  %v9655_v2 = vld [vmem:[%s13833_s11 + $0x328] ss:$48 sps:$4 sm:$0xff]  }
 0x6a4   : > { %6741 = vmatpush1.bf16.msra.mxu0 %v9577_v58  ;;  %6636 = vmatprep.subr.bf16.mxu1 %v9582_v17  ;;  %v9660_v58 = vld [vmem:[%s13833_s11 + $0x384] ss:$48 sps:$4 sm:$0xff]   ;;  %v9663_v17 = vld [vmem:[%s13833_s11 + $0x38c] ss:$48 sps:$4 sm:$0xff]  }
 0x6a5   : > { %6742 = vmatprep.subr.bf16.mxu0 %v9585_v5  ;;  %v9658_v5 = vld [vmem:[%s13833_s11 + $0x380] ss:$48 sps:$4 sm:$0xff]  }
 0x6a7   : > { %6637 = vmatpush1.bf16.msra.mxu1 %v9580_v36  ;;  %v9661_v36 = vld [vmem:[%s13833_s11 + $0x388] ss:$48 sps:$4 sm:$0xff]  }
 0x6a8   : > { %6743 = vmatpush1.bf16.msra.mxu0 %v9583_v31  ;;  %6638 = vmatprep.subr.bf16.mxu1 %v9588_v44  ;;  %v9666_v31 = vld [vmem:[%s13833_s11 + $0x3e4] ss:$48 sps:$4 sm:$0xff]   ;;  %v9669_v44 = vld [vmem:[%s13833_s11 + $0x3ec] ss:$48 sps:$4 sm:$0xff]  }
 0x6a9   : > { %6744 = vmatprep.subr.bf16.mxu0 %v9591_v28  ;;  %v9664_v28 = vld [vmem:[%s13833_s11 + $0x3e0] ss:$48 sps:$4 sm:$0xff]  }
 0x6ab   : > { %6639 = vmatpush1.bf16.msra.mxu1 %v9586_v20  ;;  %v9667_v20 = vld [vmem:[%s13833_s11 + $0x3e8] ss:$48 sps:$4 sm:$0xff]  }
 0x6ac   : > { %6745 = vmatpush1.bf16.msra.mxu0 %v9589_v27  ;;  %6640 = vmatprep.subr.bf16.mxu1 %v9594_v60  ;;  %v9672_v27 = vld [vmem:[%s13833_s11 + $0x444] ss:$48 sps:$4 sm:$0xff]   ;;  %v9675_v60 = vld [vmem:[%s13833_s11 + $0x44c] ss:$48 sps:$4 sm:$0xff]  }
 0x6ad   : > { %6746 = vmatprep.subr.bf16.mxu0 %v9597_v57  ;;  %v9670_v57 = vld [vmem:[%s13833_s11 + $0x440] ss:$48 sps:$4 sm:$0xff]  }
 0x6af   : > { %6641 = vmatpush1.bf16.msra.mxu1 %v9592_v23  ;;  %v9673_v23 = vld [vmem:[%s13833_s11 + $0x448] ss:$48 sps:$4 sm:$0xff]  }
 0x6b0   : > { %6747 = vmatpush1.bf16.msra.mxu0 %v9595_v32  ;;  %6642 = vmatprep.subr.bf16.mxu1 %v9600_v24  ;;  %v9678_v32 = vld [vmem:[%s13833_s11 + $0x4a4] ss:$48 sps:$4 sm:$0xff]   ;;  %v9681_v24 = vld [vmem:[%s13833_s11 + $0x4ac] ss:$48 sps:$4 sm:$0xff]  }
 0x6b1   : > { %6748 = vmatprep.subr.bf16.mxu0 %v9603_v7  ;;  %v9676_v7 = vld [vmem:[%s13833_s11 + $0x4a0] ss:$48 sps:$4 sm:$0xff]  }
 0x6b3   : > { %6643 = vmatpush1.bf16.msra.mxu1 %v9598_v0  ;;  %v9679_v0 = vld [vmem:[%s13833_s11 + $0x4a8] ss:$48 sps:$4 sm:$0xff]  }
 0x6b4   : > { %6749 = vmatpush1.bf16.msra.mxu0 %v9601_v34  ;;  %6771 = vmatprep.subr.bf16.mxu1 %v9606_v22  ;;  %v9684_v34 = vld [vmem:[%s13833_s11 + $0x504] ss:$48 sps:$4 sm:$0xff]   ;;  %v9687_v22 = vld [vmem:[%s13833_s11 + $0x50c] ss:$48 sps:$4 sm:$0xff]  }
 0x6b5   : > { %6877 = vmatprep.subr.bf16.mxu0 %v9609_v51  ;;  %v9682_v51 = vld [vmem:[%s13833_s11 + $0x500] ss:$48 sps:$4 sm:$0xff]  }
 0x6b6   : > { %6645 = vmatmul.mubr.bf16.vlgmr.msra.gmra.mrb[40].mxu1 %v12330_v10 }
 0x6b7   : > { %6751 = vmatmul.mubr.bf16.vlgmr.msra.gmra.mrb[36].mxu0 %v12330_v10  ;;  %6654 = vmatprep.mubr.bf16.mxu1 %v12380_v54 }
 0x6b8   : > { %6760 = vmatprep.mubr.bf16.mxu0 %v12380_v54  ;;  %6772 = vmatpush1.bf16.msra.mxu1 %v9604_v56  ;;  %v9685_v56 = vld [vmem:[%s13833_s11 + $0x508] ss:$48 sps:$4 sm:$0xff]  }
 0x6b9   : > { %6878 = vmatpush1.bf16.msra.mxu0 %v9607_v50  ;;  %6773 = vmatprep.subr.bf16.mxu1 %v9612_v30  ;;  %v9690_v50 = vld [vmem:[%s13833_s11 + $0x564] ss:$48 sps:$4 sm:$0xff]   ;;  %v9693_v30 = vld [vmem:[%s13833_s11 + $0x56c] ss:$48 sps:$4 sm:$0xff]  }
 0x6ba   : > { %6879 = vmatprep.subr.bf16.mxu0 %v9615_v3  ;;  %v9688_v3 = vld [vmem:[%s13833_s11 + $0x560] ss:$48 sps:$4 sm:$0xff]  }
 0x6bc   : > { %6774 = vmatpush1.bf16.msra.mxu1 %v9610_v55  ;;  %v9691_v55 = vld [vmem:[%s13833_s11 + $0x568] ss:$48 sps:$4 sm:$0xff]  }
 0x6bd   : > { %6880 = vmatpush1.bf16.msra.mxu0 %v9613_v26  ;;  %6775 = vmatprep.subr.bf16.mxu1 %v9618_v49  ;;  %v9696_v26 = vld [vmem:[%s13833_s11 + $0x5c4] ss:$48 sps:$4 sm:$0xff]   ;;  %v9699_v49 = vld [vmem:[%s13833_s11 + $0x5cc] ss:$48 sps:$4 sm:$0xff]  }
 0x6be   : > { %6655 = vmatmul.mubr.bf16.gmra.mrb[44].mxu1 %v12396_v19  ;;  %6881 = vmatprep.subr.bf16.mxu0 %v9621_v9  ;;  %v9694_v9 = vld [vmem:[%s13833_s11 + $0x5c0] ss:$48 sps:$4 sm:$0xff]  }
 0x6bf   : > { %6761 = vmatmul.mubr.bf16.gmra.mrb[40].mxu0 %v12396_v19  ;;  %6803 = vmatprep.mubr.bf16.mxu1 %v12275_v63 }
 0x6c0   : > { %6776 = vmatpush1.bf16.msra.mxu1 %v9616_v29  ;;  %6909 = vmatprep.mubr.bf16.mxu0 %v12275_v63  ;;  %v9628_v63 = vld [vmem:[%s13833_s11 + $0x1a0] ss:$48 sps:$4 sm:$0xff]   ;;  %v9697_v29 = vld [vmem:[%s13833_s11 + $0x5c8] ss:$48 sps:$4 sm:$0xff]  }
 0x6c1   : > { %6882 = vmatpush1.bf16.msra.mxu0 %v9619_v35  ;;  %6777 = vmatprep.subr.bf16.mxu1 %v9624_v62  ;;  %v9702_v35 = vld [vmem:[%s13833_s11 + $0x624] ss:$48 sps:$4 sm:$0xff]   ;;  %v9705_v62 = vld [vmem:[%s13833_s11 + $0x62c] ss:$48 sps:$4 sm:$0xff]  }
 0x6c2   : > { %6883 = vmatprep.subr.bf16.mxu0 %v9627_v40  ;;  %v9700_v40 = vld [vmem:[%s13833_s11 + $0x620] ss:$48 sps:$4 sm:$0xff]  }
 0x6c4   : > { %6778 = vmatpush1.bf16.msra.mxu1 %v9622_v21  ;;  %v9703_v21 = vld [vmem:[%s13833_s11 + $0x628] ss:$48 sps:$4 sm:$0xff]  }
 0x6c5   : > { %6884 = vmatpush1.bf16.msra.mxu0 %v9625_v46  ;;  %6779 = vmatprep.subr.bf16.mxu1 %v9630_v53  ;;  %v9708_v46 = vld [vmem:[%s13833_s11 + $0x684] ss:$48 sps:$4 sm:$0xff]   ;;  %v9711_v53 = vld [vmem:[%s13833_s11 + $0x68c] ss:$48 sps:$4 sm:$0xff]  }
 0x6c6   : > { %6885 = vmatprep.subr.bf16.mxu0 %v9633_v52  ;;  %v9706_v52 = vld [vmem:[%s13833_s11 + $0x680] ss:$48 sps:$4 sm:$0xff]  }
 0x6c8   : > { %6780 = vmatpush1.bf16.msra.mxu1 %v9628_v63  ;;  %v9709_v63 = vld [vmem:[%s13833_s11 + $0x688] ss:$48 sps:$4 sm:$0xff]  }
 0x6c9   : > { %6886 = vmatpush1.bf16.msra.mxu0 %v9631_v48  ;;  %6781 = vmatprep.subr.bf16.mxu1 %v9636_v42  ;;  %v9714_v48 = vld [vmem:[%s13833_s11 + $0x6e4] ss:$48 sps:$4 sm:$0xff]   ;;  %v9715_v42 = vld [vmem:[%s13833_s11 + $0x6e8] ss:$48 sps:$4 sm:$0xff]  }
 0x6ca   : > { %6887 = vmatprep.subr.bf16.mxu0 %v9639_v59  ;;  %v9720_v59 = vld [vmem:[%s13833_s11 + $0x744] ss:$48 sps:$4 sm:$0xff]  }
 0x6cc   : > { %6782 = vmatpush1.bf16.msra.mxu1 %v9634_v12  ;;  %v9723_v12 = vld [vmem:[%s13833_s11 + $0x74c] ss:$48 sps:$4 sm:$0xff]  }
 0x6cd   : > { %6888 = vmatpush1.bf16.msra.mxu0 %v9637_v6  ;;  %6783 = vmatprep.subr.bf16.mxu1 %v9642_v37  ;;  %v9718_v6 = vld [vmem:[%s13833_s11 + $0x740] ss:$48 sps:$4 sm:$0xff]   ;;  %v9721_v37 = vld [vmem:[%s13833_s11 + $0x748] ss:$48 sps:$4 sm:$0xff]  }
 0x6ce   : > { %6889 = vmatprep.subr.bf16.mxu0 %v9645_v11  ;;  %v9726_v11 = vld [vmem:[%s13833_s11 + $0x7a4] ss:$48 sps:$4 sm:$0xff]  }
 0x6d0   : > { %6784 = vmatpush1.bf16.msra.mxu1 %v9640_v13  ;;  %v9727_v13 = vld [vmem:[%s13833_s11 + $0x7a8] ss:$48 sps:$4 sm:$0xff]  }
 0x6d1   : > { %6890 = vmatpush1.bf16.msra.mxu0 %v9643_v61  ;;  %6785 = vmatprep.subr.bf16.mxu1 %v9648_v4  ;;  %v9732_v61 = vld [vmem:[%s13833_s11 + $0x804] ss:$48 sps:$4 sm:$0xff]   ;;  %v9735_v4 = vld [vmem:[%s13833_s11 + $0x80c] ss:$48 sps:$4 sm:$0xff]  }
 0x6d2   : > { %6891 = vmatprep.subr.bf16.mxu0 %v9651_v43 }
 0x6d4   : > { %6786 = vmatpush1.bf16.msra.mxu1 %v9646_v8 }
 0x6d5   : > { %6892 = vmatpush1.bf16.msra.mxu0 %v9649_v25  ;;  %6787 = vmatprep.subr.bf16.mxu1 %v9654_v33 }
 0x6d6   : > { %6893 = vmatprep.subr.bf16.mxu0 %v9657_v15  ;;  %v9730_v15 = vld [vmem:[%s13833_s11 + $0x800] ss:$48 sps:$4 sm:$0xff]  }
 0x6d8   : > { %6788 = vmatpush1.bf16.msra.mxu1 %v9652_v41  ;;  %v9733_v41 = vld [vmem:[%s13833_s11 + $0x808] ss:$48 sps:$4 sm:$0xff]  }
 0x6d9   : > { %6894 = vmatpush1.bf16.msra.mxu0 %v9655_v2  ;;  %6789 = vmatprep.subr.bf16.mxu1 %v9660_v58 }
 0x6da   : > { %6895 = vmatprep.subr.bf16.mxu0 %v9663_v17  ;;  %v9738_v17 = vld [vmem:[%s13833_s11 + $0x864] ss:$48 sps:$4 sm:$0xff]  }
 0x6dc   : > { %6790 = vmatpush1.bf16.msra.mxu1 %v9658_v5  ;;  %v9741_v5 = vld [vmem:[%s13833_s11 + $0x86c] ss:$48 sps:$4 sm:$0xff]  }
 0x6dd   : > { %6896 = vmatpush1.bf16.msra.mxu0 %v9661_v36  ;;  %6791 = vmatprep.subr.bf16.mxu1 %v9666_v31 }
 0x6de   : > { %6897 = vmatprep.subr.bf16.mxu0 %v9669_v44 }
 0x6e0   : > { %6792 = vmatpush1.bf16.msra.mxu1 %v9664_v28 }
 0x6e1   : > { %6898 = vmatpush1.bf16.msra.mxu0 %v9667_v20  ;;  %6793 = vmatprep.subr.bf16.mxu1 %v9672_v27 }
 0x6e2   : > { %6899 = vmatprep.subr.bf16.mxu0 %v9675_v60 }
 0x6e4   : > { %6794 = vmatpush1.bf16.msra.mxu1 %v9670_v57 }
 0x6e5   : > { %6900 = vmatpush1.bf16.msra.mxu0 %v9673_v23  ;;  %6795 = vmatprep.subr.bf16.mxu1 %v9678_v32  ;;  %v9736_v23 = vld [vmem:[%s13833_s11 + $0x860] ss:$48 sps:$4 sm:$0xff]   ;;  %v9739_v32 = vld [vmem:[%s13833_s11 + $0x868] ss:$48 sps:$4 sm:$0xff]  }
 0x6e6   : > { %6901 = vmatprep.subr.bf16.mxu0 %v9681_v24 }
 0x6e8   : > { %6796 = vmatpush1.bf16.msra.mxu1 %v9676_v7 }
 0x6e9   : > { %6902 = vmatpush1.bf16.msra.mxu0 %v9679_v0  ;;  %6797 = vmatprep.subr.bf16.mxu1 %v9684_v34 }
 0x6ea   : > { %6903 = vmatprep.subr.bf16.mxu0 %v9687_v22  ;;  %v9744_v22 = vld [vmem:[%s13833_s11 + $0x8c4] ss:$48 sps:$4 sm:$0xff]  }
 0x6ec   : > { %6798 = vmatpush1.bf16.msra.mxu1 %v9682_v51  ;;  %v9747_v51 = vld [vmem:[%s13833_s11 + $0x8cc] ss:$48 sps:$4 sm:$0xff]  }
 0x6ed   : > { %6904 = vmatpush1.bf16.msra.mxu0 %v9685_v56  ;;  %6799 = vmatprep.subr.bf16.mxu1 %v9690_v50 }
 0x6ee   : > { %6905 = vmatprep.subr.bf16.mxu0 %v9693_v30 }
 0x6f0   : > { %6800 = vmatpush1.bf16.msra.mxu1 %v9688_v3 }
 0x6f1   : > { %6906 = vmatpush1.bf16.msra.mxu0 %v9691_v55  ;;  %6801 = vmatprep.subr.bf16.mxu1 %v9696_v26  ;;  %v9742_v55 = vld [vmem:[%s13833_s11 + $0x8c0] ss:$48 sps:$4 sm:$0xff]  }
 0x6f2   : > { %6907 = vmatprep.subr.bf16.mxu0 %v9699_v49 }
 0x6f4   : > { %6802 = vmatpush1.bf16.msra.mxu1 %v9694_v9 }
 0x6f5   : > { %6908 = vmatpush1.bf16.msra.mxu0 %v9697_v29  ;;  %6824 = vmatprep.subr.bf16.mxu1 %v9702_v35  ;;  %v9745_v35 = vld [vmem:[%s13833_s11 + $0x8c8] ss:$48 sps:$4 sm:$0xff]  }
 0x6f6   : > { %6930 = vmatprep.subr.bf16.mxu0 %v9705_v62 }
 0x6f7   : > { %6804 = vmatmul.mubr.bf16.vlgmr.msra.gmra.mrb[48].mxu1 %v12287_v14 }
 0x6f8   : > { %6910 = vmatmul.mubr.bf16.vlgmr.msra.gmra.mrb[44].mxu0 %v12287_v14  ;;  %6813 = vmatprep.mubr.bf16.mxu1 %v12299_v39  ;;  %v9717_v14 = vld [vmem:[%s13833_s11 + $0x6ec] ss:$48 sps:$4 sm:$0xff]  }
 0x6f9   : > { %6825 = vmatpush1.bf16.msra.mxu1 %v9700_v40  ;;  %6919 = vmatprep.mubr.bf16.mxu0 %v12299_v39  ;;  %v9712_v39 = vld [vmem:[%s13833_s11 + $0x6e0] ss:$48 sps:$4 sm:$0xff]  }
 0x6fa   : > { %6931 = vmatpush1.bf16.msra.mxu0 %v9703_v21  ;;  %6826 = vmatprep.subr.bf16.mxu1 %v9708_v46 }
 0x6fb   : > { %6932 = vmatprep.subr.bf16.mxu0 %v9711_v53  ;;  %v9750_v53 = vld [vmem:[%s13833_s11 + $0x924] ss:$48 sps:$4 sm:$0xff]  }
 0x6fd   : > { %6827 = vmatpush1.bf16.msra.mxu1 %v9706_v52 }
 0x6fe   : > { %6933 = vmatpush1.bf16.msra.mxu0 %v9709_v63  ;;  %6828 = vmatprep.subr.bf16.mxu1 %v9714_v48 }
 0x6ff   : > { %6814 = vmatmul.mubr.bf16.gmra.mrb[52].mxu1 %v12317_v1  ;;  %6934 = vmatprep.subr.bf16.mxu0 %v9717_v14 }
 0x700   : > { %6920 = vmatmul.mubr.bf16.gmra.mrb[48].mxu0 %v12317_v1  ;;  %6856 = vmatprep.mubr.bf16.mxu1 %v12321_v16  ;;  %v9729_v1 = vld [vmem:[%s13833_s11 + $0x7ac] ss:$48 sps:$4 sm:$0xff]  }
 0x701   : > { %6829 = vmatpush1.bf16.msra.mxu1 %v9712_v39  ;;  %6962 = vmatprep.mubr.bf16.mxu0 %v12321_v16  ;;  %v9724_v16 = vld [vmem:[%s13833_s11 + $0x7a0] ss:$48 sps:$4 sm:$0xff]  }
 0x702   : > { %6935 = vmatpush1.bf16.msra.mxu0 %v9715_v42  ;;  %6830 = vmatprep.subr.bf16.mxu1 %v9720_v59  ;;  %v9753_v59 = vld [vmem:[%s13833_s11 + $0x92c] ss:$48 sps:$4 sm:$0xff]  }
 0x703   : > { %6936 = vmatprep.subr.bf16.mxu0 %v9723_v12 }
 0x705   : > { %6831 = vmatpush1.bf16.msra.mxu1 %v9718_v6 }
 0x706   : > { %6937 = vmatpush1.bf16.msra.mxu0 %v9721_v37  ;;  %6832 = vmatprep.subr.bf16.mxu1 %v9726_v11 }
 0x707   : > { %6938 = vmatprep.subr.bf16.mxu0 %v9729_v1 }
 0x708   : > { %v13174_v43 = vpop.f32.mrb[32].mxu1  ;;  %v13176_v8 = vpop.f32.mrb[28].mxu0 }
 0x709   : > { %6833 = vmatpush1.bf16.msra.mxu1 %v9724_v16  ;;  %v13178_v25 = vpop.f32.mrb[33].mxu1  ;;  %v13180_v33 = vpop.f32.mrb[29].mxu0  ;;  %v6999_v36 = vrot.slane %v13174_v43, 7  ;;  %v7001_v31 = vrot.slane %v13176_v8, 7 }
 0x70a   : > { %6939 = vmatpush1.bf16.msra.mxu0 %v9727_v13  ;;  %6834 = vmatprep.subr.bf16.mxu1 %v9732_v61  ;;  %v6438_v2 = vpop.f32.mrb[34].mxu1  ;;  %v6544_v58 = vpop.f32.mrb[30].mxu0  ;;  %v7000_v24 = vrot.slane %v13178_v25, 7  ;;  %v7002_v7 = vrot.slane %v13180_v33, 7  ;;  %v9748_v13 = vld [vmem:[%s13833_s11 + $0x920] ss:$48 sps:$4 sm:$0xff]  }
 0x70b   : > { %6940 = vmatprep.subr.bf16.mxu0 %v9735_v4  ;;  %v7003_v44 = vrot.slane %v6438_v2, 7  ;;  %v7007_v28 = vrot.slane %v6544_v58, 7  ;;  %v6440_v20 = vpop.f32.mrb[35].mxu1  ;;  %v6546_v27 = vpop.f32.mrb[31].mxu0  ;;  %v9759_v2 = vld [vmem:[%s13833_s11 + $0x98c] ss:$48 sps:$4 sm:$0xff]  }
 0x70c   : > { %v7005_v0 = vrot.slane %v6440_v20, 7  ;;  %v7009_v34 = vrot.slane %v6546_v27, 7  ;;  %v9754_v58 = vld [vmem:[%s13833_s11 + $0x980] ss:$48 sps:$4 sm:$0xff]   ;;  %v9763_v20 = vld [vmem:[%s13833_s11 + $0x9e8] ss:$48 sps:$4 sm:$0xff]  }
 0x70d   : > { %v13199_v60 = vsel %vm13940_vm2, %v6999_v36, %v7003_v44  ;;  %v13204_v57 = vsel %vm13941_vm3, %v7001_v31, %v7007_v28  ;;  %6835 = vmatpush1.bf16.msra.mxu1 %v9730_v15  ;;  %vm13947_vm2 = vmmov %vm13945_vm0  ;;  %v9751_v15 = vld [vmem:[%s13833_s11 + $0x928] ss:$48 sps:$4 sm:$0xff]   ;;  %v9768_v27 = vld [vmem:[%s13833_s11 + $0xa44] ss:$48 sps:$4 sm:$0xff]  }
 0x70e   : > { %6941 = vmatpush1.bf16.msra.mxu0 %v9733_v41  ;;  %6836 = vmatprep.subr.bf16.mxu1 %v9738_v17  ;;  %v13223_v56 = vsel %vm13942_vm4, %v7000_v24, %v7005_v0  ;;  %v13228_v50 = vsel %vm13943_vm5, %v7002_v7, %v7009_v34  ;;  %vm13948_vm3 = vmmov %vm13945_vm0  ;;  %v9756_v41 = vld [vmem:[%s13833_s11 + $0x984] ss:$48 sps:$4 sm:$0xff]   ;;  %v9757_v17 = vld [vmem:[%s13833_s11 + $0x988] ss:$48 sps:$4 sm:$0xff]  }
 0x70f   : > { %6942 = vmatprep.subr.bf16.mxu0 %v9741_v5  ;;  %vm13949_vm4 = vmmov %vm13945_vm0  ;;  %v9762_v5 = vld [vmem:[%s13833_s11 + $0x9e4] ss:$48 sps:$4 sm:$0xff]  }
 0x710   : > { %v6444_v30 = vpop.f32.mrb[36].mxu1  ;;  %v6550_v3 = vpop.f32.mrb[32].mxu0  ;;  %vm13950_vm5 = vmmov %vm13945_vm0 }
 0x711   : > { %6837 = vmatpush1.bf16.msra.mxu1 %v9736_v23  ;;  %v7011_v26 = vrot.slane %v6444_v30, 7  ;;  %v7015_v49 = vrot.slane %v6550_v3, 7  ;;  %v6446_v9 = vpop.f32.mrb[37].mxu1  ;;  %v6552_v29 = vpop.f32.mrb[33].mxu0  ;;  %v9771_v23 = vld [vmem:[%s13833_s11 + $0xa4c] ss:$48 sps:$4 sm:$0xff]  }
 0x712   : > { %6943 = vmatpush1.bf16.msra.mxu0 %v9739_v32  ;;  %v7013_v62 = vrot.slane %v6446_v9, 7  ;;  %v7017_v40 = vrot.slane %v6552_v29, 7  ;;  %6838 = vmatprep.subr.bf16.mxu1 %v9744_v22  ;;  %v6448_v21 = vpop.f32.mrb[38].mxu1  ;;  %v6554_v46 = vpop.f32.mrb[34].mxu0  ;;  %v9766_v32 = vld [vmem:[%s13833_s11 + $0xa40] ss:$48 sps:$4 sm:$0xff]  }
 0x713   : > { %v13240_v52 = vsel %vm13944_vm6, %v7003_v44, %v7011_v26  ;;  %v13243_v63 = vsel %vm13945_vm0, %v7007_v28, %v7015_v49  ;;  %6944 = vmatprep.subr.bf16.mxu0 %v9747_v51  ;;  %v7019_v48 = vrot.slane %v6448_v21, 7  ;;  %v7023_v14 = vrot.slane %v6554_v46, 7  ;;  %v6450_v39 = vpop.f32.mrb[39].mxu1  ;;  %v6556_v42 = vpop.f32.mrb[35].mxu0  ;;  %vm13951_vm6 = vmmov %vm13945_vm0  ;;  %v9765_v44 = vld [vmem:[%s13833_s11 + $0x9ec] ss:$48 sps:$4 sm:$0xff]  }
 0x714   : > { %v13249_v12 = vsel %vm13946_vm1, %v7005_v0, %v7013_v62  ;;  %v13252_v6 = vsel %vm13947_vm2, %v7009_v34, %v7017_v40  ;;  %v7021_v37 = vrot.slane %v6450_v39, 7  ;;  %v7025_v11 = vrot.slane %v6556_v42, 7  ;;  %v9760_v28 = vld [vmem:[%s13833_s11 + $0x9e0] ss:$48 sps:$4 sm:$0xff]   ;;  %v9769_v0 = vld [vmem:[%s13833_s11 + $0xa48] ss:$48 sps:$4 sm:$0xff]   ;;  %vm13952_vm1 = vmmov %vm13945_vm0 }
 0x715   : > { %v13255_v1 = vsel %vm13948_vm3, %v7011_v26, %v7019_v48  ;;  %v13258_v16 = vsel %vm13949_vm4, %v7015_v49, %v7023_v14  ;;  %6839 = vmatpush1.bf16.msra.mxu1 %v9742_v55  ;;  %v9774_v34 = vld [vmem:[%s13833_s11 + $0xaa4] ss:$48 sps:$4 sm:$0xff]   ;;  %v9777_v22 = vld [vmem:[%s13833_s11 + $0xaac] ss:$48 sps:$4 sm:$0xff]   ;;  %v9772_v51 = vld [vmem:[%s13833_s11 + $0xaa0] ss:$48 sps:$4 sm:$0xff]  }
 0x716   : > { %6945 = vmatpush1.bf16.msra.mxu0 %v9745_v35  ;;  %v13264_v61 = vsel %vm13950_vm5, %v7013_v62, %v7021_v37  ;;  %v13267_v4 = vsel %vm13951_vm6, %v7017_v40, %v7025_v11  ;;  %6840 = vmatprep.subr.bf16.mxu1 %v9750_v53  ;;  %v9775_v30 = vld [vmem:[%s13833_s11 + $0xaa8] ss:$48 sps:$4 sm:$0xff]   ;;  %v9780_v3 = vld [vmem:[%s13833_s11 + $0xb04] ss:$48 sps:$4 sm:$0xff]   ;;  %v9783_v55 = vld [vmem:[%s13833_s11 + $0xb0c] ss:$48 sps:$4 sm:$0xff]  }
 0x717   : > { %6946 = vmatprep.subr.bf16.mxu0 %v9753_v59  ;;  %v9778_v26 = vld [vmem:[%s13833_s11 + $0xb00] ss:$48 sps:$4 sm:$0xff]   ;;  %v9781_v49 = vld [vmem:[%s13833_s11 + $0xb08] ss:$48 sps:$4 sm:$0xff]   ;;  %v9786_v9 = vld [vmem:[%s13833_s11 + $0xb64] ss:$48 sps:$4 sm:$0xff]  }
 0x718   : > { %v9789_v29 = vld [vmem:[%s13833_s11 + $0xb6c] ss:$48 sps:$4 sm:$0xff]   ;;  %v9784_v35 = vld [vmem:[%s13833_s11 + $0xb60] ss:$48 sps:$4 sm:$0xff]   ;;  %v9787_v62 = vld [vmem:[%s13833_s11 + $0xb68] ss:$48 sps:$4 sm:$0xff]  }
 0x719   : > { %6841 = vmatpush1.bf16.msra.mxu1 %v9748_v13  ;;  %v9792_v40 = vld [vmem:[%s13833_s11 + $0xbc4] ss:$48 sps:$4 sm:$0xff]   ;;  %v9795_v21 = vld [vmem:[%s13833_s11 + $0xbcc] ss:$48 sps:$4 sm:$0xff]   ;;  %v9790_v46 = vld [vmem:[%s13833_s11 + $0xbc0] ss:$48 sps:$4 sm:$0xff]  }
 0x71a   : > { %6947 = vmatpush1.bf16.msra.mxu0 %v9751_v15  ;;  %6842 = vmatprep.subr.bf16.mxu1 %v9756_v41  ;;  %v9793_v53 = vld [vmem:[%s13833_s11 + $0xbc8] ss:$48 sps:$4 sm:$0xff]   ;;  %v9798_v48 = vld [vmem:[%s13835_s13 + $0x4] ss:$16 sps:$4 sm:$0xff]   ;;  %v9801_v14 = vld [vmem:[%s13835_s13 + $0xc] ss:$16 sps:$4 sm:$0xff]  }
 0x71b   : > { %6948 = vmatprep.subr.bf16.mxu0 %v9759_v2  ;;  %v9796_v39 = vld [vmem:[%s13835_s13] ss:$16 sps:$4 sm:$0xff]   ;;  %v9799_v42 = vld [vmem:[%s13835_s13 + $0x8] ss:$16 sps:$4 sm:$0xff]   ;;  %v9804_v59 = vld [vmem:[%s13835_s13 + $0x24] ss:$16 sps:$4 sm:$0xff]  }
 0x71c   : > { %v9807_v37 = vld [vmem:[%s13835_s13 + $0x2c] ss:$16 sps:$4 sm:$0xff]   ;;  %v9802_v11 = vld [vmem:[%s13835_s13 + $0x20] ss:$16 sps:$4 sm:$0xff]   ;;  %v9805_v13 = vld [vmem:[%s13835_s13 + $0x28] ss:$16 sps:$4 sm:$0xff]  }
 0x71d   : > { %6843 = vmatpush1.bf16.msra.mxu1 %v9754_v58  ;;  %v9810_v15 = vld [vmem:[%s13835_s13 + $0x44] ss:$16 sps:$4 sm:$0xff]   ;;  %v10001_v41 = vld [vmem:[%s10302_s21 + $0x18] sm:$0xff]  ;;  %v9808_v58 = vld [vmem:[%s13835_s13 + $0x40] ss:$16 sps:$4 sm:$0xff]  }
 0x71e   : > { %6949 = vmatpush1.bf16.msra.mxu0 %v9757_v17  ;;  %6844 = vmatprep.subr.bf16.mxu1 %v9762_v5  ;;  %v9811_v17 = vld [vmem:[%s13835_s13 + $0x48] ss:$16 sps:$4 sm:$0xff]   ;;  %v9816_v5 = vld [vmem:[%s13835_s13 + $0x64] ss:$16 sps:$4 sm:$0xff]   ;;  %vm13954_vm2 = vmmov %vm13945_vm0 }
 0x71f   : > { %6950 = vmatprep.subr.bf16.mxu0 %v9765_v44  ;;  %v9819_v44 = vld [vmem:[%s13835_s13 + $0x6c] ss:$16 sps:$4 sm:$0xff]   ;;  %vm13955_vm3 = vmmov %vm13945_vm0 }
 0x720   : > { %v7046_v8 = vsel %vm13955_vm3, 0.0, %v7002_v7 }
 0x721   : > { %6845 = vmatpush1.bf16.msra.mxu1 %v9760_v28  ;;  %v9814_v28 = vld [vmem:[%s13835_s13 + $0x60] ss:$16 sps:$4 sm:$0xff]   ;;  %v7114_v33 = vsel %vm11352_vm9, 0.0, %v7046_v8 }
 0x722   : > { %6951 = vmatpush1.bf16.msra.mxu0 %v9763_v20  ;;  %6846 = vmatprep.subr.bf16.mxu1 %v9768_v27  ;;  %v9817_v20 = vld [vmem:[%s13835_s13 + $0x68] ss:$16 sps:$4 sm:$0xff]   ;;  %v9822_v27 = vld [vmem:[%s13835_s13 + $0x84] ss:$16 sps:$4 sm:$0xff]  }
 0x723   : > { %6952 = vmatprep.subr.bf16.mxu0 %v9771_v23  ;;  %v9820_v23 = vld [vmem:[%s13835_s13 + $0x80] ss:$16 sps:$4 sm:$0xff]  }
 0x725   : > { %6847 = vmatpush1.bf16.msra.mxu1 %v9766_v32  ;;  %v9823_v32 = vld [vmem:[%s13835_s13 + $0x88] ss:$16 sps:$4 sm:$0xff]  }
 0x726   : > { %6953 = vmatpush1.bf16.msra.mxu0 %v9769_v0  ;;  %6848 = vmatprep.subr.bf16.mxu1 %v9774_v34  ;;  %v9828_v0 = vld [vmem:[%s13835_s13 + $0xa4] ss:$16 sps:$4 sm:$0xff]   ;;  %v9831_v34 = vld [vmem:[%s13835_s13 + $0xac] ss:$16 sps:$4 sm:$0xff]  }
 0x727   : > { %6954 = vmatprep.subr.bf16.mxu0 %v9777_v22  ;;  %v9826_v22 = vld [vmem:[%s13835_s13 + $0xa0] ss:$16 sps:$4 sm:$0xff]  }
 0x729   : > { %6849 = vmatpush1.bf16.msra.mxu1 %v9772_v51  ;;  %v9829_v51 = vld [vmem:[%s13835_s13 + $0xa8] ss:$16 sps:$4 sm:$0xff]  }
 0x72a   : > { %6955 = vmatpush1.bf16.msra.mxu0 %v9775_v30  ;;  %6850 = vmatprep.subr.bf16.mxu1 %v9780_v3  ;;  %v9834_v30 = vld [vmem:[%s13835_s13 + $0xc4] ss:$16 sps:$4 sm:$0xff]   ;;  %v9837_v3 = vld [vmem:[%s13835_s13 + $0xcc] ss:$16 sps:$4 sm:$0xff]  }
 0x72b   : > { %6956 = vmatprep.subr.bf16.mxu0 %v9783_v55  ;;  %v9832_v55 = vld [vmem:[%s13835_s13 + $0xc0] ss:$16 sps:$4 sm:$0xff]  }
 0x72d   : > { %6851 = vmatpush1.bf16.msra.mxu1 %v9778_v26  ;;  %v9835_v26 = vld [vmem:[%s13835_s13 + $0xc8] ss:$16 sps:$4 sm:$0xff]  }
 0x72e   : > { %6957 = vmatpush1.bf16.msra.mxu0 %v9781_v49  ;;  %6852 = vmatprep.subr.bf16.mxu1 %v9786_v9  ;;  %v9840_v49 = vld [vmem:[%s13835_s13 + $0xe4] ss:$16 sps:$4 sm:$0xff]   ;;  %v9843_v9 = vld [vmem:[%s13835_s13 + $0xec] ss:$16 sps:$4 sm:$0xff]  }
 0x72f   : > { %6958 = vmatprep.subr.bf16.mxu0 %v9789_v29  ;;  %v9838_v29 = vld [vmem:[%s13835_s13 + $0xe0] ss:$16 sps:$4 sm:$0xff]  }
 0x731   : > { %6853 = vmatpush1.bf16.msra.mxu1 %v9784_v35  ;;  %v9841_v35 = vld [vmem:[%s13835_s13 + $0xe8] ss:$16 sps:$4 sm:$0xff]  }
 0x732   : > { %6959 = vmatpush1.bf16.msra.mxu0 %v9787_v62  ;;  %6854 = vmatprep.subr.bf16.mxu1 %v9792_v40  ;;  %v9846_v62 = vld [vmem:[%s13835_s13 + $0x104] ss:$16 sps:$4 sm:$0xff]   ;;  %v9849_v40 = vld [vmem:[%s13835_s13 + $0x10c] ss:$16 sps:$4 sm:$0xff]  }
 0x733   : > { %6960 = vmatprep.subr.bf16.mxu0 %v9795_v21  ;;  %v9844_v21 = vld [vmem:[%s13835_s13 + $0x100] ss:$16 sps:$4 sm:$0xff]  }
 0x735   : > { %6855 = vmatpush1.bf16.msra.mxu1 %v9790_v46  ;;  %v9847_v46 = vld [vmem:[%s13835_s13 + $0x108] ss:$16 sps:$4 sm:$0xff]  }
 0x736   : > { %6961 = vmatpush1.bf16.msra.mxu0 %v9793_v53  ;;  %7601 = vmatprep.subr.bf16.mxu1 %v9798_v48  ;;  %v9852_v53 = vld [vmem:[%s13835_s13 + $0x124] ss:$16 sps:$4 sm:$0xff]   ;;  %v9855_v48 = vld [vmem:[%s13835_s13 + $0x12c] ss:$16 sps:$4 sm:$0xff]  }
 0x737   : > { %7654 = vmatprep.subr.bf16.mxu0 %v9801_v14  ;;  %v9850_v14 = vld [vmem:[%s13835_s13 + $0x120] ss:$16 sps:$4 sm:$0xff]  }
 0x738   : > { %6857 = vmatmul.mubr.bf16.vlgmr.msra.gmra.mrb[48].mxu1 %v12330_v10 }
 0x739   : > { %6963 = vmatmul.mubr.bf16.vlgmr.msra.gmra.mrb[44].mxu0 %v12330_v10  ;;  %6866 = vmatprep.mubr.bf16.mxu1 %v12380_v54  ;;  %v9813_v10 = vld [vmem:[%s13835_s13 + $0x4c] ss:$16 sps:$4 sm:$0xff]  }
 0x73a   : > { %6972 = vmatprep.mubr.bf16.mxu0 %v12380_v54  ;;  %7602 = vmatpush1.bf16.msra.mxu1 %v9796_v39  ;;  %v10000_v54 = vld [vmem:[%s10302_s21 + $0x8] sm:$0xff] }
 0x73b   : > { %7655 = vmatpush1.bf16.msra.mxu0 %v9799_v42  ;;  %7603 = vmatprep.subr.bf16.mxu1 %v9804_v59  ;;  %v7214_v2 = vpack.c.bf16 %v10001_v41, %v10000_v54  ;;  %v9853_v39 = vld [vmem:[%s13835_s13 + $0x128] ss:$16 sps:$4 sm:$0xff]   ;;  %v9858_v42 = vld [vmem:[%s13835_s13 + $0x144] ss:$16 sps:$4 sm:$0xff]   ;;  %v9861_v59 = vld [vmem:[%s13835_s13 + $0x14c] ss:$16 sps:$4 sm:$0xff]  }
 0x73c   : > { %7656 = vmatprep.subr.bf16.mxu0 %v9807_v37  ;;  %v9856_v37 = vld [vmem:[%s13835_s13 + $0x140] ss:$16 sps:$4 sm:$0xff]   ;;  %v9865_v54 = vld [vmem:[%s13835_s13 + $0x168] ss:$16 sps:$4 sm:$0xff]   ;;  %v9870_v41 = vld [vmem:[%s13835_s13 + $0x184] ss:$16 sps:$4 sm:$0xff]  }
 0x73e   : > { %7604 = vmatpush1.bf16.msra.mxu1 %v9802_v11  ;;  %v9859_v11 = vld [vmem:[%s13835_s13 + $0x148] ss:$16 sps:$4 sm:$0xff]  }
 0x73f   : > { %7657 = vmatpush1.bf16.msra.mxu0 %v9805_v13  ;;  %7605 = vmatprep.subr.bf16.mxu1 %v9810_v15  ;;  %v9864_v13 = vld [vmem:[%s13835_s13 + $0x164] ss:$16 sps:$4 sm:$0xff]   ;;  %v9867_v15 = vld [vmem:[%s13835_s13 + $0x16c] ss:$16 sps:$4 sm:$0xff]  }
 0x740   : > { %6867 = vmatmul.mubr.bf16.gmra.mrb[52].mxu1 %v12396_v19  ;;  %7658 = vmatprep.subr.bf16.mxu0 %v9813_v10  ;;  %v9862_v10 = vld [vmem:[%s13835_s13 + $0x160] ss:$16 sps:$4 sm:$0xff]  }
 0x741   : > { %6973 = vmatmul.mubr.bf16.gmra.mrb[48].mxu0 %v12396_v19  ;;  %7633 = vmatprep.mubr.bf16.mxu1 %v7214_v2  ;;  %v9825_v19 = vld [vmem:[%s13835_s13 + $0x8c] ss:$16 sps:$4 sm:$0xff]  }
 0x742   : > { %7606 = vmatpush1.bf16.msra.mxu1 %v9808_v58  ;;  %7686 = vmatprep.mubr.bf16.mxu0 %v7214_v2  ;;  %v9873_v2 = vld [vmem:[%s13835_s13 + $0x18c] ss:$16 sps:$4 sm:$0xff]   ;;  %v9868_v58 = vld [vmem:[%s13835_s13 + $0x180] ss:$16 sps:$4 sm:$0xff]  }
 0x743   : > { %7659 = vmatpush1.bf16.msra.mxu0 %v9811_v17  ;;  %7607 = vmatprep.subr.bf16.mxu1 %v9816_v5  ;;  %v9871_v17 = vld [vmem:[%s13835_s13 + $0x188] ss:$16 sps:$4 sm:$0xff]   ;;  %v9876_v5 = vld [vmem:[%s13835_s13 + $0x1a4] ss:$16 sps:$4 sm:$0xff]  }
 0x744   : > { %7660 = vmatprep.subr.bf16.mxu0 %v9819_v44  ;;  %v9879_v44 = vld [vmem:[%s13835_s13 + $0x1ac] ss:$16 sps:$4 sm:$0xff]  }
 0x746   : > { %7608 = vmatpush1.bf16.msra.mxu1 %v9814_v28  ;;  %v9874_v28 = vld [vmem:[%s13835_s13 + $0x1a0] ss:$16 sps:$4 sm:$0xff]  }
 0x747   : > { %7661 = vmatpush1.bf16.msra.mxu0 %v9817_v20  ;;  %7609 = vmatprep.subr.bf16.mxu1 %v9822_v27  ;;  %v9877_v20 = vld [vmem:[%s13835_s13 + $0x1a8] ss:$16 sps:$4 sm:$0xff]   ;;  %v9882_v27 = vld [vmem:[%s13835_s13 + $0x1c4] ss:$16 sps:$4 sm:$0xff]  }
 0x748   : > { %7662 = vmatprep.subr.bf16.mxu0 %v9825_v19  ;;  %v9885_v19 = vld [vmem:[%s13835_s13 + $0x1cc] ss:$16 sps:$4 sm:$0xff]  }
 0x74a   : > { %7610 = vmatpush1.bf16.msra.mxu1 %v9820_v23  ;;  %v9880_v23 = vld [vmem:[%s13835_s13 + $0x1c0] ss:$16 sps:$4 sm:$0xff]  }
 0x74b   : > { %7663 = vmatpush1.bf16.msra.mxu0 %v9823_v32  ;;  %7611 = vmatprep.subr.bf16.mxu1 %v9828_v0  ;;  %v9883_v32 = vld [vmem:[%s13835_s13 + $0x1c8] ss:$16 sps:$4 sm:$0xff]   ;;  %v9888_v0 = vld [vmem:[%s13835_s13 + $0x1e4] ss:$16 sps:$4 sm:$0xff]  }
 0x74c   : > { %7664 = vmatprep.subr.bf16.mxu0 %v9831_v34  ;;  %v9891_v34 = vld [vmem:[%s13835_s13 + $0x1ec] ss:$16 sps:$4 sm:$0xff]  }
 0x74e   : > { %7612 = vmatpush1.bf16.msra.mxu1 %v9826_v22  ;;  %v9886_v22 = vld [vmem:[%s13835_s13 + $0x1e0] ss:$16 sps:$4 sm:$0xff]  }
 0x74f   : > { %7665 = vmatpush1.bf16.msra.mxu0 %v9829_v51  ;;  %7613 = vmatprep.subr.bf16.mxu1 %v9834_v30  ;;  %v9889_v51 = vld [vmem:[%s13835_s13 + $0x1e8] ss:$16 sps:$4 sm:$0xff]   ;;  %v10002_v30 = vld [vmem:[%s10302_s21] sm:$0xff] }
 0x750   : > { %7666 = vmatprep.subr.bf16.mxu0 %v9837_v3  ;;  %v10003_v3 = vld [vmem:[%s10302_s21 + $0x10] sm:$0xff] }
 0x752   : > { %7614 = vmatpush1.bf16.msra.mxu1 %v9832_v55  ;;  %v7213_v55 = vpack.c.bf16 %v10003_v3, %v10002_v30  ;;  %v7115_v30 = vsel %vm11367_vm10, 0.0, %v13199_v60  ;;  %v7118_v60 = vsel %vm11367_vm10, 0.0, %v13228_v50 }
 0x753   : > { %7667 = vmatpush1.bf16.msra.mxu0 %v9835_v26  ;;  %7615 = vmatprep.subr.bf16.mxu1 %v9840_v49  ;;  %v10004_v26 = vld [vmem:[%s10302_s21 + $0x28] sm:$0xff]  ;;  %v10005_v49 = vld [vmem:[%s10302_s21 + $0x38] sm:$0xff] }
 0x754   : > { %7668 = vmatprep.subr.bf16.mxu0 %v9843_v9  ;;  %v7216_v9 = vpack.c.bf16 %v10005_v49, %v10004_v26 }
 0x756   : > { %7616 = vmatpush1.bf16.msra.mxu1 %v9838_v29  ;;  %v10006_v29 = vld [vmem:[%s10302_s21 + $0x20] sm:$0xff] }
 0x757   : > { %7669 = vmatpush1.bf16.msra.mxu0 %v9841_v35  ;;  %7617 = vmatprep.subr.bf16.mxu1 %v9846_v62  ;;  %v10007_v35 = vld [vmem:[%s10302_s21 + $0x30] sm:$0xff]  ;;  %s10012_s21 = sshll.u32 %s10074_s25, 4  ;;  %s10013_s21 = int_to_ptr.vmem [resolvable:$false] %s10012_s21 }
 0x758   : > { %7670 = vmatprep.subr.bf16.mxu0 %v9849_v40  ;;  %v7215_v62 = vpack.c.bf16 %v10007_v35, %v10006_v29  ;;  %v7043_v40 = vsel %vm13945_vm0, 0.0, %v6999_v36  ;;  %v7116_v29 = vsel %vm11367_vm10, 0.0, %v13223_v56  ;;  %v7121_v56 = vsel %vm11411_vm11, 0.0, %v13243_v63  ;;  %s10014_s20 = scalar_lea.vmem %s10013_s21, 4096  ;;  %p10015_p0 = scmp.lt.s32.totalorder %s13771_s30, %s10013_s21 }
 0x759   : > { %p10016_p1 = scmp.lt.s32.totalorder %s10014_s20, %s10008_s26 }
 0x75a   : > { %7618 = vmatpush1.bf16.msra.mxu1 %v9844_v21  ;;  %v7045_v21 = vsel %vm13952_vm1, 0.0, %v7001_v31 }
 0x75b   : > { %7671 = vmatpush1.bf16.msra.mxu0 %v9847_v46  ;;  %7619 = vmatprep.subr.bf16.mxu1 %v9852_v53  ;;  %v7113_v43 = vsel %vm11352_vm9, 0.0, %v7045_v21  ;;  %p10017_p2 = por %p10016_p1, %p10015_p0 }
 0x75c   : > { %7672 = vmatprep.subr.bf16.mxu0 %v9855_v48 }
 0x75d   : > { %p10018_p3 = pnand %p10017_p2, %p10011_p13 }
 0x75e   : > { %7620 = vmatpush1.bf16.msra.mxu1 %v9850_v14 }
 0x75f   : > { %7673 = vmatpush1.bf16.msra.mxu0 %v9853_v39  ;;  %7621 = vmatprep.subr.bf16.mxu1 %v9858_v42  ;;  %v7111_v39 = vsel %vm11352_vm9, 0.0, %v7043_v40  ;;  %v7044_v42 = vsel %vm13954_vm2, 0.0, %v7000_v24 }
 0x760   : > { %7674 = vmatprep.subr.bf16.mxu0 %v9861_v59  ;;  %v7112_v24 = vsel %vm11352_vm9, 0.0, %v7044_v42 }
 0x762   : > { %7622 = vmatpush1.bf16.msra.mxu1 %v9856_v37 }
 0x763   : > { %7675 = vmatpush1.bf16.msra.mxu0 %v9859_v11  ;;  %7623 = vmatprep.subr.bf16.mxu1 %v9864_v13 }
 0x764   : > { %7676 = vmatprep.subr.bf16.mxu0 %v9867_v15 }
 0x766   : > { %7624 = vmatpush1.bf16.msra.mxu1 %v9862_v10 }
 0x767   : > { %7677 = vmatpush1.bf16.msra.mxu0 %v9865_v54  ;;  %7625 = vmatprep.subr.bf16.mxu1 %v9870_v41 }
 0x768   : > { %7678 = vmatprep.subr.bf16.mxu0 %v9873_v2 }
 0x76a   : > { %7626 = vmatpush1.bf16.msra.mxu1 %v9868_v58 }
 0x76b   : > { %7679 = vmatpush1.bf16.msra.mxu0 %v9871_v17  ;;  %7627 = vmatprep.subr.bf16.mxu1 %v9876_v5 }
 0x76c   : > { %7680 = vmatprep.subr.bf16.mxu0 %v9879_v44 }
 0x76e   : > { %7628 = vmatpush1.bf16.msra.mxu1 %v9874_v28 }
 0x76f   : > { %7681 = vmatpush1.bf16.msra.mxu0 %v9877_v20  ;;  %7629 = vmatprep.subr.bf16.mxu1 %v9882_v27 }
 0x770   : > { %7682 = vmatprep.subr.bf16.mxu0 %v9885_v19 }
 0x772   : > { %7630 = vmatpush1.bf16.msra.mxu1 %v9880_v23 }
 0x773   : > { %7683 = vmatpush1.bf16.msra.mxu0 %v9883_v32  ;;  %7631 = vmatprep.subr.bf16.mxu1 %v9888_v0 }
 0x774   : > { %7684 = vmatprep.subr.bf16.mxu0 %v9891_v34 }
 0x776   : > { %7632 = vmatpush1.bf16.msra.mxu1 %v9886_v22 }
 0x777   : > { %7685 = vmatpush1.bf16.msra.mxu0 %v9889_v51 }
 0x779   : > { %7634 = vmatmul.mubr.bf16.vlgmr.msra.gmra.mrb[40].mxu1 %v7213_v55 }
 0x77a   : > { %7687 = vmatmul.mubr.bf16.vlgmr.msra.gmra.mrb[36].mxu0 %v7213_v55  ;;  %7643 = vmatprep.mubr.bf16.mxu1 %v7216_v9 }
 0x77b   : > { %7696 = vmatprep.mubr.bf16.mxu0 %v7216_v9  ;;  %v7117_v9 = vsel %vm11367_vm10, 0.0, %v13204_v57 }
 0x781   : > { %7644 = vmatmul.mubr.bf16.gmra.mrb[44].mxu1 %v7215_v62 }
 0x782   : > { %7697 = vmatmul.mubr.bf16.gmra.mrb[40].mxu0 %v7215_v62 }
 0x80b   : > { %v6858_v46 = vpop.f32.mrb[48].mxu1 }
 0x80c   : > { %v6964_v53 = vpop.f32.mrb[44].mxu0  ;;  %v6860_v48 = vpop.f32.mrb[49].mxu1  ;;  %v7063_v36 = vrot.slane %v6858_v46, 1  ;;  %v7126_v46 = vsel %vm11417_vm12, 0.0, %v13267_v4 }
 0x80d   : > { %v6966_v59 = vpop.f32.mrb[45].mxu0  ;;  %v6862_v37 = vpop.f32.mrb[50].mxu1  ;;  %v7069_v15 = vrot.slane %v6964_v53, 1  ;;  %v7066_v10 = vrot.slane %v6860_v48, 1  ;;  %v7119_v53 = vsel %vm11411_vm11, 0.0, %v13240_v52 }
 0x80e   : > { %v7064_v31 = vrot.slane %v6862_v37, 1  ;;  %v6968_v11 = vpop.f32.mrb[46].mxu0  ;;  %v6864_v13 = vpop.f32.mrb[51].mxu1  ;;  %v7072_v2 = vrot.slane %v6966_v59, 1 }
 0x80f   : > { %v7070_v54 = vrot.slane %v6968_v11, 1  ;;  %v7067_v41 = vrot.slane %v6864_v13, 1  ;;  %v6970_v25 = vpop.f32.mrb[47].mxu0 }
 0x810   : > { %v7065_v58 = vsel %vm2663_vm14, %v7063_v36, %v7064_v31  ;;  %v7073_v17 = vrot.slane %v6970_v25, 1 }
 0x811   : > { %v7071_v7 = vsel %vm2663_vm14, %v7069_v15, %v7070_v54  ;;  %v7068_v5 = vsel %vm2663_vm14, %v7066_v10, %v7067_v41  ;;  %v7127_v28 = vsel %vm11475_vm13, 0.0, %v7065_v58  ;;  %v7120_v10 = vsel %vm11411_vm11, 0.0, %v13249_v12 }
 0x812   : > { %v7074_v20 = vsel %vm2663_vm14, %v7072_v2, %v7073_v17  ;;  %v13588_v27 = vadd.f32 %v7127_v28, %v7111_v39  ;;  %v7129_v19 = vsel %vm11475_vm13, 0.0, %v7071_v7  ;;  %v7128_v23 = vsel %vm11475_vm13, 0.0, %v7068_v5 }
 0x813   : > { %v6868_v32 = vpop.f32.mrb[52].mxu1  ;;  %v13594_v0 = vadd.f32 %v7129_v19, %v7113_v43  ;;  %v13596_v34 = vadd.f32 %v7128_v23, %v7112_v24  ;;  %v7130_v22 = vsel %vm11475_vm13, 0.0, %v7074_v20  ;;  %v7122_v2 = vsel %vm11411_vm11, 0.0, %v13252_v6 }
 0x814   : > { %v7075_v3 = vrot.slane %v6868_v32, 1  ;;  %v6974_v55 = vpop.f32.mrb[48].mxu0  ;;  %v6870_v26 = vpop.f32.mrb[53].mxu1  ;;  %v13603_v49 = vadd.f32 %v7130_v22, %v7114_v33 }
 0x815   : > { %v7079_v35 = vrot.slane %v6974_v55, 1  ;;  %v7077_v62 = vrot.slane %v6870_v26, 1  ;;  %v6976_v40 = vpop.f32.mrb[49].mxu0  ;;  %v6872_v21 = vpop.f32.mrb[54].mxu1 }
 0x816   : > { %v7076_v48 = vsel %vm2663_vm14, %v7064_v31, %v7075_v3  ;;  %v7081_v14 = vrot.slane %v6976_v40, 1  ;;  %v7083_v57 = vrot.slane %v6872_v21, 1  ;;  %v6978_v39 = vpop.f32.mrb[50].mxu0  ;;  %v6874_v42 = vpop.f32.mrb[55].mxu1 }
 0x817   : > { %v7080_v59 = vsel %vm2663_vm14, %v7070_v54, %v7079_v35  ;;  %v7078_v37 = vsel %vm2663_vm14, %v7067_v41, %v7077_v62  ;;  %v7087_v43 = vrot.slane %v6978_v39, 1  ;;  %v7085_v50 = vrot.slane %v6874_v42, 1  ;;  %v6980_v8 = vpop.f32.mrb[51].mxu0 }
 0x818   : > { %v7082_v36 = vsel %vm2663_vm14, %v7073_v17, %v7081_v14  ;;  %v7084_v52 = vsel %vm2663_vm14, %v7075_v3, %v7083_v57  ;;  %v7107_v31 = vsel %vm2663_vm14, %v7083_v57, 0.0  ;;  %v7089_v11 = vrot.slane %v6980_v8, 1 }
 0x819   : > { %v7088_v13 = vsel %vm2663_vm14, %v7079_v35, %v7087_v43  ;;  %v7109_v15 = vsel %vm2663_vm14, %v7087_v43, 0.0  ;;  %v7086_v63 = vsel %vm2663_vm14, %v7077_v62, %v7085_v50  ;;  %v7139_v41 = vsel %vm11579_vm7, 0.0, %v7107_v31 }
 0x81a   : > { %v7141_v25 = vsel %vm11579_vm7, 0.0, %v7109_v15  ;;  %v7090_v24 = vsel %vm2663_vm14, %v7081_v14, %v7089_v11  ;;  %v7108_v58 = vsel %vm2663_vm14, %v7085_v50, 0.0  ;;  %v7110_v17 = vsel %vm2663_vm14, %v7089_v11, 0.0  ;;  %v7175_v14 = vld [vmem:[%s13834_s12] sm:$0xf] }
 0x81b   : > { %v7131_v7 = vsel %vm11503_vm15, 0.0, %v7076_v48  ;;  %v7133_v12 = vsel %vm11503_vm15, 0.0, %v7080_v59  ;;  %v7132_v28 = vsel %vm11503_vm15, 0.0, %v7078_v37  ;;  %v7134_v20 = vsel %vm11503_vm15, 0.0, %v7082_v36 }
 0x81c   : > { %v8783_v5 = vadd.f32 %v7131_v7, %v7115_v30  ;;  %v8807_v44 = vadd.f32 %v7133_v12, %v7117_v9  ;;  %v8786_v19 = vadd.f32 %v7132_v28, %v7116_v29  ;;  %v8810_v6 = vadd.f32 %v7134_v20, %v7118_v60 }
 0x81d   : > { %v7135_v32 = vsel %vm11565_vm8, 0.0, %v7084_v52  ;;  %v7137_v22 = vsel %vm11565_vm8, 0.0, %v7088_v13  ;;  %v7140_v51 = vsel %vm11579_vm7, 0.0, %v7108_v58  ;;  %v7142_v30 = vsel %vm11579_vm7, 0.0, %v7110_v17 }
 0x81e   : > { %v13658_v3 = vadd.f32 %v7135_v32, %v7119_v53  ;;  %v13660_v55 = vadd.f32 %v7137_v22, %v7121_v56  ;;  %v7136_v26 = vsel %vm11565_vm8, 0.0, %v7086_v63  ;;  %v7138_v9 = vsel %vm11565_vm8, 0.0, %v7090_v24 }
 0x81f   : > { %v7123_v35 = vsel %vm11417_vm12, 0.0, %v13255_v1  ;;  %v7125_v62 = vsel %vm11417_vm12, 0.0, %v13258_v16  ;;  %v13672_v40 = vadd.f32 %v7136_v26, %v7120_v10  ;;  %v13674_v21 = vadd.f32 %v7138_v9, %v7122_v2 }
 0x820   : > { %v7124_v60 = vsel %vm11417_vm12, 0.0, %v13264_v61  ;;  %v13682_v53 = vadd.f32 %v7139_v41, %v7123_v35  ;;  %v13684_v1 = vadd.f32 %v7141_v25, %v7125_v62  ;;  %v13688_v16 = vadd.f32 %v7142_v30, %v7126_v46  ;;  %v7723_v61 = vld [vmem:[%s13836_s14] sm:$0xf] }
 0x821   : > { %v13686_v48 = vadd.f32 %v7140_v51, %v7124_v60  ;;  %v7180_v57 = vrot.slane %v7175_v14, %v10626_v38  ;;  %v7188_v4 = vrot.slane %v7175_v14, %v11466_v18  ;;  %v7184_v39 = vrot.slane %v7175_v14, %v10632_v47 }
 0x822   : > { %v13701_v42 = vrot.slane %v7175_v14, %v11469_v45  ;;  %v13709_v59 = vrot.slane %v7723_v61, %v10626_v38  ;;  %v13713_v50 = vrot.slane %v7723_v61, %v11466_v18  ;;  %v13717_v36 = vrot.slane %v7723_v61, %v10632_v47 }
 0x823   : > { %v8778_v56 = vadd.f32 %v13588_v27, %v7180_v57  ;;  %v8802_v43 = vadd.f32 %v13594_v0, %v7188_v4  ;;  %v8781_v8 = vadd.f32 %v13596_v34, %v7184_v39  ;;  %v13722_v38 = vrot.slane %v7723_v61, %v11469_v45 }
 0x824   : > { %v8805_v27 = vadd.f32 %v13603_v49, %v13701_v42  ;;  %v8784_v13 = vadd.f32 %v8783_v5, %v7180_v57  ;;  %v8808_v10 = vadd.f32 %v8807_v44, %v7188_v4  ;;  %v8787_v34 = vadd.f32 %v8786_v19, %v7184_v39 }
 0x825   : > { %v8811_v2 = vadd.f32 %v8810_v6, %v13701_v42  ;;  %v8790_v19 = vadd.f32 %v13658_v3, %v7180_v57  ;;  %v8814_v23 = vadd.f32 %v13660_v55, %v7188_v4  ;;  %v8793_v32 = vadd.f32 %v13672_v40, %v7184_v39 }
 0x826   : > { %v8817_v26 = vadd.f32 %v13674_v21, %v13701_v42  ;;  %v8796_v9 = vadd.f32 %v13682_v53, %v7180_v57  ;;  %v8820_v55 = vadd.f32 %v13684_v1, %v7188_v4  ;;  %v8799_v40 = vadd.f32 %v13686_v48, %v7184_v39 }
 0x827   : > { %v8823_v21 = vadd.f32 %v13688_v16, %v13701_v42 }
 0x84c   : > { %v7635_v37 = vpop.f32.mrb[40].mxu1 }
 0x84d   : > { %v8779_v52 = vadd.f32 %v8778_v56, %v7635_v37  ;;  %v7688_v31 = vpop.f32.mrb[36].mxu0  ;;  %v7637_v11 = vpop.f32.mrb[41].mxu1 }
 0x84e   : > { %v8803_v15 = vadd.f32 %v8802_v43, %v7688_v31  ;;  %v8782_v0 = vadd.f32 %v8781_v8, %v7637_v11  ;;  %v7690_v18 = vpop.f32.mrb[37].mxu0  ;;  %v7639_v63 = vpop.f32.mrb[42].mxu1 }
 0x84f   : > { %v7745_v47 = vadd.f32 %v8779_v52, %v13709_v59  ;;  %v8806_v54 = vadd.f32 %v8805_v27, %v7690_v18  ;;  %v8785_v41 = vadd.f32 %v8784_v13, %v7639_v63  ;;  %v7692_v25 = vpop.f32.mrb[38].mxu0  ;;  %v7641_v24 = vpop.f32.mrb[43].mxu1 }
 0x850   : > { %v7747_v49 = vadd.f32 %v8803_v15, %v13713_v50  ;;  %v7746_v45 = vadd.f32 %v8782_v0, %v13717_v36  ;;  %v8809_v58 = vadd.f32 %v8808_v10, %v7692_v25  ;;  %v8788_v17 = vadd.f32 %v8787_v34, %v7641_v24  ;;  %v7694_v33 = vpop.f32.mrb[39].mxu0 }
 0x851   : > { %7761 = vst [vmem:[%s13729_s29] sm:$0xff] %v7745_v47  ;;  %v7748_v7 = vadd.f32 %v8806_v54, %v13722_v38  ;;  %v7749_v12 = vadd.f32 %v8785_v41, %v13709_v59  ;;  %v8812_v5 = vadd.f32 %v8811_v2, %v7694_v33 }
 0x852   : > { %7763 = vst [vmem:[%s13729_s29 + $0x10] sm:$0xff] %v7747_v49  ;;  %7762 = vst [vmem:[%s13729_s29 + $0x8] sm:$0xff] %v7746_v45  ;;  %v7751_v44 = vadd.f32 %v8809_v58, %v13713_v50  ;;  %v7750_v28 = vadd.f32 %v8788_v17, %v13717_v36 }
 0x853   : > { %7764 = vst [vmem:[%s13729_s29 + $0x18] sm:$0xff] %v7748_v7  ;;  %7765 = vst [vmem:[%s13729_s29 + $0x20] sm:$0xff] %v7749_v12  ;;  %v7752_v20 = vadd.f32 %v8812_v5, %v13722_v38 }
 0x854   : > { %7767 = vst [vmem:[%s13729_s29 + $0x30] sm:$0xff] %v7751_v44  ;;  %7766 = vst [vmem:[%s13729_s29 + $0x28] sm:$0xff] %v7750_v28  ;;  %v7645_v6 = vpop.f32.mrb[44].mxu1 }
 0x855   : > { %7768 = vst [vmem:[%s13729_s29 + $0x38] sm:$0xff] %v7752_v20  ;;  %v8791_v22 = vadd.f32 %v8790_v19, %v7645_v6  ;;  %v7698_v51 = vpop.f32.mrb[40].mxu0  ;;  %v7647_v30 = vpop.f32.mrb[45].mxu1 }
 0x856   : > { %v8815_v29 = vadd.f32 %v8814_v23, %v7698_v51  ;;  %v8794_v3 = vadd.f32 %v8793_v32, %v7647_v30  ;;  %v7700_v35 = vpop.f32.mrb[41].mxu0  ;;  %v7649_v62 = vpop.f32.mrb[46].mxu1 }
 0x857   : > { %v7753_v60 = vadd.f32 %v8791_v22, %v13709_v59  ;;  %v8818_v46 = vadd.f32 %v8817_v26, %v7700_v35  ;;  %v8797_v14 = vadd.f32 %v8796_v9, %v7649_v62  ;;  %v7702_v61 = vpop.f32.mrb[42].mxu0  ;;  %v7651_v56 = vpop.f32.mrb[47].mxu1 }
 0x858   : > { %v7755_v53 = vadd.f32 %v8815_v29, %v13713_v50  ;;  %v7754_v1 = vadd.f32 %v8794_v3, %v13717_v36  ;;  %v8821_v48 = vadd.f32 %v8820_v55, %v7702_v61  ;;  %v8800_v57 = vadd.f32 %v8799_v40, %v7651_v56  ;;  %v7704_v4 = vpop.f32.mrb[43].mxu0 }
 0x859   : > { %7769 = vst [vmem:[%s13729_s29 + $0x40] sm:$0xff] %v7753_v60  ;;  %v7756_v39 = vadd.f32 %v8818_v46, %v13722_v38  ;;  %v7757_v16 = vadd.f32 %v8797_v14, %v13709_v59  ;;  %v8824_v42 = vadd.f32 %v8823_v21, %v7704_v4 }
 0x85a   : > { %7771 = vst [vmem:[%s13729_s29 + $0x50] sm:$0xff] %v7755_v53  ;;  %7770 = vst [vmem:[%s13729_s29 + $0x48] sm:$0xff] %v7754_v1  ;;  %v7759_v37 = vadd.f32 %v8821_v48, %v13713_v50  ;;  %v7758_v43 = vadd.f32 %v8800_v57, %v13717_v36 }
 0x85b   : > { %7772 = vst [vmem:[%s13729_s29 + $0x58] sm:$0xff] %v7756_v39  ;;  %7773 = vst [vmem:[%s13729_s29 + $0x60] sm:$0xff] %v7757_v16  ;;  %v7760_v59 = vadd.f32 %v8824_v42, %v13722_v38 }
 0x85c   : > { %7775 = vst [vmem:[%s13729_s29 + $0x70] sm:$0xff] %v7759_v37  ;;  %7774 = vst [vmem:[%s13729_s29 + $0x68] sm:$0xff] %v7758_v43 }
 0x85d   : > { %7776 = vst [vmem:[%s13729_s29 + $0x78] sm:$0xff] %v7760_v59 }
 0x85e   : > { %10021 = shalt.err (!%p10018_p3)
}
 0x85f   : > { %s10022_s24 = scalar_lea.hbm %s13769_s17, 2048  ;;  %s10026_s27 = scalar_lea.hbm %s13837_s15, 4096 }
 0x860   : > { %p10023_p4 = scmp.ne.s32.totalorder %s13769_s17, %s10022_s24  ;;  %p10027_p9 = scmp.lt.u32.totalorder %s13769_s17, %s13837_s15 }
 0x861   : > { %p10028_p10 = scmp.lt.u32.totalorder %s10026_s27, %s10022_s24  ;;  %p10030_p12 = scmp.lt.u32.totalorder %s10022_s24, %s13769_s17 }
 0x862   : > { %p10024_p7 = pnand %p10023_p4, %p10195_p5 }
 0x863   : > { %p10029_p11 = por %p10028_p10, %p10027_p9 }
 0x864   : > { %p10025_p8 = pneg %p10024_p7 }
 0x865   : > { %p10031_p13 = por %p10030_p12, %p10029_p11 }
 0x867   : > { %p10032_p0 = pnand %p10031_p13, %p10025_p8 }
 0x869   : > { %10035 = shalt.err (!%p10032_p0)
}
 0x86a   : > { %s10075_s22 = smov 512   ;;  %s10076_s16 = smov 32  }
 0x86b   : > { %8889 = dma.vmem_to_hbm [thread:$0]  (%p10195_p5), %s13771_s30, 2048, %s13769_s17, %s13781_s23, %s10075_s22, %s10075_s22, %s10076_s16  }
 0x86c PF: > { %s13963_s26 = sld [smem:[#allocation7_spill]]  ;;  %s13964_s25 = sld [smem:[#allocation5_spill]] }
 0x872   : > { %p8895_p1 = scmp.ge.s32.totalorder %s13963_s26, 2  ;;  %s7807_s20 = sand.u32 1, %s13964_s25  }
 0x873   : > { %s7808_s24 = scalar_lea.sflag [#allocation3], %s7807_s20 }
 0x874   : > { %p8892_p2 = pnand %p8895_p1, %p10199_p6 }
 0x876   : > { %10053 = dma.done.wait (!%p8892_p2), %s7808_s24, 2048  }
 0x877   : > { %10055 = vsyncadd (!%p8892_p2), %s7808_s24, 4294965248  ;;  %s13966_s21 = sld [smem:[#allocation8_spill]]  ;;  %s13967_s2 = sld [smem:[#allocation6_spill]] }
 0x878   : > { %s13968_s20 = sld [smem:[#allocation9_spill]]  ;;  %s13969_s18 = smov %s10062_s19 }
 0x87d   : > { %p25_p3 = scmp.ge.s32.totalorder %s13966_s21, 4   ;;  %s13970_s19 = smov %s13967_s2 }
 0x87f   :  { %27 = sbr.rel (!%p25_p3) target bundleno = 6 (0x6), region = 118 }
 0x886   :  { %7813 = vsyncpa [#allocation3], 1 }
 0x887   :  { %7815 = vsyncpa [#allocation3 + $0x1], 1 }

</bundles_post_ra>
